<compile_context>
chip_gen: v7x
topology: tpu7x:2x2x1
jax: 0.10.0
libtpu: 0.0.40
codegen_flags: <defaults>
</compile_context>

<pallas_src>
import functools

import jax
import jax.numpy as jnp
import numpy as np
from jax.experimental import pallas as pl
from jax.experimental.pallas import tpu as pltpu

EPS = 1e-5
NEG_SLOPE = 0.1
_VMEM_LIMIT = 64 * 1024 * 1024   # fits v7x (64 MiB physical); v5e/v6e have 128 MiB


def _leaky(v):
    return jnp.where(v > 0, v, NEG_SLOPE * v)


def _largest_divisor(total, target, multiple_of=8):
    """Largest divisor of `total` that is <= target and a multiple of `multiple_of`;
    falls back to `total` (single tile, block == full dim) if none exists."""
    for d in range(min(target, total), 0, -1):
        if total % d == 0 and d % multiple_of == 0:
            return d
    return total


# -------- pass 1: conv1 (1x1) -> per-tile partial BN1 statistics --------------
def _conv1_stats_kernel(x_ref, w1_ref, st_ref):
    # x_ref: (TM, Cin)   w1_ref: (Cin, C0)   st_ref: (1, 2, C0)
    z = jnp.dot(x_ref[...], w1_ref[...], preferred_element_type=jnp.float32)
    c0 = z.shape[1]
    st_ref[:, 0:1, :] = jnp.sum(z, axis=0, keepdims=True).reshape(1, 1, c0)
    st_ref[:, 1:2, :] = jnp.sum(z * z, axis=0, keepdims=True).reshape(1, 1, c0)


# -------- pass 2: conv1 + BN1 affine + leaky + conv2 (3x3) + partial BN2 stats --
def _conv2_stats_kernel(x_ref, w1_ref, s1_ref, t1_ref, w2_ref,
                        z2_ref, st2_ref, pad_ref, *, H, W):
    # x_ref:  (H*W, Cin)      one image, rows flattened (pixels on sublanes)
    # w1_ref: (Cin, C0)       1x1 conv weight as a channel matmul
    # s1/t1:  (1, C0)         folded BN1 scale / shift
    # w2_ref: (3, 3, C0, C1)  3x3 conv weight (HWIO)
    # z2_ref: (H*W, C1)       raw conv2 output (pre-BN2)
    # st2_ref:(1, 2, C1)      per-image partial [sum, sum_sq] of conv2 output
    # pad_ref:(H+2, W+2, C0)  VMEM scratch for the zero-padded activation
    c0 = w1_ref.shape[1]
    c1 = w2_ref.shape[3]

    # conv1 (1x1) + BN1 affine + leaky
    z1 = jnp.dot(x_ref[...], w1_ref[...], preferred_element_type=jnp.float32)
    a1 = _leaky(z1 * s1_ref[...] + t1_ref[...])                 # (H*W, C0)

    # Halo-only zeroing: O(border) work instead of a full-slab zero pass.
    # (Re-zeroed every grid step so it is also correct when the "parallel"
    # axis is split across TensorCores.)
    pad_ref[0:1, :, :] = jnp.zeros((1, W + 2, c0), jnp.float32)
    pad_ref[H + 1:H + 2, :, :] = jnp.zeros((1, W + 2, c0), jnp.float32)
    pad_ref[:, 0:1, :] = jnp.zeros((H + 2, 1, c0), jnp.float32)
    pad_ref[:, W + 1:W + 2, :] = jnp.zeros((H + 2, 1, c0), jnp.float32)
    pad_ref[1:H + 1, 1:W + 1, :] = a1.reshape(H, W, c0)

    # 3x3 conv as 9 shifted channel matmuls accumulated in f32.
    # TODO(synk): fuse the 9 taps into one im2col matmul (K = 9*C0) once a
    # lane-dim concatenate of sub-128 channel slabs lowers reliably.
    acc = jnp.zeros((H * W, c1), dtype=jnp.float32)
    for ky in range(3):
        for kx in range(3):
            patch = pad_ref[ky:ky + H, kx:kx + W, :].reshape(H * W, c0)
            acc = acc + jnp.dot(patch, w2_ref[ky, kx],
                                preferred_element_type=jnp.float32)

    z2_ref[...] = acc
    st2_ref[:, 0:1, :] = jnp.sum(acc, axis=0, keepdims=True).reshape(1, 1, c1)
    st2_ref[:, 1:2, :] = jnp.sum(acc * acc, axis=0, keepdims=True).reshape(1, 1, c1)


# -------- pass 3: BN2 affine + residual + leaky (lane-dense layout) ------------
def _bn2_residual_kernel(z2_ref, x_ref, sc_ref, sh_ref, o_ref):
    # all refs lane-dense 2D: (TR, W*C1); sc/sh are broadcast rows (1, W*C1)
    y = z2_ref[...] * sc_ref[...] + sh_ref[...] + x_ref[...]
    o_ref[...] = _leaky(y)


def basic_res_block(x_nchw, w1, g1, b1, w2, g2, b2):
    """x_nchw: (N, Cin, H, W).  w1: (C0, Cin, 1, 1), w2: (C1, C0, 3, 3) (PyTorch OIHW).
    g*/b*: BatchNorm gamma/beta, shapes (C0,), (C1,)."""
    N, Cin, H, W = x_nchw.shape
    C0 = w1.shape[0]
    C1 = w2.shape[0]
    assert C1 == Cin, "residual add requires planes[1] == inplanes"

    f32 = jnp.float32
    x_nhwc = jnp.transpose(x_nchw, (0, 2, 3, 1)).astype(f32)      # (N, H, W, Cin)
    x2d = x_nhwc.reshape(N * H * W, Cin)                          # free row-major view
    w1k = jnp.transpose(w1[:, :, 0, 0], (1, 0)).astype(f32)       # (Cin, C0)
    w2k = jnp.transpose(w2, (2, 3, 1, 0)).astype(f32)             # (3, 3, C0, C1)

    M = N * H * W
    HW = H * W
    cparams = pltpu.CompilerParams(dimension_semantics=("parallel",),
                                   vmem_limit_bytes=_VMEM_LIMIT)

    # ---- pass 1: partial BN1 stats of conv1 output (z1 never hits HBM) ----
    TM = _largest_divisor(M, 256)          # MXU-friendly M tile (multiple of 128 here)
    GM = M // TM
    st1 = pl.pallas_call(
        _conv1_stats_kernel,
        grid=(GM,),
        in_specs=[pl.BlockSpec((TM, Cin), lambda i: (i, 0)),
                  pl.BlockSpec((Cin, C0), lambda i: (0, 0))],
        out_specs=pl.BlockSpec((1, 2, C0), lambda i: (i, 0, 0)),
        out_shape=jax.ShapeDtypeStruct((GM, 2, C0), f32),
        compiler_params=cparams,
    )(x2d, w1k)
    mu1 = jnp.sum(st1[:, 0, :], axis=0) / M
    var1 = jnp.maximum(jnp.sum(st1[:, 1, :], axis=0) / M - mu1 * mu1, 0.0)
    scale1 = g1.astype(f32) * jax.lax.rsqrt(var1 + EPS)
    shift1 = b1.astype(f32) - mu1 * scale1

    # ---- pass 2: conv1 + BN1 + leaky + conv2 (3x3) + partial BN2 stats ----
    kernel2 = functools.partial(_conv2_stats_kernel, H=H, W=W)
    z2, st2 = pl.pallas_call(
        kernel2,
        grid=(N,),
        in_specs=[pl.BlockSpec((HW, Cin), lambda n: (n, 0)),
                  pl.BlockSpec((Cin, C0), lambda n: (0, 0)),
                  pl.BlockSpec((1, C0), lambda n: (0, 0)),
                  pl.BlockSpec((1, C0), lambda n: (0, 0)),
                  pl.BlockSpec((3, 3, C0, C1), lambda n: (0, 0, 0, 0))],
        out_specs=(pl.BlockSpec((HW, C1), lambda n: (n, 0)),
                   pl.BlockSpec((1, 2, C1), lambda n: (n, 0, 0))),
        out_shape=(jax.ShapeDtypeStruct((M, C1), f32),
                   jax.ShapeDtypeStruct((N, 2, C1), f32)),
        scratch_shapes=[pltpu.VMEM((H + 2, W + 2, C0), f32)],
        compiler_params=cparams,
    )(x2d, w1k, scale1.reshape(1, C0), shift1.reshape(1, C0), w2k)
    mu2 = jnp.sum(st2[:, 0, :], axis=0) / M
    var2 = jnp.maximum(jnp.sum(st2[:, 1, :], axis=0) / M - mu2 * mu2, 0.0)
    scale2 = g2.astype(f32) * jax.lax.rsqrt(var2 + EPS)
    shift2 = b2.astype(f32) - mu2 * scale2

    # ---- pass 3: BN2 affine + residual + leaky, lane-dense (N*H, W*C1) view ----
    WC = W * C1
    R = N * H
    TR = _largest_divisor(R, 256)
    z2_ld = z2.reshape(R, WC)              # free row-major views of NHWC
    x_ld = x_nhwc.reshape(R, WC)
    sc_ld = jnp.tile(scale2, W).reshape(1, WC)
    sh_ld = jnp.tile(shift2, W).reshape(1, WC)
    out_ld = pl.pallas_call(
        _bn2_residual_kernel,
        grid=(R // TR,),
        in_specs=[pl.BlockSpec((TR, WC), lambda i: (i, 0)),
                  pl.BlockSpec((TR, WC), lambda i: (i, 0)),
                  pl.BlockSpec((1, WC), lambda i: (0, 0)),
                  pl.BlockSpec((1, WC), lambda i: (0, 0))],
        out_specs=pl.BlockSpec((TR, WC), lambda i: (i, 0)),
        out_shape=jax.ShapeDtypeStruct((R, WC), f32),
        compiler_params=cparams,
    )(z2_ld, x_ld, sc_ld, sh_ld)

    out = out_ld.reshape(N, H, W, C1)
    return jnp.transpose(out, (0, 3, 1, 2))                       # back to NCHW


# ---------------- pure-JAX reference (for correctness check) ----------------
def _bn_ref(y, gamma, beta):
    mu = jnp.mean(y, axis=(0, 2, 3), keepdims=True)
    var = jnp.mean((y - mu) ** 2, axis=(0, 2, 3), keepdims=True)
    return ((y - mu) * jax.lax.rsqrt(var + EPS)
            * gamma.reshape(1, -1, 1, 1) + beta.reshape(1, -1, 1, 1))


def reference(x, w1, g1, b1, w2, g2, b2):
    dn = ('NCHW', 'OIHW', 'NCHW')
    y = jax.lax.conv_general_dilated(x, w1, (1, 1), 'VALID', dimension_numbers=dn,
                                     precision=jax.lax.Precision.HIGHEST)
    y = _leaky(_bn_ref(y, g1, b1))
    y = jax.lax.conv_general_dilated(y, w2, (1, 1), ((1, 1), (1, 1)),
                                     dimension_numbers=dn,
                                     precision=jax.lax.Precision.HIGHEST)
    y = _bn_ref(y, g2, b2)
    y = y + x
    return _leaky(y)


if __name__ == "__main__":
    key = jax.random.PRNGKey(0)
    ks = jax.random.split(key, 7)

    N, Cin, H, W = 2, 8, 16, 16
    planes = (4, 8)                      # planes[1] must equal inplanes for the residual

    x = jax.random.normal(ks[0], (N, Cin, H, W), jnp.float32)
    w1 = 0.1 * jax.random.normal(ks[1], (planes[0], Cin, 1, 1), jnp.float32)
    g1 = 1.0 + 0.1 * jax.random.normal(ks[2], (planes[0],), jnp.float32)
    b1 = 0.1 * jax.random.normal(ks[3], (planes[0],), jnp.float32)
    w2 = 0.1 * jax.random.normal(ks[4], (planes[1], planes[0], 3, 3), jnp.float32)
    g2 = 1.0 + 0.1 * jax.random.normal(ks[5], (planes[1],), jnp.float32)
    b2 = 0.1 * jax.random.normal(ks[6], (planes[1],), jnp.float32)

    fwd = jax.jit(basic_res_block)
    out = jax.block_until_ready(fwd(x, w1, g1, b1, w2, g2, b2))

    ref = jax.block_until_ready(reference(x, w1, g1, b1, w2, g2, b2))
    np.testing.assert_allclose(np.asarray(out), np.asarray(ref), rtol=2e-2, atol=2e-2)

    print("KERNEL_OK")
</pallas_src>

<mosaic_0001>
module attributes {stable_mosaic.version = 11 : i64} {
  func.func @_conv1_stats_kernel(%arg0: i32, %arg1: memref<256x8xf32, #tpu.memory_space<vmem>>, %arg2: memref<8x4xf32, #tpu.memory_space<vmem>>, %arg3: memref<1x2x4xf32, #tpu.memory_space<vmem>>) attributes {dimension_semantics = [#tpu.dimension_semantics<parallel>], iteration_bounds = array<i64: 2>, scalar_prefetch = 0 : i64, scratch_operands = 0 : i64, tpu.core_type = #tpu.core_type<tc>, window_params = [{transform_indices = @transform_0, window_bounds = array<i64: 256, 8>}, {pipeline_mode = #tpu.pipeline_mode<synchronous>, transform_indices = @transform_1, window_bounds = array<i64: 8, 4>}, {transform_indices = @transform_2, window_bounds = array<i64: 1, 2, 4>}]} {
    %c0 = arith.constant 0 : index
    %c0_0 = arith.constant 0 : index
    %0 = vector.load %arg1[%c0, %c0_0] : memref<256x8xf32, #tpu.memory_space<vmem>>, vector<256x8xf32>
    %c0_1 = arith.constant 0 : index
    %c0_2 = arith.constant 0 : index
    %1 = vector.load %arg2[%c0_1, %c0_2] : memref<8x4xf32, #tpu.memory_space<vmem>>, vector<8x4xf32>
    %cst = arith.constant dense<0.000000e+00> : vector<256x4xf32>
    %2 = tpu.matmul %0, %1, %cst {dimension_numbers = #tpu.dot_dimension_numbers<[1], [0], [0], [1], [0, 0, 1, 1], [], []>} : vector<256x8xf32>, vector<8x4xf32>, vector<256x4xf32> -> vector<256x4xf32>
    %cst_3 = arith.constant dense<0.000000e+00> : vector<4xf32>
    %3 = vector.multi_reduction <add>, %2, %cst_3 [0] : vector<256x4xf32> to vector<4xf32>
    %4 = vector.shape_cast %3 : vector<4xf32> to vector<1x4xf32>
    %5 = vector.shape_cast %4 : vector<1x4xf32> to vector<1x1x4xf32>
    %c0_4 = arith.constant 0 : index
    %c0_5 = arith.constant 0 : index
    %c0_6 = arith.constant 0 : index
    %6 = vector.load %arg3[%c0_4, %c0_5, %c0_6] : memref<1x2x4xf32, #tpu.memory_space<vmem>>, vector<1x1x4xf32>
    tpu.vector_store %arg3[%c0_4, %c0_5, %c0_6], %5 {strides = array<i32>} : memref<1x2x4xf32, #tpu.memory_space<vmem>>, vector<1x1x4xf32>,
    %7 = arith.mulf %2, %2 : vector<256x4xf32>
    %cst_7 = arith.constant dense<0.000000e+00> : vector<4xf32>
    %8 = vector.multi_reduction <add>, %7, %cst_7 [0] : vector<256x4xf32> to vector<4xf32>
    %9 = vector.shape_cast %8 : vector<4xf32> to vector<1x4xf32>
    %10 = vector.shape_cast %9 : vector<1x4xf32> to vector<1x1x4xf32>
    %c0_8 = arith.constant 0 : index
    %c1 = arith.constant 1 : index
    %c0_9 = arith.constant 0 : index
    %11 = vector.load %arg3[%c0_8, %c1, %c0_9] : memref<1x2x4xf32, #tpu.memory_space<vmem>>, vector<1x1x4xf32>
    tpu.vector_store %arg3[%c0_8, %c1, %c0_9], %10 {strides = array<i32>} : memref<1x2x4xf32, #tpu.memory_space<vmem>>, vector<1x1x4xf32>,
    return
  }
  func.func @transform_0(%arg0: i32) -> (i32, i32) {
    %c0_i32 = arith.constant 0 : i32
    %c0_i32_0 = arith.constant 0 : i32
    return %arg0, %c0_i32 : i32, i32
  }
  func.func @transform_1(%arg0: i32) -> (i32, i32) {
    %c0_i32 = arith.constant 0 : i32
    %c0_i32_0 = arith.constant 0 : i32
    %c0_i32_1 = arith.constant 0 : i32
    return %c0_i32, %c0_i32_0 : i32, i32
  }
  func.func @transform_2(%arg0: i32) -> (i32, i32, i32) {
    %c0_i32 = arith.constant 0 : i32
    %c0_i32_0 = arith.constant 0 : i32
    %c0_i32_1 = arith.constant 0 : i32
    return %arg0, %c0_i32, %c0_i32_0 : i32, i32, i32
  }
}

module attributes {stable_mosaic.version = 11 : i64} {
  func.func @_conv2_stats_kernel(%arg0: i32, %arg1: memref<256x8xf32, #tpu.memory_space<vmem>>, %arg2: memref<8x4xf32, #tpu.memory_space<vmem>>, %arg3: memref<1x4xf32, #tpu.memory_space<vmem>>, %arg4: memref<1x4xf32, #tpu.memory_space<vmem>>, %arg5: memref<3x3x4x8xf32, #tpu.memory_space<vmem>>, %arg6: memref<256x8xf32, #tpu.memory_space<vmem>>, %arg7: memref<1x2x8xf32, #tpu.memory_space<vmem>>, %arg8: memref<18x18x4xf32, #tpu.memory_space<vmem>>) attributes {dimension_semantics = [#tpu.dimension_semantics<parallel>], iteration_bounds = array<i64: 2>, scalar_prefetch = 0 : i64, scratch_operands = 1 : i64, tpu.core_type = #tpu.core_type<tc>, window_params = [{transform_indices = @transform_0, window_bounds = array<i64: 256, 8>}, {pipeline_mode = #tpu.pipeline_mode<synchronous>, transform_indices = @transform_1, window_bounds = array<i64: 8, 4>}, {pipeline_mode = #tpu.pipeline_mode<synchronous>, transform_indices = @transform_2, window_bounds = array<i64: 1, 4>}, {pipeline_mode = #tpu.pipeline_mode<synchronous>, transform_indices = @transform_3, window_bounds = array<i64: 1, 4>}, {pipeline_mode = #tpu.pipeline_mode<synchronous>, transform_indices = @transform_4, window_bounds = array<i64: 3, 3, 4, 8>}, {transform_indices = @transform_5, window_bounds = array<i64: 256, 8>}, {transform_indices = @transform_6, window_bounds = array<i64: 1, 2, 8>}]} {
    %c0 = arith.constant 0 : index
    %c0_0 = arith.constant 0 : index
    %0 = vector.load %arg1[%c0, %c0_0] : memref<256x8xf32, #tpu.memory_space<vmem>>, vector<256x8xf32>
    %c0_1 = arith.constant 0 : index
    %c0_2 = arith.constant 0 : index
    %1 = vector.load %arg2[%c0_1, %c0_2] : memref<8x4xf32, #tpu.memory_space<vmem>>, vector<8x4xf32>
    %cst = arith.constant dense<0.000000e+00> : vector<256x4xf32>
    %2 = tpu.matmul %0, %1, %cst {dimension_numbers = #tpu.dot_dimension_numbers<[1], [0], [0], [1], [0, 0, 1, 1], [], []>} : vector<256x8xf32>, vector<8x4xf32>, vector<256x4xf32> -> vector<256x4xf32>
    %c0_3 = arith.constant 0 : index
    %c0_4 = arith.constant 0 : index
    %3 = vector.load %arg3[%c0_3, %c0_4] : memref<1x4xf32, #tpu.memory_space<vmem>>, vector<1x4xf32>
    %4 = vector.broadcast %3 : vector<1x4xf32> to vector<256x4xf32>
    %5 = arith.mulf %2, %4 : vector<256x4xf32>
    %c0_5 = arith.constant 0 : index
    %c0_6 = arith.constant 0 : index
    %6 = vector.load %arg4[%c0_5, %c0_6] : memref<1x4xf32, #tpu.memory_space<vmem>>, vector<1x4xf32>
    %7 = vector.broadcast %6 : vector<1x4xf32> to vector<256x4xf32>
    %8 = arith.addf %5, %7 : vector<256x4xf32>
    %cst_7 = arith.constant 0.000000e+00 : f32
    %9 = vector.broadcast %cst_7 : f32 to vector<256x4xf32>
    %10 = arith.cmpf ogt, %8, %9 : vector<256x4xf32>
    %cst_8 = arith.constant 1.000000e-01 : f32
    %11 = vector.broadcast %cst_8 : f32 to vector<256x4xf32>
    %12 = arith.mulf %11, %8 : vector<256x4xf32>
    %13 = arith.select %10, %8, %12 : vector<256x4xi1>, vector<256x4xf32>
    %cst_9 = arith.constant 0.000000e+00 : f32
    %14 = vector.broadcast %cst_9 : f32 to vector<1x18x4xf32>
    %c0_10 = arith.constant 0 : index
    %c0_11 = arith.constant 0 : index
    %c0_12 = arith.constant 0 : index
    %15 = vector.load %arg8[%c0_10, %c0_11, %c0_12] : memref<18x18x4xf32, #tpu.memory_space<vmem>>, vector<1x18x4xf32>
    tpu.vector_store %arg8[%c0_10, %c0_11, %c0_12], %14 {strides = array<i32>} : memref<18x18x4xf32, #tpu.memory_space<vmem>>, vector<1x18x4xf32>,
    %cst_13 = arith.constant 0.000000e+00 : f32
    %16 = vector.broadcast %cst_13 : f32 to vector<1x18x4xf32>
    %c17 = arith.constant 17 : index
    %c0_14 = arith.constant 0 : index
    %c0_15 = arith.constant 0 : index
    %17 = vector.load %arg8[%c17, %c0_14, %c0_15] : memref<18x18x4xf32, #tpu.memory_space<vmem>>, vector<1x18x4xf32>
    tpu.vector_store %arg8[%c17, %c0_14, %c0_15], %16 {strides = array<i32>} : memref<18x18x4xf32, #tpu.memory_space<vmem>>, vector<1x18x4xf32>,
    %cst_16 = arith.constant 0.000000e+00 : f32
    %18 = vector.broadcast %cst_16 : f32 to vector<18x1x4xf32>
    %c0_17 = arith.constant 0 : index
    %c0_18 = arith.constant 0 : index
    %c0_19 = arith.constant 0 : index
    %19 = vector.load %arg8[%c0_17, %c0_18, %c0_19] : memref<18x18x4xf32, #tpu.memory_space<vmem>>, vector<18x1x4xf32>
    tpu.vector_store %arg8[%c0_17, %c0_18, %c0_19], %18 {strides = array<i32>} : memref<18x18x4xf32, #tpu.memory_space<vmem>>, vector<18x1x4xf32>,
    %cst_20 = arith.constant 0.000000e+00 : f32
    %20 = vector.broadcast %cst_20 : f32 to vector<18x1x4xf32>
    %c0_21 = arith.constant 0 : index
    %c17_22 = arith.constant 17 : index
    %c0_23 = arith.constant 0 : index
    %21 = vector.load %arg8[%c0_21, %c17_22, %c0_23] : memref<18x18x4xf32, #tpu.memory_space<vmem>>, vector<18x1x4xf32>
    tpu.vector_store %arg8[%c0_21, %c17_22, %c0_23], %20 {strides = array<i32>} : memref<18x18x4xf32, #tpu.memory_space<vmem>>, vector<18x1x4xf32>,
    %22 = vector.shape_cast %13 : vector<256x4xf32> to vector<16x16x4xf32>
    %c1 = arith.constant 1 : index
    %c1_24 = arith.constant 1 : index
    %c0_25 = arith.constant 0 : index
    %23 = vector.load %arg8[%c1, %c1_24, %c0_25] : memref<18x18x4xf32, #tpu.memory_space<vmem>>, vector<16x16x4xf32>
    tpu.vector_store %arg8[%c1, %c1_24, %c0_25], %22 {strides = array<i32>} : memref<18x18x4xf32, #tpu.memory_space<vmem>>, vector<16x16x4xf32>,
    %cst_26 = arith.constant 0.000000e+00 : f32
    %24 = vector.broadcast %cst_26 : f32 to vector<256x8xf32>
    %c0_27 = arith.constant 0 : index
    %c0_28 = arith.constant 0 : index
    %c0_29 = arith.constant 0 : index
    %25 = vector.load %arg8[%c0_27, %c0_28, %c0_29] : memref<18x18x4xf32, #tpu.memory_space<vmem>>, vector<16x16x4xf32>
    %26 = vector.shape_cast %25 : vector<16x16x4xf32> to vector<256x4xf32>
    %c0_30 = arith.constant 0 : index
    %c0_31 = arith.constant 0 : index
    %c0_32 = arith.constant 0 : index
    %c0_33 = arith.constant 0 : index
    %27 = vector.load %arg5[%c0_30, %c0_31, %c0_32, %c0_33] : memref<3x3x4x8xf32, #tpu.memory_space<vmem>>, vector<1x1x4x8xf32>
    %28 = vector.shape_cast %27 : vector<1x1x4x8xf32> to vector<4x8xf32>
    %cst_34 = arith.constant dense<0.000000e+00> : vector<256x8xf32>
    %29 = tpu.matmul %26, %28, %cst_34 {dimension_numbers = #tpu.dot_dimension_numbers<[1], [0], [0], [1], [0, 0, 1, 1], [], []>} : vector<256x4xf32>, vector<4x8xf32>, vector<256x8xf32> -> vector<256x8xf32>
    %30 = arith.addf %24, %29 : vector<256x8xf32>
    %c0_35 = arith.constant 0 : index
    %c1_36 = arith.constant 1 : index
    %c0_37 = arith.constant 0 : index
    %31 = vector.load %arg8[%c0_35, %c1_36, %c0_37] : memref<18x18x4xf32, #tpu.memory_space<vmem>>, vector<16x16x4xf32>
    %32 = vector.shape_cast %31 : vector<16x16x4xf32> to vector<256x4xf32>
    %c0_38 = arith.constant 0 : index
    %c1_39 = arith.constant 1 : index
    %c0_40 = arith.constant 0 : index
    %c0_41 = arith.constant 0 : index
    %33 = vector.load %arg5[%c0_38, %c1_39, %c0_40, %c0_41] : memref<3x3x4x8xf32, #tpu.memory_space<vmem>>, vector<1x1x4x8xf32>
    %34 = vector.shape_cast %33 : vector<1x1x4x8xf32> to vector<4x8xf32>
    %cst_42 = arith.constant dense<0.000000e+00> : vector<256x8xf32>
    %35 = tpu.matmul %32, %34, %cst_42 {dimension_numbers = #tpu.dot_dimension_numbers<[1], [0], [0], [1], [0, 0, 1, 1], [], []>} : vector<256x4xf32>, vector<4x8xf32>, vector<256x8xf32> -> vector<256x8xf32>
    %36 = arith.addf %30, %35 : vector<256x8xf32>
    %c0_43 = arith.constant 0 : index
    %c2 = arith.constant 2 : index
    %c0_44 = arith.constant 0 : index
    %37 = vector.load %arg8[%c0_43, %c2, %c0_44] : memref<18x18x4xf32, #tpu.memory_space<vmem>>, vector<16x16x4xf32>
    %38 = vector.shape_cast %37 : vector<16x16x4xf32> to vector<256x4xf32>
    %c0_45 = arith.constant 0 : index
    %c2_46 = arith.constant 2 : index
    %c0_47 = arith.constant 0 : index
    %c0_48 = arith.constant 0 : index
    %39 = vector.load %arg5[%c0_45, %c2_46, %c0_47, %c0_48] : memref<3x3x4x8xf32, #tpu.memory_space<vmem>>, vector<1x1x4x8xf32>
    %40 = vector.shape_cast %39 : vector<1x1x4x8xf32> to vector<4x8xf32>
    %cst_49 = arith.constant dense<0.000000e+00> : vector<256x8xf32>
    %41 = tpu.matmul %38, %40, %cst_49 {dimension_numbers = #tpu.dot_dimension_numbers<[1], [0], [0], [1], [0, 0, 1, 1], [], []>} : vector<256x4xf32>, vector<4x8xf32>, vector<256x8xf32> -> vector<256x8xf32>
    %42 = arith.addf %36, %41 : vector<256x8xf32>
    %c1_50 = arith.constant 1 : index
    %c0_51 = arith.constant 0 : index
    %c0_52 = arith.constant 0 : index
    %43 = vector.load %arg8[%c1_50, %c0_51, %c0_52] : memref<18x18x4xf32, #tpu.memory_space<vmem>>, vector<16x16x4xf32>
    %44 = vector.shape_cast %43 : vector<16x16x4xf32> to vector<256x4xf32>
    %c1_53 = arith.constant 1 : index
    %c0_54 = arith.constant 0 : index
    %c0_55 = arith.constant 0 : index
    %c0_56 = arith.constant 0 : index
    %45 = vector.load %arg5[%c1_53, %c0_54, %c0_55, %c0_56] : memref<3x3x4x8xf32, #tpu.memory_space<vmem>>, vector<1x1x4x8xf32>
    %46 = vector.shape_cast %45 : vector<1x1x4x8xf32> to vector<4x8xf32>
    %cst_57 = arith.constant dense<0.000000e+00> : vector<256x8xf32>
    %47 = tpu.matmul %44, %46, %cst_57 {dimension_numbers = #tpu.dot_dimension_numbers<[1], [0], [0], [1], [0, 0, 1, 1], [], []>} : vector<256x4xf32>, vector<4x8xf32>, vector<256x8xf32> -> vector<256x8xf32>
    %48 = arith.addf %42, %47 : vector<256x8xf32>
    %c1_58 = arith.constant 1 : index
    %c1_59 = arith.constant 1 : index
    %c0_60 = arith.constant 0 : index
    %49 = vector.load %arg8[%c1_58, %c1_59, %c0_60] : memref<18x18x4xf32, #tpu.memory_space<vmem>>, vector<16x16x4xf32>
    %50 = vector.shape_cast %49 : vector<16x16x4xf32> to vector<256x4xf32>
    %c1_61 = arith.constant 1 : index
    %c1_62 = arith.constant 1 : index
    %c0_63 = arith.constant 0 : index
    %c0_64 = arith.constant 0 : index
    %51 = vector.load %arg5[%c1_61, %c1_62, %c0_63, %c0_64] : memref<3x3x4x8xf32, #tpu.memory_space<vmem>>, vector<1x1x4x8xf32>
    %52 = vector.shape_cast %51 : vector<1x1x4x8xf32> to vector<4x8xf32>
    %cst_65 = arith.constant dense<0.000000e+00> : vector<256x8xf32>
    %53 = tpu.matmul %50, %52, %cst_65 {dimension_numbers = #tpu.dot_dimension_numbers<[1], [0], [0], [1], [0, 0, 1, 1], [], []>} : vector<256x4xf32>, vector<4x8xf32>, vector<256x8xf32> -> vector<256x8xf32>
    %54 = arith.addf %48, %53 : vector<256x8xf32>
    %c1_66 = arith.constant 1 : index
    %c2_67 = arith.constant 2 : index
    %c0_68 = arith.constant 0 : index
    %55 = vector.load %arg8[%c1_66, %c2_67, %c0_68] : memref<18x18x4xf32, #tpu.memory_space<vmem>>, vector<16x16x4xf32>
    %56 = vector.shape_cast %55 : vector<16x16x4xf32> to vector<256x4xf32>
    %c1_69 = arith.constant 1 : index
    %c2_70 = arith.constant 2 : index
    %c0_71 = arith.constant 0 : index
    %c0_72 = arith.constant 0 : index
    %57 = vector.load %arg5[%c1_69, %c2_70, %c0_71, %c0_72] : memref<3x3x4x8xf32, #tpu.memory_space<vmem>>, vector<1x1x4x8xf32>
    %58 = vector.shape_cast %57 : vector<1x1x4x8xf32> to vector<4x8xf32>
    %cst_73 = arith.constant dense<0.000000e+00> : vector<256x8xf32>
    %59 = tpu.matmul %56, %58, %cst_73 {dimension_numbers = #tpu.dot_dimension_numbers<[1], [0], [0], [1], [0, 0, 1, 1], [], []>} : vector<256x4xf32>, vector<4x8xf32>, vector<256x8xf32> -> vector<256x8xf32>
    %60 = arith.addf %54, %59 : vector<256x8xf32>
    %c2_74 = arith.constant 2 : index
    %c0_75 = arith.constant 0 : index
    %c0_76 = arith.constant 0 : index
    %61 = vector.load %arg8[%c2_74, %c0_75, %c0_76] : memref<18x18x4xf32, #tpu.memory_space<vmem>>, vector<16x16x4xf32>
    %62 = vector.shape_cast %61 : vector<16x16x4xf32> to vector<256x4xf32>
    %c2_77 = arith.constant 2 : index
    %c0_78 = arith.constant 0 : index
    %c0_79 = arith.constant 0 : index
    %c0_80 = arith.constant 0 : index
    %63 = vector.load %arg5[%c2_77, %c0_78, %c0_79, %c0_80] : memref<3x3x4x8xf32, #tpu.memory_space<vmem>>, vector<1x1x4x8xf32>
    %64 = vector.shape_cast %63 : vector<1x1x4x8xf32> to vector<4x8xf32>
    %cst_81 = arith.constant dense<0.000000e+00> : vector<256x8xf32>
    %65 = tpu.matmul %62, %64, %cst_81 {dimension_numbers = #tpu.dot_dimension_numbers<[1], [0], [0], [1], [0, 0, 1, 1], [], []>} : vector<256x4xf32>, vector<4x8xf32>, vector<256x8xf32> -> vector<256x8xf32>
    %66 = arith.addf %60, %65 : vector<256x8xf32>
    %c2_82 = arith.constant 2 : index
    %c1_83 = arith.constant 1 : index
    %c0_84 = arith.constant 0 : index
    %67 = vector.load %arg8[%c2_82, %c1_83, %c0_84] : memref<18x18x4xf32, #tpu.memory_space<vmem>>, vector<16x16x4xf32>
    %68 = vector.shape_cast %67 : vector<16x16x4xf32> to vector<256x4xf32>
    %c2_85 = arith.constant 2 : index
    %c1_86 = arith.constant 1 : index
    %c0_87 = arith.constant 0 : index
    %c0_88 = arith.constant 0 : index
    %69 = vector.load %arg5[%c2_85, %c1_86, %c0_87, %c0_88] : memref<3x3x4x8xf32, #tpu.memory_space<vmem>>, vector<1x1x4x8xf32>
    %70 = vector.shape_cast %69 : vector<1x1x4x8xf32> to vector<4x8xf32>
    %cst_89 = arith.constant dense<0.000000e+00> : vector<256x8xf32>
    %71 = tpu.matmul %68, %70, %cst_89 {dimension_numbers = #tpu.dot_dimension_numbers<[1], [0], [0], [1], [0, 0, 1, 1], [], []>} : vector<256x4xf32>, vector<4x8xf32>, vector<256x8xf32> -> vector<256x8xf32>
    %72 = arith.addf %66, %71 : vector<256x8xf32>
    %c2_90 = arith.constant 2 : index
    %c2_91 = arith.constant 2 : index
    %c0_92 = arith.constant 0 : index
    %73 = vector.load %arg8[%c2_90, %c2_91, %c0_92] : memref<18x18x4xf32, #tpu.memory_space<vmem>>, vector<16x16x4xf32>
    %74 = vector.shape_cast %73 : vector<16x16x4xf32> to vector<256x4xf32>
    %c2_93 = arith.constant 2 : index
    %c2_94 = arith.constant 2 : index
    %c0_95 = arith.constant 0 : index
    %c0_96 = arith.constant 0 : index
    %75 = vector.load %arg5[%c2_93, %c2_94, %c0_95, %c0_96] : memref<3x3x4x8xf32, #tpu.memory_space<vmem>>, vector<1x1x4x8xf32>
    %76 = vector.shape_cast %75 : vector<1x1x4x8xf32> to vector<4x8xf32>
    %cst_97 = arith.constant dense<0.000000e+00> : vector<256x8xf32>
    %77 = tpu.matmul %74, %76, %cst_97 {dimension_numbers = #tpu.dot_dimension_numbers<[1], [0], [0], [1], [0, 0, 1, 1], [], []>} : vector<256x4xf32>, vector<4x8xf32>, vector<256x8xf32> -> vector<256x8xf32>
    %78 = arith.addf %72, %77 : vector<256x8xf32>
    %c0_98 = arith.constant 0 : index
    %c0_99 = arith.constant 0 : index
    %79 = vector.load %arg6[%c0_98, %c0_99] : memref<256x8xf32, #tpu.memory_space<vmem>>, vector<256x8xf32>
    tpu.vector_store %arg6[%c0_98, %c0_99], %78 {strides = array<i32>} : memref<256x8xf32, #tpu.memory_space<vmem>>, vector<256x8xf32>,
    %cst_100 = arith.constant dense<0.000000e+00> : vector<8xf32>
    %80 = vector.multi_reduction <add>, %78, %cst_100 [0] : vector<256x8xf32> to vector<8xf32>
    %81 = vector.shape_cast %80 : vector<8xf32> to vector<1x8xf32>
    %82 = vector.shape_cast %81 : vector<1x8xf32> to vector<1x1x8xf32>
    %c0_101 = arith.constant 0 : index
    %c0_102 = arith.constant 0 : index
    %c0_103 = arith.constant 0 : index
    %83 = vector.load %arg7[%c0_101, %c0_102, %c0_103] : memref<1x2x8xf32, #tpu.memory_space<vmem>>, vector<1x1x8xf32>
    tpu.vector_store %arg7[%c0_101, %c0_102, %c0_103], %82 {strides = array<i32>} : memref<1x2x8xf32, #tpu.memory_space<vmem>>, vector<1x1x8xf32>,
    %84 = arith.mulf %78, %78 : vector<256x8xf32>
    %cst_104 = arith.constant dense<0.000000e+00> : vector<8xf32>
    %85 = vector.multi_reduction <add>, %84, %cst_104 [0] : vector<256x8xf32> to vector<8xf32>
    %86 = vector.shape_cast %85 : vector<8xf32> to vector<1x8xf32>
    %87 = vector.shape_cast %86 : vector<1x8xf32> to vector<1x1x8xf32>
    %c0_105 = arith.constant 0 : index
    %c1_106 = arith.constant 1 : index
    %c0_107 = arith.constant 0 : index
    %88 = vector.load %arg7[%c0_105, %c1_106, %c0_107] : memref<1x2x8xf32, #tpu.memory_space<vmem>>, vector<1x1x8xf32>
    tpu.vector_store %arg7[%c0_105, %c1_106, %c0_107], %87 {strides = array<i32>} : memref<1x2x8xf32, #tpu.memory_space<vmem>>, vector<1x1x8xf32>,
    return
  }
  func.func @transform_0(%arg0: i32) -> (i32, i32) {
    %c0_i32 = arith.constant 0 : i32
    %c0_i32_0 = arith.constant 0 : i32
    return %arg0, %c0_i32 : i32, i32
  }
  func.func @transform_1(%arg0: i32) -> (i32, i32) {
    %c0_i32 = arith.constant 0 : i32
    %c0_i32_0 = arith.constant 0 : i32
    %c0_i32_1 = arith.constant 0 : i32
    return %c0_i32, %c0_i32_0 : i32, i32
  }
  func.func @transform_2(%arg0: i32) -> (i32, i32) {
    %c0_i32 = arith.constant 0 : i32
    %c0_i32_0 = arith.constant 0 : i32
    %c0_i32_1 = arith.constant 0 : i32
    return %c0_i32, %c0_i32_0 : i32, i32
  }
  func.func @transform_3(%arg0: i32) -> (i32, i32) {
    %c0_i32 = arith.constant 0 : i32
    %c0_i32_0 = arith.constant 0 : i32
    %c0_i32_1 = arith.constant 0 : i32
    return %c0_i32, %c0_i32_0 : i32, i32
  }
  func.func @transform_4(%arg0: i32) -> (i32, i32, i32, i32) {
    %c0_i32 = arith.constant 0 : i32
    %c0_i32_0 = arith.constant 0 : i32
    %c0_i32_1 = arith.constant 0 : i32
    %c0_i32_2 = arith.constant 0 : i32
    %c0_i32_3 = arith.constant 0 : i32
    return %c0_i32, %c0_i32_0, %c0_i32_1, %c0_i32_2 : i32, i32, i32, i32
  }
  func.func @transform_5(%arg0: i32) -> (i32, i32) {
    %c0_i32 = arith.constant 0 : i32
    %c0_i32_0 = arith.constant 0 : i32
    return %arg0, %c0_i32 : i32, i32
  }
  func.func @transform_6(%arg0: i32) -> (i32, i32, i32) {
    %c0_i32 = arith.constant 0 : i32
    %c0_i32_0 = arith.constant 0 : i32
    %c0_i32_1 = arith.constant 0 : i32
    return %arg0, %c0_i32, %c0_i32_0 : i32, i32, i32
  }
}

module attributes {stable_mosaic.version = 11 : i64} {
  func.func @_bn2_residual_kernel(%arg0: i32, %arg1: memref<32x128xf32, #tpu.memory_space<vmem>>, %arg2: memref<32x128xf32, #tpu.memory_space<vmem>>, %arg3: memref<1x128xf32, #tpu.memory_space<vmem>>, %arg4: memref<1x128xf32, #tpu.memory_space<vmem>>, %arg5: memref<32x128xf32, #tpu.memory_space<vmem>>) attributes {dimension_semantics = [#tpu.dimension_semantics<parallel>], iteration_bounds = array<i64: 1>, scalar_prefetch = 0 : i64, scratch_operands = 0 : i64, tpu.core_type = #tpu.core_type<tc>, window_params = [{transform_indices = @transform_0, window_bounds = array<i64: 32, 128>}, {transform_indices = @transform_1, window_bounds = array<i64: 32, 128>}, {pipeline_mode = #tpu.pipeline_mode<synchronous>, transform_indices = @transform_2, window_bounds = array<i64: 1, 128>}, {pipeline_mode = #tpu.pipeline_mode<synchronous>, transform_indices = @transform_3, window_bounds = array<i64: 1, 128>}, {transform_indices = @transform_4, window_bounds = array<i64: 32, 128>}]} {
    %c0 = arith.constant 0 : index
    %c0_0 = arith.constant 0 : index
    %0 = vector.load %arg1[%c0, %c0_0] : memref<32x128xf32, #tpu.memory_space<vmem>>, vector<32x128xf32>
    %c0_1 = arith.constant 0 : index
    %c0_2 = arith.constant 0 : index
    %1 = vector.load %arg3[%c0_1, %c0_2] : memref<1x128xf32, #tpu.memory_space<vmem>>, vector<1x128xf32>
    %2 = vector.broadcast %1 : vector<1x128xf32> to vector<32x128xf32>
    %3 = arith.mulf %0, %2 : vector<32x128xf32>
    %c0_3 = arith.constant 0 : index
    %c0_4 = arith.constant 0 : index
    %4 = vector.load %arg4[%c0_3, %c0_4] : memref<1x128xf32, #tpu.memory_space<vmem>>, vector<1x128xf32>
    %5 = vector.broadcast %4 : vector<1x128xf32> to vector<32x128xf32>
    %6 = arith.addf %3, %5 : vector<32x128xf32>
    %c0_5 = arith.constant 0 : index
    %c0_6 = arith.constant 0 : index
    %7 = vector.load %arg2[%c0_5, %c0_6] : memref<32x128xf32, #tpu.memory_space<vmem>>, vector<32x128xf32>
    %8 = arith.addf %6, %7 : vector<32x128xf32>
    %cst = arith.constant 0.000000e+00 : f32
    %9 = vector.broadcast %cst : f32 to vector<32x128xf32>
    %10 = arith.cmpf ogt, %8, %9 : vector<32x128xf32>
    %cst_7 = arith.constant 1.000000e-01 : f32
    %11 = vector.broadcast %cst_7 : f32 to vector<32x128xf32>
    %12 = arith.mulf %11, %8 : vector<32x128xf32>
    %13 = arith.select %10, %8, %12 : vector<32x128xi1>, vector<32x128xf32>
    %c0_8 = arith.constant 0 : index
    %c0_9 = arith.constant 0 : index
    %14 = vector.load %arg5[%c0_8, %c0_9] : memref<32x128xf32, #tpu.memory_space<vmem>>, vector<32x128xf32>
    tpu.vector_store %arg5[%c0_8, %c0_9], %13 {strides = array<i32>} : memref<32x128xf32, #tpu.memory_space<vmem>>, vector<32x128xf32>,
    return
  }
  func.func @transform_0(%arg0: i32) -> (i32, i32) {
    %c0_i32 = arith.constant 0 : i32
    %c0_i32_0 = arith.constant 0 : i32
    return %arg0, %c0_i32 : i32, i32
  }
  func.func @transform_1(%arg0: i32) -> (i32, i32) {
    %c0_i32 = arith.constant 0 : i32
    %c0_i32_0 = arith.constant 0 : i32
    return %arg0, %c0_i32 : i32, i32
  }
  func.func @transform_2(%arg0: i32) -> (i32, i32) {
    %c0_i32 = arith.constant 0 : i32
    %c0_i32_0 = arith.constant 0 : i32
    %c0_i32_1 = arith.constant 0 : i32
    return %c0_i32, %c0_i32_0 : i32, i32
  }
  func.func @transform_3(%arg0: i32) -> (i32, i32) {
    %c0_i32 = arith.constant 0 : i32
    %c0_i32_0 = arith.constant 0 : i32
    %c0_i32_1 = arith.constant 0 : i32
    return %c0_i32, %c0_i32_0 : i32, i32
  }
  func.func @transform_4(%arg0: i32) -> (i32, i32) {
    %c0_i32 = arith.constant 0 : i32
    %c0_i32_0 = arith.constant 0 : i32
    return %arg0, %c0_i32 : i32, i32
  }
}

</mosaic_0001>

<bundles_post_ra>
// kernel: tile.13
= control target key start
LH: loop header
LB: loop body
LE: loop exit
PB: predicated region body
PF: predicated region fallthrough
CT: control target
= control target key end

     0   :  { %s28_s0 = inlined_call_operand.vmem [shape: f32[8], index: 0, kind: input, shape index: {}]   ;;  %s29_s1 = inlined_call_operand.vmem [shape: f32[16,8], index: 1, kind: output, shape index: {}]  }
   0x1   :  { %v4_v0 = vld [vmem:[%s28_s0] ss:$0 sm:$0xff] }
   0x2   :  { %5 = vst [vmem:[%s29_s1] sm:$0xff] %v4_v0  ;;  %8 = vst [vmem:[%s29_s1 + $0x8] sm:$0xff] %v4_v0 }

// kernel: tile.14
= control target key start
LH: loop header
LB: loop body
LE: loop exit
PB: predicated region body
PF: predicated region fallthrough
CT: control target
= control target key end

     0   :  { %s167_s10 = smov 120   ;;  %s168_s11 = smov 104   ;;  %vm4_vm0 = vcmask 64512   ;;  %s253_s0 = inlined_call_operand.vmem [shape: f32[16,8], index: 0, kind: input, shape index: {}]   ;;  %s254_s1 = inlined_call_operand.hbm [shape: f32[1,128], index: 1, kind: output, shape index: {}]  }
   0x1   :  { %v112_v0 = vld [vmem:[%s253_s0 + $0xf] sm:$0x1]   ;;  %v114_v1 = vld [vmem:[%s253_s0 + $0xd] sm:$0x1]   ;;  %v113_v2 = vld [vmem:[%s253_s0 + $0xe] sm:$0x1]  }
   0x2   :  { %8 = vrot.lane.b32.xlu0 %v112_v0, %s167_s10  ;;  %20 = vrot.lane.b32.xlu1 %v114_v1, %s168_s11  ;;  %v115_v3 = vld [vmem:[%s253_s0 + $0xc] sm:$0x1]   ;;  %s169_s16 = smov 112   ;;  %s170_s17 = smov 96   ;;  %v116_v4 = vld [vmem:[%s253_s0 + $0xb] sm:$0x1]  }
   0x3   :  { %v117_v5 = vld [vmem:[%s253_s0 + $0xa] sm:$0x1]   ;;  %v3_v6 = vld [vmem:[%s253_s0] sm:$0x1]  }
   0x6   :  { %14 = vrot.lane.b32.xlu0 %v113_v2, %s169_s16  ;;  %26 = vrot.lane.b32.xlu1 %v115_v3, %s170_s17 }
   0x7   :  { %2 = vsyncpa [#allocation1], 0  ;;  %s171_s24 = smov 88   ;;  %s172_s25 = smov 80   ;;  %5 = vst.msk [vmem:[#allocation2] sm:$0x1] %vm4_vm0, %v3_v6  }
   0x8   :  { %v118_v7 = vld [vmem:[%s253_s0 + $0x9] sm:$0x1]   ;;  %v119_v8 = vld [vmem:[%s253_s0 + $0x8] sm:$0x1]   ;;  %s173_s30 = smov 72   ;;  %s174_s2 = smov 64  }
   0x9   :  { %v120_v9 = vld [vmem:[%s253_s0 + $0x7] sm:$0x1]   ;;  %v121_v10 = vld [vmem:[%s253_s0 + $0x6] sm:$0x1]   ;;  %s175_s7 = smov 56   ;;  %s176_s8 = smov 48  }
   0xa   :  { %32 = vrot.lane.b32.xlu0 %v116_v4, %s171_s24  ;;  %38 = vrot.lane.b32.xlu1 %v117_v5, %s172_s25  ;;  %v122_v11 = vld [vmem:[%s253_s0 + $0x5] sm:$0x1]   ;;  %v123_v12 = vld [vmem:[%s253_s0 + $0x4] sm:$0x1]   ;;  %s177_s13 = smov 40   ;;  %s178_s14 = smov 32  }
   0xb   :  { %v124_v13 = vld [vmem:[%s253_s0 + $0x3] sm:$0x1]   ;;  %v125_v14 = vld [vmem:[%s253_s0 + $0x2] sm:$0x1]   ;;  %s179_s19 = smov 24   ;;  %s180_s20 = smov 16  }
   0xc   :  { %v126_v15 = vld [vmem:[%s253_s0 + $0x1] sm:$0x1]   ;;  %s181_s0 = smov 8   ;;  %vm10_vm1 = vcmask 1048512   ;;  %vm16_vm2 = vcmask 982912   ;;  %vm22_vm3 = vcmask 917312  }
   0xd   :  { %vm28_vm4 = vcmask 851712   ;;  %vm34_vm5 = vcmask 786112   ;;  %vm40_vm6 = vcmask 720512   ;;  %vm46_vm7 = vcmask 654912   ;;  %s182_s23 = smov [#allocation0]  }
   0xe   :  { %44 = vrot.lane.b32.xlu0 %v118_v7, %s173_s30  ;;  %50 = vrot.lane.b32.xlu1 %v119_v8, %s174_s2  ;;  %vm52_vm8 = vcmask 589312   ;;  %vm58_vm9 = vcmask 523712   ;;  %vm64_vm10 = vcmask 458112   ;;  %vm70_vm11 = vcmask 392512   ;;  %s106_s24 = sshll.u32 %s182_s23, 4  ;;  %s107_s24 = int_to_ptr.vmem [resolvable:$true] %s106_s24 }
   0xf   :  { %vm76_vm12 = vcmask 326912   ;;  %vm82_vm13 = vcmask 261312   ;;  %vm88_vm14 = vcmask 195712   ;;  %vm94_vm15 = vcmask 130112   ;;  %s143_s25 = scalar_lea.vmem %s107_s24, 16  ;;  %s147_s26 = scalar_lea.vmem %s107_s24, 32 }
  0x10   :  { %p144_p0 = scmp.ne.s32.totalorder %s107_s24, %s143_s25  ;;  %p148_p1 = scmp.lt.s32.totalorder %s107_s24, %s107_s24 }
  0x11   :  { %p149_p2 = scmp.lt.s32.totalorder %s147_s26, %s143_s25 }
  0x12   :  { %56 = vrot.lane.b32.xlu0 %v120_v9, %s175_s7  ;;  %62 = vrot.lane.b32.xlu1 %v121_v10, %s176_s8 }
  0x13   :  { %p150_p3 = por %p149_p2, %p148_p1 }
  0x15   :  { %p151_p4 = pnand %p150_p3, %p144_p0 }
  0x16   :  { %68 = vrot.lane.b32.xlu0 %v122_v11, %s177_s13  ;;  %74 = vrot.lane.b32.xlu1 %v123_v12, %s178_s14 }
  0x1a   :  { %80 = vrot.lane.b32.xlu0 %v124_v13, %s179_s19  ;;  %86 = vrot.lane.b32.xlu1 %v125_v14, %s180_s20 }
  0x1e   :  { %92 = vrot.lane.b32.xlu0 %v126_v15, %s181_s0 }
  0x74   :  { %v9_v16 = vpop.permute.xlu0 %8   ;;  %v21_v17 = vpop.permute.xlu1 %20  }
  0x75   :  { %11 = vst.msk [vmem:[#allocation2] sm:$0x1] %vm10_vm1, %v9_v16  }
  0x78   :  { %v15_v18 = vpop.permute.xlu0 %14   ;;  %v27_v19 = vpop.permute.xlu1 %26  }
  0x79   :  { %17 = vst.msk [vmem:[#allocation2] sm:$0x1] %vm16_vm2, %v15_v18  }
  0x7a   :  { %23 = vst.msk [vmem:[#allocation2] sm:$0x1] %vm22_vm3, %v21_v17  }
  0x7b   :  { %29 = vst.msk [vmem:[#allocation2] sm:$0x1] %vm28_vm4, %v27_v19  }
  0x7c   :  { %v33_v20 = vpop.permute.xlu0 %32   ;;  %v39_v21 = vpop.permute.xlu1 %38  }
  0x7d   :  { %35 = vst.msk [vmem:[#allocation2] sm:$0x1] %vm34_vm5, %v33_v20  }
  0x7e   :  { %41 = vst.msk [vmem:[#allocation2] sm:$0x1] %vm40_vm6, %v39_v21  }
  0x80   :  { %v45_v22 = vpop.permute.xlu0 %44   ;;  %v51_v23 = vpop.permute.xlu1 %50  }
  0x81   :  { %47 = vst.msk [vmem:[#allocation2] sm:$0x1] %vm46_vm7, %v45_v22  }
  0x82   :  { %53 = vst.msk [vmem:[#allocation2] sm:$0x1] %vm52_vm8, %v51_v23  }
  0x84   :  { %v57_v24 = vpop.permute.xlu0 %56   ;;  %v63_v25 = vpop.permute.xlu1 %62  }
  0x85   :  { %59 = vst.msk [vmem:[#allocation2] sm:$0x1] %vm58_vm9, %v57_v24  }
  0x86   :  { %65 = vst.msk [vmem:[#allocation2] sm:$0x1] %vm64_vm10, %v63_v25  }
  0x88   :  { %v69_v26 = vpop.permute.xlu0 %68   ;;  %v75_v27 = vpop.permute.xlu1 %74  }
  0x89   :  { %71 = vst.msk [vmem:[#allocation2] sm:$0x1] %vm70_vm11, %v69_v26  }
  0x8a   :  { %77 = vst.msk [vmem:[#allocation2] sm:$0x1] %vm76_vm12, %v75_v27  }
  0x8c   :  { %v81_v28 = vpop.permute.xlu0 %80   ;;  %v87_v29 = vpop.permute.xlu1 %86  }
  0x8d   :  { %83 = vst.msk [vmem:[#allocation2] sm:$0x1] %vm82_vm13, %v81_v28  }
  0x8e   :  { %89 = vst.msk [vmem:[#allocation2] sm:$0x1] %vm88_vm14, %v87_v29  }
  0x90   :  { %v93_v30 = vpop.permute.xlu0 %92  }
  0x91   :  { %95 = vst.msk [vmem:[#allocation2] sm:$0x1] %vm94_vm15, %v93_v30  }
  0x98   :  { %v99_v31 = vld [vmem:[#allocation2] sm:$0x1] }
  0x99   :  { %101 = vst [vmem:[#allocation0] sm:$0x1] %v99_v31 }
  0x9a   :  { %154 = shalt.err (!%p151_p4)
}
  0x9b   :  { %s155_s29 = scalar_lea.hbm %s254_s1, 16 }
  0x9c   :  { %p156_p5 = scmp.ne.s32.totalorder %s254_s1, %s155_s29  ;;  %p159_p6 = scmp.lt.u32.totalorder %s155_s29, %s254_s1 }
  0x9e   :  { %p161_p7 = pnand %p159_p6, %p156_p5 }
  0xa0   :  { %164 = shalt.err (!%p161_p7)
}
  0xa1   :  { %109 = dma.vmem_to_hbm [thread:$0]  %s107_s24, 16, %s254_s1, [#allocation1]  }
  0xa2   :  { %165 = dma.done.wait [#allocation1], 16  }
  0xa3   :  { %166 = vsyncadd [#allocation1], 4294967280 }
  0xa4   :  { %111 = vsyncpa [#allocation1], 1 }

// kernel: basic_res_block.3
= control target key start
LH: loop header
LB: loop body
LE: loop exit
PB: predicated region body
PF: predicated region fallthrough
CT: control target
= control target key end

     0   :  { %7 = vsyncpa [#allocation3], 0  ;;  %s1548_s0 = inlined_call_operand.hbm [shape: f32[512,8], index: 0, kind: input, shape index: {}]   ;;  %s1549_s1 = inlined_call_operand.hbm [shape: f32[8,4], index: 1, kind: input, shape index: {}]   ;;  %s1550_s2 = inlined_call_operand.hbm [shape: f32[2,2,4], index: 2, kind: output, shape index: {}]  }
   0x1   :  { %9 = vsyncpa [#allocation3 + $0x1], 0 }
   0x2   :  { %10 = vsyncpa [#allocation6], 0 }
   0x3   :  { %11 = vsyncpa [#allocation4], 0 }
   0x4   :  { %13 = vsyncpa [#allocation4 + $0x1], 0  ;;  %s1141_s9 = smov 0   ;;  %s1143_s10 = smov 0  }
   0x5   :  { %s1145_s11 = smov 0   ;;  %s1147_s12 = smov 0  }
   0x6 LB: > { %s1162_s13 = sadd.s32 4294967295, %s1119_s12   ;;  %s799_s14 = sadd.s32 4294967294, %s1119_s12   ;;  %s1119_s12 = sphi %s1147_s12, %s1575_s12   ;;  %s1115_s11 = sphi %s1145_s11, %s1574_s11   ;;  %s1111_s10 = sphi %s1143_s10, %s1573_s10   ;;  %s1107_s9 = sphi %s1141_s9, %s1572_s9  }
   0x7   : > { %s1166_s15 = sadd.s32 1, %s1119_s12   ;;  %s26_s16 = sadd.s32 1, %s1115_s11 }
   0x8   : > { %s23_s17 = ssub.s32 %s1119_s12, %s1166_s15  ;;  %p33_p0 = scmp.ne.s32.totalorder %s1115_s11, %s1111_s10 }
   0x9   : > { %p24_p1 = scmp.eq.s32.totalorder %s23_s17, 0  ;;  %p34_p2 = scmp.eq.s32.totalorder %s1119_s12, 0 }
   0xa   : > { %p39_p3 = scmp.ne.s32.totalorder %s1111_s10, %s1107_s9  ;;  %p1551_p4 = scmp.eq.s32.totalorder %s1162_s13, 0 }
   0xb   : > { %s1178_s18 = scalar_select %p24_p1, %s1115_s11, %s26_s16  }
   0xc   : > { %p1180_p5 = por %p34_p2, %p33_p0  ;;  %p1186_p6 = por %p1551_p4, %p39_p3 }
   0xd   : > { %p84_p7 = scmp.eq.s32.totalorder %s1162_s13, 1  ;;  %p90_p8 = scmp.eq.s32.totalorder %s799_s14, 1 }
   0xe   : > { %s1557_s20 = scalar_select %p1186_p6, 1, 0 }
   0xf   : > { %p800_p9 = scmp.ge.s32.totalorder %s1119_s12, 1  ;;  %p97_p10 = scmp.lt.s32.totalorder %s1119_s12, 3 }
  0x10   : > { %p1193_p11 = por %p84_p7, %p33_p0  ;;  %p1197_p12 = por %p90_p8, %p39_p3 }
  0x11   : > { %p1201_p13 = pnand %p800_p9, %p97_p10  ;;  %s1121_s24 = smov [#allocation5]  }
  0x12   : > { %s1558_s21 = scalar_select %p1193_p11, 1, 0 }
  0x13   : > { %s1559_s22 = scalar_select %p1197_p12, 1, 0 }
  0x14   : > { %s1560_s23 = scalar_select %p1201_p13, 1, 0 }
  0x15   : > { %p940_p2 = pneg %p1201_p13  ;;  %s110_s25 = sshll.u32 %s1121_s24, 4  ;;  %s111_s25 = int_to_ptr.vmem [resolvable:$true] %s110_s25 }
  0x16   : > { %p953_p4 = scmp.lt.s32.totalorder %s1119_s12, 2  ;;  %p1561_p0 = scmp.eq.s32.totalorder %s1162_s13, 0 }
  0x17   : > { %s121_s27 = sand.u32 1, %s1115_s11   ;;  %s991_s4 = scalar_lea.hbm %s1549_s1, 128 }
  0x18   : > { %p1211_p7 = pnand %p940_p2, %p1561_p0  ;;  %p1218_p3 = pnand %p953_p4, %p1180_p5 }
  0x19   : > { %s803_s29 = sshll.u32 %s121_s27, 8  ;;  %p992_p8 = scmp.ne.s32.totalorder %s1549_s1, %s991_s4 }
  0x1a   : > { %s1563_s28 = scalar_select %p1218_p3, 1, 0 }
  0x1b   : > { %p993_p9 = pneg %p1211_p7  ;;  %p998_p4 = scmp.lt.u32.totalorder %s991_s4, %s1549_s1 }
  0x1d   : > { %p994_p10 = pnand %p993_p9, %p992_p8 }
  0x1f   : > { %p995_p2 = pneg %p994_p10 }
  0x21   : > { %p1000_p5 = pnand %p998_p4, %p995_p2 }
  0x23   : > { %1003 = shalt.err (!%p1000_p5)
}
  0x24   : > { %s1004_s14 = scalar_lea.vmem %s111_s25, 128  ;;  %p1012_p11 = scmp.lt.s32.totalorder %s111_s25, %s111_s25 }
  0x25   : > { %p1005_p0 = scmp.ne.s32.totalorder %s111_s25, %s1004_s14  ;;  %p1013_p6 = scmp.lt.s32.totalorder %s1004_s14, %s1004_s14 }
  0x27   : > { %p1007_p1 = pnand %p1005_p0, %p993_p9  ;;  %p1014_p13 = por %p1013_p6, %p1012_p11 }
  0x29   : > { %p1008_p12 = pneg %p1007_p1 }
  0x2b   : > { %p1015_p3 = pnand %p1014_p13, %p1008_p12 }
  0x2d   : > { %1018 = shalt.err (!%p1015_p3)
}
  0x2e   : > { %943 = dma.hbm_to_vmem [thread:$0]  (!%p1211_p7), %s1549_s1, 128, %s111_s25, [#allocation6]  }
  0x2f   : > { %s846_s19 = sshll.u32 %s1119_s12, 12  ;;  %s125_s24 = scalar_lea.vmem [#allocation2], %s803_s29 }
  0x30   : > { %s132_s30 = sshll.u32 %s125_s24, 4  ;;  %s1242_s5 = scalar_lea.hbm %s1548_s0, %s846_s19  ;;  %s1244_s30 = int_to_ptr.vmem [resolvable:$true] %s132_s30 }
  0x31   : > { %s1246_s26 = scalar_lea.sflag [#allocation3], %s121_s27  ;;  %s1019_s6 = scalar_lea.hbm %s1242_s5, 4096 }
  0x32   : > { %p1020_p6 = scmp.ne.s32.totalorder %s1242_s5, %s1019_s6  ;;  %p1564_p11 = scmp.ne.s32.totalorder %s1563_s28, 0 }
  0x33   : > { %s1024_s7 = scalar_lea.hbm %s1548_s0, 8192  ;;  %p1025_p7 = scmp.lt.u32.totalorder %s1242_s5, %s1548_s0 }
  0x34   : > { %p1021_p12 = pneg %p1564_p11  ;;  %p1026_p3 = scmp.lt.u32.totalorder %s1024_s7, %s1019_s6 }
  0x35   : > { %p1028_p9 = scmp.lt.u32.totalorder %s1019_s6, %s1242_s5 }
  0x36   : > { %p1022_p13 = pnand %p1021_p12, %p1020_p6  ;;  %p1027_p8 = por %p1026_p3, %p1025_p7 }
  0x38   : > { %p1023_p1 = pneg %p1022_p13  ;;  %p1029_p10 = por %p1028_p9, %p1027_p8 }
  0x3a   : > { %p1030_p2 = pnand %p1029_p10, %p1023_p1 }
  0x3c   : > { %1033 = shalt.err (!%p1030_p2)
}
  0x3d   : > { %s1034_s27 = scalar_lea.vmem %s1244_s30, 4096  ;;  %s1122_s16 = smov [#allocation2]  }
  0x3e   : > { %p1035_p4 = scmp.ne.s32.totalorder %s1244_s30, %s1034_s27  ;;  %s1039_s17 = sshll.u32 %s1122_s16, 4  ;;  %s1040_s17 = int_to_ptr.vmem [resolvable:$false] %s1039_s17 }
  0x3f   : > { %s1041_s19 = scalar_lea.vmem %s1040_s17, 8192  ;;  %p1042_p6 = scmp.lt.s32.totalorder %s1244_s30, %s1040_s17 }
  0x40   : > { %p1037_p5 = pnand %p1035_p4, %p1021_p12  ;;  %p1043_p13 = scmp.lt.s32.totalorder %s1041_s19, %s1034_s27 }
  0x42   : > { %p1038_p0 = pneg %p1037_p5  ;;  %p1044_p7 = por %p1043_p13, %p1042_p6 }
  0x44   : > { %p1045_p3 = pnand %p1044_p7, %p1038_p0 }
  0x46   : > { %1048 = shalt.err (!%p1045_p3)
}
  0x47   : > { %s1123_s24 = smov 128   ;;  %s1124_s3 = smov 8  }
  0x48   : > { %947 = dma.hbm_to_vmem [thread:$0]  (!%p1564_p11), %s1242_s5, 4096, %s1244_s30, %s1246_s26, %s1123_s24, %s1123_s24, %s1124_s3  }
  0x49   : > { %p1565_p12 = scmp.ne.s32.totalorder %s1560_s23, 0 }
  0x4a   : > { %s1277_s4 = sand.u32 (!%p1565_p12), 1, %s1111_s10   ;;  %p1566_p1 = scmp.ne.s32.totalorder (!%p1565_p12), %s1557_s20, 0 }
  0x4b   : > { %144 = sbr.rel (%p1565_p12) target bundleno = 395 (0x18b), region = 28  ;;  %s807_s6 = sshll.u32 (!%p1565_p12), %s1277_s4, 8 }
  0x4c   : > { %s147_s25 = scalar_lea.sflag (!%p1565_p12), [#allocation3], %s1277_s4  ;;  %s1281_s29 = scalar_lea.vmem (!%p1565_p12), [#allocation2], %s807_s6 }
  0x52   : > { %1094 = dma.done.wait (%p1566_p1), %s147_s25, 4096  }
  0x53   : > { %1096 = vsyncadd (%p1566_p1), %s147_s25, 4294963200  ;;  %p1567_p11 = scmp.eq.s32.totalorder %s1162_s13, 0 }
  0x55   : > { %1098 = dma.done.wait (%p1567_p11), [#allocation6], 128   ;;  %p1568_p8 = pmov %p1567_p11 }
  0x56   : > { %vm209_vm0 = vcmask 64512   ;;  %v208_v0 = vld [vmem:[#allocation5] sm:$0xff]  ;;  %v177_v2 = vld [vmem:[%s1281_s29 + $0x8] sm:$0xff]  ;;  %v178_v3 = vld [vmem:[%s1281_s29 + $0x10] sm:$0xff]  ;;  %vm531_vm1 = vcmask 31744   ;;  %s809_s20 = sshll.u32 %s1277_s4, 1 }
  0x57   : > { %1100 = vsyncadd (%p1568_p8), [#allocation6], 4294967168  ;;  %v176_v1 = vld [vmem:[%s1281_s29] sm:$0xff]  ;;  %880 = vmatprep.subr.mxu0 %v208_v0  ;;  %930 = vmatprep.subr.mxu1 %v208_v0  ;;  %v179_v4 = vld [vmem:[%s1281_s29 + $0x18] sm:$0xff]  ;;  %vm601_vm2 = vcmask 24576   ;;  %s843_s23 = sshll.u32 %s1162_s13, 5 }
  0x58   : > { %882 = vmatprep.mubr.msk.f32.mxu0 %vm209_vm0, %v176_v1  ;;  %881 = vmatpush3.msra.mxu0 %v208_v0  ;;  %v180_v5 = vld [vmem:[%s1281_s29 + $0x20] sm:$0xff]  ;;  %v193_v7 = vld [vmem:[%s1281_s29 + $0x88] sm:$0xff]  ;;  %v194_v8 = vld [vmem:[%s1281_s29 + $0x90] sm:$0xff]  ;;  %s174_s28 = scalar_lea.vmem [#allocation7], %s809_s20  ;;  %s1504_s7 = scalar_lea.hbm %s1550_s2, %s843_s23 }
  0x59   : > { %883 = vmatmul.mubr.msk.f32.vlgmr.msra.gmra.mrb[0].mxu0 %vm209_vm0, %v177_v2  ;;  %931 = vmatpush3.msra.mxu1 %v208_v0  ;;  %v192_v6 = vld [vmem:[%s1281_s29 + $0x80] sm:$0xff]  ;;  %v181_v9 = vld [vmem:[%s1281_s29 + $0x28] sm:$0xff]  ;;  %v195_v10 = vld [vmem:[%s1281_s29 + $0x98] sm:$0xff]  ;;  %s719_s30 = sshll.u32 %s174_s28, 4  ;;  %s706_s8 = scalar_lea.sflag [#allocation4], %s1277_s4  ;;  %s1506_s30 = int_to_ptr.vmem [resolvable:$true] %s719_s30 }
  0x5a   : > { %885 = vmatprep.mubr.msk.f32.mxu0 %vm209_vm0, %v178_v3  ;;  %906 = vmatprep.mubr.msk.f32.mxu1 %vm209_vm0, %v192_v6  ;;  %v182_v11 = vld [vmem:[%s1281_s29 + $0x30] sm:$0xff]  ;;  %v196_v12 = vld [vmem:[%s1281_s29 + $0xa0] sm:$0xff]  ;;  %v183_v13 = vld [vmem:[%s1281_s29 + $0x38] sm:$0xff]  ;;  %s1049_s14 = scalar_lea.vmem %s1506_s30, 32  ;;  %p1569_p10 = scmp.ne.s32.totalorder %s1558_s21, 0 }
  0x5b   : > { %907 = vmatmul.mubr.msk.f32.vlgmr.msra.gmra.mrb[0].mxu1 %vm209_vm0, %v193_v7  ;;  %v197_v14 = vld [vmem:[%s1281_s29 + $0xa8] sm:$0xff]  ;;  %v184_v15 = vld [vmem:[%s1281_s29 + $0x40] sm:$0xff]  ;;  %v198_v16 = vld [vmem:[%s1281_s29 + $0xb0] sm:$0xff]  ;;  %p1050_p9 = scmp.ne.s32.totalorder %s1506_s30, %s1049_s14  ;;  %s1125_s13 = smov [#allocation7]  }
  0x5c   : > { %909 = vmatprep.mubr.msk.f32.mxu1 %vm209_vm0, %v194_v8  ;;  %v185_v17 = vld [vmem:[%s1281_s29 + $0x48] sm:$0xff]  ;;  %v199_v18 = vld [vmem:[%s1281_s29 + $0xb8] sm:$0xff]  ;;  %v186_v19 = vld [vmem:[%s1281_s29 + $0x50] sm:$0xff]  ;;  %s1053_s27 = sshll.u32 %s1125_s13, 4  ;;  %s1054_s27 = int_to_ptr.vmem [resolvable:$false] %s1053_s27 }
  0x5d   : > { %886 = vmatmul.mubr.msk.f32.gmra.mrb[2].mxu0 %vm209_vm0, %v179_v4  ;;  %v200_v20 = vld [vmem:[%s1281_s29 + $0xc0] sm:$0xff]  ;;  %v187_v21 = vld [vmem:[%s1281_s29 + $0x58] sm:$0xff]  ;;  %v201_v22 = vld [vmem:[%s1281_s29 + $0xc8] sm:$0xff]  ;;  %p1051_p2 = pnand %p1050_p9, %p1569_p10  ;;  %s1055_s16 = scalar_lea.vmem %s1054_s27, 64 }
  0x5e   : > { %888 = vmatprep.mubr.msk.f32.mxu0 %vm209_vm0, %v180_v5  ;;  %v188_v23 = vld [vmem:[%s1281_s29 + $0x60] sm:$0xff]  ;;  %v202_v24 = vld [vmem:[%s1281_s29 + $0xd0] sm:$0xff]  ;;  %v189_v25 = vld [vmem:[%s1281_s29 + $0x68] sm:$0xff]  ;;  %p1056_p5 = scmp.lt.s32.totalorder %s1506_s30, %s1054_s27  ;;  %p1057_p0 = scmp.lt.s32.totalorder %s1055_s16, %s1049_s14 }
  0x5f   : > { %910 = vmatmul.mubr.msk.f32.gmra.mrb[2].mxu1 %vm209_vm0, %v195_v10  ;;  %v203_v26 = vld [vmem:[%s1281_s29 + $0xd8] sm:$0xff]  ;;  %v190_v27 = vld [vmem:[%s1281_s29 + $0x70] sm:$0xff]  ;;  %v204_v28 = vld [vmem:[%s1281_s29 + $0xe0] sm:$0xff]  ;;  %p1052_p4 = pneg %p1051_p2 }
  0x60   : > { %912 = vmatprep.mubr.msk.f32.mxu1 %vm209_vm0, %v196_v12  ;;  %v191_v29 = vld [vmem:[%s1281_s29 + $0x78] sm:$0xff]  ;;  %v205_v30 = vld [vmem:[%s1281_s29 + $0xe8] sm:$0xff]  ;;  %v206_v31 = vld [vmem:[%s1281_s29 + $0xf0] sm:$0xff]  ;;  %p1058_p6 = por %p1057_p0, %p1056_p5 }
  0x61   : > { %889 = vmatmul.mubr.msk.f32.gmra.mrb[4].mxu0 %vm209_vm0, %v181_v9  ;;  %v207_v32 = vld [vmem:[%s1281_s29 + $0xf8] sm:$0xff] }
  0x62   : > { %891 = vmatprep.mubr.msk.f32.mxu0 %vm209_vm0, %v182_v11  ;;  %p1059_p13 = pnand %p1058_p6, %p1052_p4 }
  0x63   : > { %913 = vmatmul.mubr.msk.f32.gmra.mrb[4].mxu1 %vm209_vm0, %v197_v14 }
  0x64   : > { %915 = vmatprep.mubr.msk.f32.mxu1 %vm209_vm0, %v198_v16 }
  0x65   : > { %892 = vmatmul.mubr.msk.f32.gmra.mrb[6].mxu0 %vm209_vm0, %v183_v13 }
  0x66   : > { %894 = vmatprep.mubr.msk.f32.mxu0 %vm209_vm0, %v184_v15 }
  0x67   : > { %916 = vmatmul.mubr.msk.f32.gmra.mrb[6].mxu1 %vm209_vm0, %v199_v18 }
  0x68   : > { %918 = vmatprep.mubr.msk.f32.mxu1 %vm209_vm0, %v200_v20 }
  0x69   : > { %895 = vmatmul.mubr.msk.f32.gmra.mrb[8].mxu0 %vm209_vm0, %v185_v17 }
  0x6a   : > { %897 = vmatprep.mubr.msk.f32.mxu0 %vm209_vm0, %v186_v19 }
  0x6b   : > { %919 = vmatmul.mubr.msk.f32.gmra.mrb[8].mxu1 %vm209_vm0, %v201_v22 }
  0x6c   : > { %921 = vmatprep.mubr.msk.f32.mxu1 %vm209_vm0, %v202_v24 }
  0x6d   : > { %898 = vmatmul.mubr.msk.f32.gmra.mrb[10].mxu0 %vm209_vm0, %v187_v21 }
  0x6e   : > { %900 = vmatprep.mubr.msk.f32.mxu0 %vm209_vm0, %v188_v23 }
  0x6f   : > { %922 = vmatmul.mubr.msk.f32.gmra.mrb[10].mxu1 %vm209_vm0, %v203_v26 }
  0x70   : > { %924 = vmatprep.mubr.msk.f32.mxu1 %vm209_vm0, %v204_v28 }
  0x71   : > { %901 = vmatmul.mubr.msk.f32.gmra.mrb[12].mxu0 %vm209_vm0, %v189_v25 }
  0x72   : > { %903 = vmatprep.mubr.msk.f32.mxu0 %vm209_vm0, %v190_v27 }
  0x73   : > { %925 = vmatmul.mubr.msk.f32.gmra.mrb[12].mxu1 %vm209_vm0, %v205_v30 }
  0x74   : > { %927 = vmatprep.mubr.msk.f32.mxu1 %vm209_vm0, %v206_v31 }
  0x75   : > { %904 = vmatmul.mubr.msk.f32.gmra.mrb[14].mxu0 %vm209_vm0, %v191_v29 }
  0x77   : > { %928 = vmatmul.mubr.msk.f32.gmra.mrb[14].mxu1 %vm209_vm0, %v207_v32 }
 0x12c   : > { %v884_v33 = vpop.f32.mrb[0].mxu0 }
 0x12d   : > { %v533_v34 = vsel %vm531_vm1, %v884_v33, 0.0  ;;  %v604_v35 = vmul.f32 %v884_v33, %v884_v33  ;;  %v372_v36 = vpop.f32.mrb[1].mxu0 }
 0x12e   : > { %v532_v37 = vsel %vm531_vm1, %v372_v36, 0.0  ;;  %v603_v38 = vmul.f32 %v372_v36, %v372_v36  ;;  %v1359_v43 = vpop.f32.mrb[0].mxu1 }
 0x12f   : > { %v636_v39 = vsel %vm531_vm1, %v604_v35, 0.0  ;;  %v534_v40 = vadd.f32 %v533_v34, %v532_v37  ;;  %v1361_v46 = vpop.f32.mrb[1].mxu1 }
 0x130   : > { %v635_v41 = vsel %vm531_vm1, %v603_v38, 0.0  ;;  %v887_v42 = vpop.f32.mrb[2].mxu0 }
 0x131   : > { %v637_v44 = vadd.f32 %v636_v39, %v635_v41  ;;  %v382_v45 = vpop.f32.mrb[3].mxu0  ;;  %v606_v47 = vmul.f32 %v887_v42, %v887_v42  ;;  %v537_v51 = vsel %vm531_vm1, %v887_v42, 0.0 }
 0x132   : > { %v535_v48 = vsel %vm531_vm1, %v382_v45, 0.0  ;;  %v605_v49 = vmul.f32 %v382_v45, %v382_v45  ;;  %v1366_v54 = vpop.f32.mrb[2].mxu1 }
 0x133   : > { %v536_v50 = vadd.f32 %v535_v48, %v534_v40  ;;  %v1368_v58 = vpop.f32.mrb[3].mxu1  ;;  %v640_v59 = vsel %vm531_vm1, %v606_v47, 0.0 }
 0x134   : > { %v638_v52 = vsel %vm531_vm1, %v605_v49, 0.0  ;;  %v890_v53 = vpop.f32.mrb[4].mxu0 }
 0x135   : > { %v639_v55 = vadd.f32 %v638_v52, %v637_v44  ;;  %v392_v56 = vpop.f32.mrb[5].mxu0  ;;  %v538_v57 = vadd.f32 %v537_v51, %v536_v50  ;;  %v608_v60 = vmul.f32 %v890_v53, %v890_v53  ;;  %v541_v1 = vsel %vm531_vm1, %v890_v53, 0.0 }
 0x136   : > { %v539_v61 = vsel %vm531_vm1, %v392_v56, 0.0  ;;  %v607_v62 = vmul.f32 %v392_v56, %v392_v56  ;;  %v1374_v4 = vpop.f32.mrb[4].mxu1 }
 0x137   : > { %v540_v63 = vadd.f32 %v539_v61, %v538_v57  ;;  %v641_v0 = vadd.f32 %v640_v59, %v639_v55  ;;  %v1376_v8 = vpop.f32.mrb[5].mxu1  ;;  %v644_v9 = vsel %vm531_vm1, %v608_v60, 0.0 }
 0x138   : > { %v642_v2 = vsel %vm531_vm1, %v607_v62, 0.0  ;;  %v893_v3 = vpop.f32.mrb[6].mxu0 }
 0x139   : > { %v643_v5 = vadd.f32 %v642_v2, %v641_v0  ;;  %v402_v6 = vpop.f32.mrb[7].mxu0  ;;  %v542_v7 = vadd.f32 %v541_v1, %v540_v63  ;;  %v610_v10 = vmul.f32 %v893_v3, %v893_v3  ;;  %v545_v15 = vsel %vm531_vm1, %v893_v3, 0.0 }
 0x13a   : > { %v543_v11 = vsel %vm531_vm1, %v402_v6, 0.0  ;;  %v609_v12 = vmul.f32 %v402_v6, %v402_v6  ;;  %v1382_v18 = vpop.f32.mrb[6].mxu1 }
 0x13b   : > { %v544_v13 = vadd.f32 %v543_v11, %v542_v7  ;;  %v645_v14 = vadd.f32 %v644_v9, %v643_v5  ;;  %v1384_v22 = vpop.f32.mrb[7].mxu1  ;;  %v648_v23 = vsel %vm531_vm1, %v610_v10, 0.0  ;;  %v619_v5 = vmul.f32 %v1361_v46, %v1361_v46 }
 0x13c   : > { %v646_v16 = vsel %vm531_vm1, %v609_v12, 0.0  ;;  %v896_v17 = vpop.f32.mrb[8].mxu0 }
 0x13d   : > { %v647_v19 = vadd.f32 %v646_v16, %v645_v14  ;;  %v412_v20 = vpop.f32.mrb[9].mxu0  ;;  %v546_v21 = vadd.f32 %v545_v15, %v544_v13  ;;  %v612_v24 = vmul.f32 %v896_v17, %v896_v17  ;;  %v549_v29 = vsel %vm531_vm1, %v896_v17, 0.0 }
 0x13e   : > { %v547_v25 = vsel %vm531_vm1, %v412_v20, 0.0  ;;  %v611_v26 = vmul.f32 %v412_v20, %v412_v20  ;;  %v1390_v32 = vpop.f32.mrb[8].mxu1  ;;  %v563_v16 = vsel %vm531_vm1, %v1361_v46, 0.0  ;;  %v565_v46 = vsel %vm531_vm1, %v1359_v43, 0.0 }
 0x13f   : > { %v548_v27 = vadd.f32 %v547_v25, %v546_v21  ;;  %v649_v28 = vadd.f32 %v648_v23, %v647_v19  ;;  %v1392_v36 = vpop.f32.mrb[9].mxu1  ;;  %v652_v37 = vsel %vm531_vm1, %v612_v24, 0.0  ;;  %v620_v24 = vmul.f32 %v1359_v43, %v1359_v43 }
 0x140   : > { %v650_v30 = vsel %vm531_vm1, %v611_v26, 0.0  ;;  %v899_v31 = vpop.f32.mrb[10].mxu0  ;;  %v666_v25 = vsel %vm531_vm1, %v619_v5, 0.0  ;;  %v621_v26 = vmul.f32 %v1368_v58, %v1368_v58  ;;  %v569_v43 = vsel %vm531_vm1, %v1366_v54, 0.0 }
 0x141   : > { %v651_v33 = vadd.f32 %v650_v30, %v649_v28  ;;  %v422_v34 = vpop.f32.mrb[11].mxu0  ;;  %v550_v35 = vadd.f32 %v549_v29, %v548_v27  ;;  %v614_v38 = vmul.f32 %v899_v31, %v899_v31  ;;  %v553_v44 = vsel %vm531_vm1, %v899_v31, 0.0 }
 0x142   : > { %v551_v39 = vsel %vm531_vm1, %v422_v34, 0.0  ;;  %v613_v40 = vmul.f32 %v422_v34, %v422_v34  ;;  %v1398_v48 = vpop.f32.mrb[10].mxu1  ;;  %v567_v29 = vsel %vm531_vm1, %v1368_v58, 0.0  ;;  %v622_v34 = vmul.f32 %v1366_v54, %v1366_v54 }
 0x143   : > { %v552_v41 = vadd.f32 %v551_v39, %v550_v35  ;;  %v653_v42 = vadd.f32 %v652_v37, %v651_v33  ;;  %v1400_v52 = vpop.f32.mrb[11].mxu1  ;;  %v656_v53 = vsel %vm531_vm1, %v614_v38, 0.0  ;;  %v668_v33 = vsel %vm531_vm1, %v620_v24, 0.0 }
 0x144   : > { %v654_v45 = vsel %vm531_vm1, %v613_v40, 0.0  ;;  %v902_v47 = vpop.f32.mrb[12].mxu0  ;;  %v670_v35 = vsel %vm531_vm1, %v621_v26, 0.0  ;;  %v623_v37 = vmul.f32 %v1376_v8, %v1376_v8  ;;  %v571_v58 = vsel %vm531_vm1, %v1376_v8, 0.0 }
 0x145   : > { %v655_v49 = vadd.f32 %v654_v45, %v653_v42  ;;  %v432_v50 = vpop.f32.mrb[13].mxu0  ;;  %v554_v51 = vadd.f32 %v553_v44, %v552_v41  ;;  %v616_v55 = vmul.f32 %v902_v47, %v902_v47  ;;  %v557_v61 = vsel %vm531_vm1, %v902_v47, 0.0 }
 0x146   : > { %v555_v56 = vsel %vm531_vm1, %v432_v50, 0.0  ;;  %v615_v57 = vmul.f32 %v432_v50, %v432_v50  ;;  %v1406_v0 = vpop.f32.mrb[12].mxu1  ;;  %v672_v42 = vsel %vm531_vm1, %v622_v34, 0.0  ;;  %v624_v44 = vmul.f32 %v1374_v4, %v1374_v4 }
 0x147   : > { %v556_v59 = vadd.f32 %v555_v56, %v554_v51  ;;  %v657_v60 = vadd.f32 %v656_v53, %v655_v49  ;;  %v1410_v6 = vpop.f32.mrb[13].mxu1  ;;  %v660_v7 = vsel %vm531_vm1, %v616_v55, 0.0  ;;  %v674_v45 = vsel %vm531_vm1, %v623_v37, 0.0 }
 0x148   : > { %v658_v62 = vsel %vm531_vm1, %v615_v57, 0.0  ;;  %v905_v63 = vpop.f32.mrb[14].mxu0  ;;  %v625_v47 = vmul.f32 %v1384_v22, %v1384_v22  ;;  %v573_v54 = vsel %vm531_vm1, %v1374_v4, 0.0  ;;  %v575_v8 = vsel %vm531_vm1, %v1384_v22, 0.0 }
 0x149   : > { %v659_v1 = vadd.f32 %v658_v62, %v657_v60  ;;  %v442_v2 = vpop.f32.mrb[15].mxu0  ;;  %v558_v3 = vadd.f32 %v557_v61, %v556_v59  ;;  %v618_v9 = vmul.f32 %v905_v63, %v905_v63  ;;  %v561_v14 = vsel %vm531_vm1, %v905_v63, 0.0 }
 0x14a   : > { %v559_v10 = vsel %vm531_vm1, %v442_v2, 0.0  ;;  %v617_v11 = vmul.f32 %v442_v2, %v442_v2  ;;  %v1418_v17 = vpop.f32.mrb[14].mxu1  ;;  %v676_v55 = vsel %vm531_vm1, %v624_v44, 0.0  ;;  %v626_v56 = vmul.f32 %v1382_v18, %v1382_v18 }
 0x14b   : > { %v560_v12 = vadd.f32 %v559_v10, %v558_v3  ;;  %v661_v13 = vadd.f32 %v660_v7, %v659_v1  ;;  %v1420_v21 = vpop.f32.mrb[15].mxu1  ;;  %v664_v23 = vsel %vm531_vm1, %v618_v9, 0.0  ;;  %v678_v57 = vsel %vm531_vm1, %v625_v47, 0.0 }
 0x14c   : > { %v662_v15 = vsel %vm531_vm1, %v617_v11, 0.0  ;;  %v627_v59 = vmul.f32 %v1392_v36, %v1392_v36  ;;  %v577_v4 = vsel %vm531_vm1, %v1382_v18, 0.0  ;;  %v579_v22 = vsel %vm531_vm1, %v1392_v36, 0.0 }
 0x14d   : > { %v562_v19 = vadd.f32 %v561_v14, %v560_v12  ;;  %v663_v20 = vadd.f32 %v662_v15, %v661_v13  ;;  %v680_v1 = vsel %vm531_vm1, %v626_v56, 0.0  ;;  %v628_v2 = vmul.f32 %v1390_v32, %v1390_v32 }
 0x14e   : > { %v682_v3 = vsel %vm531_vm1, %v627_v59, 0.0  ;;  %v629_v5 = vmul.f32 %v1400_v52, %v1400_v52  ;;  %v581_v18 = vsel %vm531_vm1, %v1390_v32, 0.0  ;;  %v583_v36 = vsel %vm531_vm1, %v1400_v52, 0.0 }
 0x14f   : > { %v665_v27 = vadd.f32 %v664_v23, %v663_v20  ;;  %v564_v28 = vadd.f32 %v563_v16, %v562_v19  ;;  %v684_v12 = vsel %vm531_vm1, %v628_v2, 0.0  ;;  %v630_v13 = vmul.f32 %v1398_v48, %v1398_v48 }
 0x150   : > { %v686_v14 = vsel %vm531_vm1, %v629_v5, 0.0  ;;  %v631_v15 = vmul.f32 %v1410_v6, %v1410_v6  ;;  %v585_v32 = vsel %vm531_vm1, %v1398_v48, 0.0  ;;  %v587_v52 = vsel %vm531_vm1, %v1410_v6, 0.0 }
 0x151   : > { %v667_v30 = vadd.f32 %v666_v25, %v665_v27  ;;  %v566_v31 = vadd.f32 %v565_v46, %v564_v28  ;;  %v688_v24 = vsel %vm531_vm1, %v630_v13, 0.0  ;;  %v632_v25 = vmul.f32 %v1406_v0, %v1406_v0 }
 0x152   : > { %v690_v26 = vsel %vm531_vm1, %v631_v15, 0.0  ;;  %v633_v27 = vmul.f32 %v1420_v21, %v1420_v21  ;;  %v589_v48 = vsel %vm531_vm1, %v1406_v0, 0.0  ;;  %v591_v6 = vsel %vm531_vm1, %v1420_v21, 0.0 }
 0x153   : > { %v568_v38 = vadd.f32 %v567_v29, %v566_v31  ;;  %v669_v39 = vadd.f32 %v668_v33, %v667_v30  ;;  %v692_v31 = vsel %vm531_vm1, %v632_v25, 0.0  ;;  %v634_v33 = vmul.f32 %v1418_v17, %v1418_v17 }
 0x154   : > { %v694_v34 = vsel %vm531_vm1, %v633_v27, 0.0 }
 0x155   : > { %v671_v40 = vadd.f32 %v670_v35, %v669_v39  ;;  %v570_v41 = vadd.f32 %v569_v43, %v568_v38  ;;  %v593_v38 = vsel %vm531_vm1, %v1418_v17, 0.0  ;;  %v696_v21 = vsel %vm531_vm1, %v634_v33, 0.0 }
 0x157   : > { %v572_v49 = vadd.f32 %v571_v58, %v570_v41  ;;  %v673_v50 = vadd.f32 %v672_v42, %v671_v40 }
 0x159   : > { %v675_v51 = vadd.f32 %v674_v45, %v673_v50  ;;  %v574_v53 = vadd.f32 %v573_v54, %v572_v49 }
 0x15b   : > { %v576_v60 = vadd.f32 %v575_v8, %v574_v53  ;;  %v677_v61 = vadd.f32 %v676_v55, %v675_v51 }
 0x15d   : > { %v679_v62 = vadd.f32 %v678_v57, %v677_v61  ;;  %v578_v63 = vadd.f32 %v577_v4, %v576_v60 }
 0x15f   : > { %v580_v7 = vadd.f32 %v579_v22, %v578_v63  ;;  %v681_v9 = vadd.f32 %v680_v1, %v679_v62 }
 0x161   : > { %v683_v10 = vadd.f32 %v682_v3, %v681_v9  ;;  %v582_v11 = vadd.f32 %v581_v18, %v580_v7 }
 0x163   : > { %v584_v16 = vadd.f32 %v583_v36, %v582_v11  ;;  %v685_v19 = vadd.f32 %v684_v12, %v683_v10 }
 0x165   : > { %v687_v20 = vadd.f32 %v686_v14, %v685_v19  ;;  %v586_v23 = vadd.f32 %v585_v32, %v584_v16 }
 0x167   : > { %v588_v28 = vadd.f32 %v587_v52, %v586_v23  ;;  %v689_v46 = vadd.f32 %v688_v24, %v687_v20 }
 0x169   : > { %v691_v29 = vadd.f32 %v690_v26, %v689_v46  ;;  %v590_v30 = vadd.f32 %v589_v48, %v588_v28 }
 0x16b   : > { %v592_v35 = vadd.f32 %v591_v6, %v590_v30  ;;  %v693_v37 = vadd.f32 %v692_v31, %v691_v29 }
 0x16d   : > { %v594_v0 = vadd.f32 %v593_v38, %v592_v35  ;;  %v695_v39 = vadd.f32 %v694_v34, %v693_v37 }
 0x16f   : > { %v595_v43 = vrot.slane %v594_v0, 4  ;;  %v697_v58 = vadd.f32 %v696_v21, %v695_v39 }
 0x171   : > { %v596_v40 = vadd.f32 %v595_v43, %v594_v0  ;;  %v698_v41 = vrot.slane %v697_v58, 4 }
 0x173   : > { %v597_v42 = vrot.slane %v596_v40, 2  ;;  %v699_v44 = vadd.f32 %v698_v41, %v697_v58 }
 0x175   : > { %v598_v45 = vadd.f32 %v597_v42, %v596_v40  ;;  %v700_v47 = vrot.slane %v699_v44, 2 }
 0x177   : > { %v599_v49 = vrot.slane %v598_v45, 1  ;;  %v701_v50 = vadd.f32 %v700_v47, %v699_v44 }
 0x179   : > { %v600_v17 = vadd.f32 %v599_v49, %v598_v45  ;;  %v702_v54 = vrot.slane %v701_v50, 1 }
 0x17b   : > { %v703_v8 = vadd.f32 %v702_v54, %v701_v50  ;;  %602 = vst.msk [vmem:[%s174_s28] sm:$0x1] %vm601_vm2, %v600_v17 }
 0x17d   : > { %704 = vst.msk [vmem:[%s174_s28 + $0x1] sm:$0x1] %vm601_vm2, %v703_v8 }
 0x17e   : > { %1062 = shalt.err (!%p1059_p13)
}
 0x17f   : > { %s1063_s17 = scalar_lea.hbm %s1504_s7, 32  ;;  %s1067_s3 = scalar_lea.hbm %s1550_s2, 64 }
 0x180   : > { %p1064_p7 = scmp.ne.s32.totalorder %s1504_s7, %s1063_s17  ;;  %p1068_p1 = scmp.lt.u32.totalorder %s1504_s7, %s1550_s2 }
 0x181   : > { %p1069_p11 = scmp.lt.u32.totalorder %s1067_s3, %s1063_s17  ;;  %p1071_p9 = scmp.lt.u32.totalorder %s1063_s17, %s1504_s7 }
 0x182   : > { %p1065_p3 = pnand %p1064_p7, %p1569_p10 }
 0x183   : > { %p1070_p8 = por %p1069_p11, %p1068_p1 }
 0x184   : > { %p1066_p12 = pneg %p1065_p3 }
 0x185   : > { %p1072_p2 = por %p1071_p9, %p1070_p8 }
 0x187   : > { %p1073_p4 = pnand %p1072_p2, %p1066_p12 }
 0x189   : > { %1076 = shalt.err (!%p1073_p4)
}
 0x18a   : > { %938 = dma.vmem_to_hbm [thread:$0]  (%p1569_p10), %s1506_s30, 32, %s1504_s7, %s706_s8  }
 0x18b PF: > { %s731_s25 = sand.u32 1, %s1107_s9   ;;  %p1570_p5 = scmp.ne.s32.totalorder %s1559_s22, 0 }
 0x18c   : > { %p1571_p0 = scmp.ge.s32.totalorder %s1119_s12, 2  ;;  %s732_s29 = scalar_lea.sflag [#allocation4], %s731_s25 }
 0x18e   : > { %p949_p6 = pnand %p1571_p0, %p1570_p5 }
 0x190   : > { %1102 = dma.done.wait (!%p949_p6), %s732_s29, 32  }
 0x191   : > { %1104 = vsyncadd (!%p949_p6), %s732_s29, 4294967264  ;;  %p16_p13 = scmp.ge.s32.totalorder %s1166_s15, 4   ;;  %s1572_s9 = smov %s1111_s10 }
 0x192   : > { %s1573_s10 = smov %s1115_s11  ;;  %s1574_s11 = smov %s1178_s18 }
 0x193   : > { %s1575_s12 = smov %s1166_s15  ;;  %18 = sbr.rel (!%p16_p13) target bundleno = 6 (0x6), region = 77 }
 0x19a   :  { %737 = vsyncpa [#allocation3], 1 }
 0x19b   :  { %739 = vsyncpa [#allocation3 + $0x1], 1 }
 0x19c   :  { %740 = vsyncpa [#allocation6], 1 }
 0x19d   :  { %741 = vsyncpa [#allocation4], 1 }
 0x19e   :  { %743 = vsyncpa [#allocation4 + $0x1], 1 }

// kernel: basic_res_block.5
= control target key start
LH: loop header
LB: loop body
LE: loop exit
PB: predicated region body
PF: predicated region fallthrough
CT: control target
= control target key end

     0   :  { %9 = vsyncpa [#allocation3], 0  ;;  %s373_s0 = inlined_call_operand.hbm [shape: f32[32,128], index: 0, kind: input, shape index: {}]   ;;  %s374_s1 = inlined_call_operand.hbm [shape: f32[32,128], index: 1, kind: input, shape index: {}]   ;;  %s375_s2 = inlined_call_operand.hbm [shape: f32[1,128], index: 2, kind: input, shape index: {}]   ;;  %s376_s3 = inlined_call_operand.hbm [shape: f32[1,128], index: 3, kind: input, shape index: {}]   ;;  %s377_s4 = inlined_call_operand.hbm [shape: f32[32,128], index: 4, kind: output, shape index: {}]  }
   0x1   :  { %10 = vsyncpa [#allocation6], 0 }
   0x2   :  { %11 = vsyncpa [#allocation9], 0 }
   0x3   :  { %12 = vsyncpa [#allocation4], 0  ;;  %s265_s15 = smov [#allocation5]   ;;  %s266_s17 = smov [#allocation2]  }
   0x4   :  { %s30_s16 = sshll.u32 %s265_s15, 4  ;;  %s18_s18 = sshll.u32 %s266_s17, 4  ;;  %s31_s16 = int_to_ptr.vmem [resolvable:$true] %s30_s16  ;;  %s297_s18 = int_to_ptr.vmem [resolvable:$true] %s18_s18 }
   0x5   :  { %s147_s21 = scalar_lea.hbm %s374_s1, 512 }
   0x6   :  { %p148_p0 = scmp.ne.s32.totalorder %s374_s1, %s147_s21  ;;  %p151_p1 = scmp.lt.u32.totalorder %s147_s21, %s374_s1 }
   0x8   :  { %p153_p2 = pnand %p151_p1, %p148_p0 }
   0xa   :  { %156 = shalt.err (!%p153_p2)
}
   0xb   :  { %s157_s26 = scalar_lea.vmem %s31_s16, 512  ;;  %p162_p4 = scmp.lt.s32.totalorder %s31_s16, %s31_s16 }
   0xc   :  { %p158_p3 = scmp.ne.s32.totalorder %s31_s16, %s157_s26  ;;  %p163_p5 = scmp.lt.s32.totalorder %s157_s26, %s157_s26 }
   0xe   :  { %p164_p6 = por %p163_p5, %p162_p4 }
  0x10   :  { %p165_p7 = pnand %p164_p6, %p158_p3 }
  0x12   :  { %168 = shalt.err (!%p165_p7)
}
  0x13   :  { %s267_s27 = smov 128   ;;  %s268_s28 = smov 8  }
  0x14   :  { %36 = dma.hbm_to_vmem [thread:$0]  %s374_s1, 512, %s31_s16, [#allocation6], %s267_s27, %s267_s27, %s268_s28  }
  0x15   :  { %s169_s7 = scalar_lea.hbm %s373_s0, 512 }
  0x16   :  { %p170_p8 = scmp.ne.s32.totalorder %s373_s0, %s169_s7  ;;  %p173_p9 = scmp.lt.u32.totalorder %s169_s7, %s373_s0 }
  0x18   :  { %p175_p10 = pnand %p173_p9, %p170_p8 }
  0x1a   :  { %178 = shalt.err (!%p175_p10)
}
  0x1b   :  { %s179_s12 = scalar_lea.vmem %s297_s18, 512  ;;  %p184_p12 = scmp.lt.s32.totalorder %s297_s18, %s297_s18 }
  0x1c   :  { %p180_p11 = scmp.ne.s32.totalorder %s297_s18, %s179_s12  ;;  %p185_p13 = scmp.lt.s32.totalorder %s179_s12, %s179_s12 }
  0x1e   :  { %p186_p0 = por %p185_p13, %p184_p12 }
  0x20   :  { %p187_p1 = pnand %p186_p0, %p180_p11 }
  0x22   :  { %190 = shalt.err (!%p187_p1)
}
  0x23   :  { %24 = dma.hbm_to_vmem [thread:$0]  %s373_s0, 512, %s297_s18, [#allocation3], %s267_s27, %s267_s27, %s268_s28  }
  0x24   :  { %s269_s14 = smov [#allocation7]   ;;  %s270_s16 = smov [#allocation8]  }
  0x25   :  { %s43_s15 = sshll.u32 %s269_s14, 4  ;;  %s53_s17 = sshll.u32 %s270_s16, 4  ;;  %s44_s15 = int_to_ptr.vmem [resolvable:$true] %s43_s15  ;;  %s54_s17 = int_to_ptr.vmem [resolvable:$true] %s53_s17 }
  0x26   :  { %s191_s21 = scalar_lea.hbm %s375_s2, 16 }
  0x27   :  { %p192_p2 = scmp.ne.s32.totalorder %s375_s2, %s191_s21  ;;  %p195_p3 = scmp.lt.u32.totalorder %s191_s21, %s375_s2 }
  0x29   :  { %p197_p4 = pnand %p195_p3, %p192_p2 }
  0x2b   :  { %200 = shalt.err (!%p197_p4)
}
  0x2c   :  { %s201_s0 = scalar_lea.vmem %s44_s15, 16  ;;  %s205_s18 = scalar_lea.vmem %s44_s15, 32 }
  0x2d   :  { %p202_p5 = scmp.ne.s32.totalorder %s44_s15, %s201_s0  ;;  %p206_p6 = scmp.lt.s32.totalorder %s44_s15, %s44_s15 }
  0x2e   :  { %p207_p7 = scmp.lt.s32.totalorder %s205_s18, %s201_s0 }
  0x30   :  { %p208_p8 = por %p207_p7, %p206_p6 }
  0x32   :  { %p209_p9 = pnand %p208_p8, %p202_p5 }
  0x34   :  { %212 = shalt.err (!%p209_p9)
}
  0x35   :  { %46 = dma.hbm_to_vmem [thread:$0]  %s375_s2, 16, %s44_s15, [#allocation6]  }
  0x36   :  { %s213_s6 = scalar_lea.hbm %s376_s3, 16 }
  0x37   :  { %p214_p10 = scmp.ne.s32.totalorder %s376_s3, %s213_s6  ;;  %p217_p11 = scmp.lt.u32.totalorder %s213_s6, %s376_s3 }
  0x39   :  { %p219_p12 = pnand %p217_p11, %p214_p10 }
  0x3b   :  { %222 = shalt.err (!%p219_p12)
}
  0x3c   :  { %s223_s11 = scalar_lea.vmem %s54_s17, 16  ;;  %s227_s12 = scalar_lea.vmem %s54_s17, 32 }
  0x3d   :  { %p224_p13 = scmp.ne.s32.totalorder %s54_s17, %s223_s11  ;;  %p228_p0 = scmp.lt.s32.totalorder %s54_s17, %s54_s17 }
  0x3e   :  { %p229_p1 = scmp.lt.s32.totalorder %s227_s12, %s223_s11 }
  0x40   :  { %p230_p2 = por %p229_p1, %p228_p0 }
  0x42   :  { %p231_p3 = pnand %p230_p2, %p224_p13 }
  0x44   :  { %234 = shalt.err (!%p231_p3)
}
  0x45   :  { %56 = dma.hbm_to_vmem [thread:$0]  %s376_s3, 16, %s54_s17, [#allocation9]  }
  0x46   :  { %257 = dma.done.wait [#allocation3], 512  }
  0x47   :  { %258 = vsyncadd [#allocation3], 4294966784 }
  0x48   :  { %259 = dma.done.wait [#allocation6], 528  }
  0x49   :  { %260 = vsyncadd [#allocation6], 4294966768 }
  0x4a   :  { %261 = dma.done.wait [#allocation9], 16  }
  0x4b   :  { %262 = vsyncadd [#allocation9], 4294967280  ;;  %v69_v0 = vld [vmem:[#allocation2] sm:$0xff]  ;;  %v70_v4 = vld [vmem:[#allocation2 + $0x8] sm:$0xff]  ;;  %s271_s3 = smov [#allocation10]  }
  0x4c   :  { %v138_v1 = vld [vmem:[#allocation7] ss:$0 sm:$0xff]  ;;  %v139_v2 = vld [vmem:[#allocation8] ss:$0 sm:$0xff]  ;;  %v71_v7 = vld [vmem:[#allocation2 + $0x10] sm:$0xff]  ;;  %s124_s13 = sshll.u32 %s271_s3, 4  ;;  %s125_s13 = int_to_ptr.vmem [resolvable:$true] %s124_s13 }
  0x4d   :  { %v80_v3 = vmul.f32 %v138_v1, %v69_v0  ;;  %v95_v5 = vld [vmem:[#allocation5] sm:$0xff]  ;;  %v81_v6 = vmul.f32 %v138_v1, %v70_v4  ;;  %v72_v8 = vld [vmem:[#allocation2 + $0x18] sm:$0xff]  ;;  %v96_v10 = vld [vmem:[#allocation5 + $0x8] sm:$0xff]  ;;  %v82_v11 = vmul.f32 %v138_v1, %v71_v7  ;;  %s235_s14 = scalar_lea.vmem %s125_s13, 512  ;;  %p240_p5 = scmp.lt.s32.totalorder %s125_s13, %s125_s13 }
  0x4e   :  { %v83_v12 = vmul.f32 %v138_v1, %v72_v8  ;;  %v97_v14 = vld [vmem:[#allocation5 + $0x10] sm:$0xff]  ;;  %v98_v15 = vld [vmem:[#allocation5 + $0x18] sm:$0xff]  ;;  %p236_p4 = scmp.ne.s32.totalorder %s125_s13, %s235_s14  ;;  %p241_p6 = scmp.lt.s32.totalorder %s235_s14, %s235_s14 }
  0x4f   :  { %v91_v9 = vadd.f32 %v139_v2, %v80_v3  ;;  %v92_v13 = vadd.f32 %v139_v2, %v81_v6  ;;  %v93_v17 = vadd.f32 %v139_v2, %v82_v11 }
  0x50   :  { %v94_v18 = vadd.f32 %v139_v2, %v83_v12  ;;  %p242_p7 = por %p241_p6, %p240_p5 }
  0x51   :  { %v99_v16 = vadd.f32 %v95_v5, %v91_v9  ;;  %v100_v19 = vadd.f32 %v96_v10, %v92_v13  ;;  %v101_v21 = vadd.f32 %v97_v14, %v93_v17 }
  0x52   :  { %v102_v22 = vadd.f32 %v98_v15, %v94_v18  ;;  %p243_p8 = pnand %p242_p7, %p236_p4 }
  0x53   :  { %vm103_vm0 = vcmp.gt.f32.partialorder %v99_v16, 0.0  ;;  %v107_v20 = vmul.f32 0.1, %v99_v16  ;;  %vm104_vm1 = vcmp.gt.f32.partialorder %v100_v19, 0.0  ;;  %v108_v23 = vmul.f32 0.1, %v100_v19 }
  0x54   :  { %vm105_vm2 = vcmp.gt.f32.partialorder %v101_v21, 0.0  ;;  %v109_v25 = vmul.f32 0.1, %v101_v21  ;;  %vm106_vm3 = vcmp.gt.f32.partialorder %v102_v22, 0.0  ;;  %v110_v27 = vmul.f32 0.1, %v102_v22 }
  0x55   :  { %v111_v24 = vsel %vm103_vm0, %v99_v16, %v107_v20  ;;  %v112_v26 = vsel %vm104_vm1, %v100_v19, %v108_v23 }
  0x56   :  { %115 = vst [vmem:[#allocation10] sm:$0xff] %v111_v24  ;;  %116 = vst [vmem:[#allocation10 + $0x8] sm:$0xff] %v112_v26  ;;  %v113_v28 = vsel %vm105_vm2, %v101_v21, %v109_v25  ;;  %v114_v29 = vsel %vm106_vm3, %v102_v22, %v110_v27 }
  0x57   :  { %117 = vst [vmem:[#allocation10 + $0x10] sm:$0xff] %v113_v28  ;;  %118 = vst [vmem:[#allocation10 + $0x18] sm:$0xff] %v114_v29 }
  0x58   :  { %246 = shalt.err (!%p243_p8)
}
  0x59   :  { %s247_s17 = scalar_lea.hbm %s377_s4, 512 }
  0x5a   :  { %p248_p9 = scmp.ne.s32.totalorder %s377_s4, %s247_s17  ;;  %p251_p10 = scmp.lt.u32.totalorder %s247_s17, %s377_s4 }
  0x5c   :  { %p253_p11 = pnand %p251_p10, %p248_p9 }
  0x5e   :  { %256 = shalt.err (!%p253_p11)
}
  0x5f   :  { %130 = dma.vmem_to_hbm [thread:$0]  %s125_s13, 512, %s377_s4, [#allocation4], %s267_s27, %s267_s27, %s268_s28  }
  0x60   :  { %263 = dma.done.wait [#allocation4], 512  }
  0x61   :  { %264 = vsyncadd [#allocation4], 4294966784 }
  0x62   :  { %134 = vsyncpa [#allocation3], 1 }
  0x63   :  { %135 = vsyncpa [#allocation6], 1 }
  0x64   :  { %136 = vsyncpa [#allocation9], 1 }
  0x65   :  { %137 = vsyncpa [#allocation4], 1 }

// kernel: basic_res_block.4
= control target key start
LH: loop header
LB: loop body
LE: loop exit
PB: predicated region body
PF: predicated region fallthrough
CT: control target
= control target key end

     0   :  { %12 = vsyncpa [#allocation4], 0  ;;  %s8078_s0 = inlined_call_operand.hbm [shape: f32[512,8], index: 0, kind: input, shape index: {}]   ;;  %s8079_s1 = inlined_call_operand.hbm [shape: f32[8,4], index: 1, kind: input, shape index: {}]   ;;  %s8080_s2 = inlined_call_operand.hbm [shape: f32[1,4], index: 2, kind: input, shape index: {}]   ;;  %s8081_s3 = inlined_call_operand.hbm [shape: f32[1,4], index: 3, kind: input, shape index: {}]   ;;  %s8082_s4 = inlined_call_operand.hbm [shape: f32[3,3,4,8], index: 4, kind: input, shape index: {}]   ;;  %s8083_s5 = inlined_call_operand.hbm [shape: f32[512,8], index: 5, kind: output, shape index: {0}]   ;;  %s8084_s6 = inlined_call_operand.hbm [shape: f32[2,2,8], index: 6, kind: output, shape index: {1}]  }
   0x1   :  { %14 = vsyncpa [#allocation4 + $0x1], 0 }
   0x2   :  { %15 = vsyncpa [#allocation7], 0 }
   0x3   :  { %16 = vsyncpa [#allocation10], 0 }
   0x4   :  { %17 = vsyncpa [#allocation5], 0 }
   0x5   :  { %19 = vsyncpa [#allocation5 + $0x1], 0 }
   0x6   :  { %20 = vsyncpa [#allocation14], 0 }
   0x7   :  { %22 = vsyncpa [#allocation14 + $0x1], 0  ;;  %s6612_s21 = smov 0   ;;  %s6614_s22 = smov 0  }
   0x8   :  { %s6616_s23 = smov 0   ;;  %s6618_s24 = smov 0  }
   0x9 LB: > { %s6633_s25 = sadd.s32 4294967295, %s6561_s24   ;;  %s4770_s26 = sadd.s32 4294967294, %s6561_s24   ;;  %s6561_s24 = sphi %s6618_s24, %s8182_s24   ;;  %s6557_s23 = sphi %s6616_s23, %s8181_s23   ;;  %s6553_s22 = sphi %s6614_s22, %s8180_s22   ;;  %s6549_s21 = sphi %s6612_s21, %s8179_s21  }
   0xa   : > { %p48_p0 = scmp.ne.s32.totalorder %s6553_s22, %s6549_s21  ;;  %p8085_p1 = scmp.eq.s32.totalorder %s6633_s25, 0 }
   0xb   : > { %p162_p3 = scmp.eq.s32.totalorder %s4770_s26, 1  ;;  %p4771_p5 = scmp.ge.s32.totalorder %s6561_s24, 1 }
   0xc   : > { %p6642_p4 = por %p8085_p1, %p48_p0  ;;  %p195_p7 = scmp.lt.s32.totalorder %s6561_s24, 3 }
   0xd   : > { %p6647_p6 = por %p162_p3, %p48_p0  ;;  %s6563_s30 = smov [#allocation6]  }
   0xe   : > { %s8113_s27 = scalar_select %p6642_p4, 1, 0 }
   0xf   : > { %s8114_s28 = scalar_select %p6647_p6, 1, 0 }
  0x10   : > { %p6652_p8 = pnand %p4771_p5, %p195_p7  ;;  %s208_s7 = sshll.u32 %s6563_s30, 4  ;;  %s209_s7 = int_to_ptr.vmem [resolvable:$true] %s208_s7 }
  0x11   : > { %s6564_s8 = smov [#allocation9]   ;;  %s6565_s11 = smov [#allocation8]  }
  0x12   : > { %s8115_s29 = scalar_select %p6652_p8, 1, 0 }
  0x13   : > { %p6236_p10 = pneg %p6652_p8  ;;  %s230_s9 = sshll.u32 %s6564_s8, 4  ;;  %s6665_s9 = int_to_ptr.vmem [resolvable:$true] %s230_s9 }
  0x14   : > { %s219_s12 = sshll.u32 %s6565_s11, 4  ;;  %s6313_s15 = scalar_lea.hbm %s8079_s1, 128  ;;  %s6667_s12 = int_to_ptr.vmem [resolvable:$true] %s219_s12 }
  0x15   : > { %p6661_p11 = pnand %p6236_p10, %p8085_p1  ;;  %p6314_p12 = scmp.ne.s32.totalorder %s8079_s1, %s6313_s15 }
  0x16   : > { %p6320_p5 = scmp.lt.u32.totalorder %s6313_s15, %s8079_s1 }
  0x17   : > { %p6677_p13 = pneg %p6661_p11 }
  0x19   : > { %p6316_p0 = pnand %p6677_p13, %p6314_p12 }
  0x1b   : > { %p6317_p3 = pneg %p6316_p0 }
  0x1d   : > { %p6322_p7 = pnand %p6320_p5, %p6317_p3 }
  0x1f   : > { %6325 = shalt.err (!%p6322_p7)
}
  0x20   : > { %s6326_s26 = scalar_lea.vmem %s209_s7, 128  ;;  %p6334_p2 = scmp.lt.s32.totalorder %s209_s7, %s209_s7 }
  0x21   : > { %p6327_p10 = scmp.ne.s32.totalorder %s209_s7, %s6326_s26  ;;  %p6335_p6 = scmp.lt.s32.totalorder %s6326_s26, %s6326_s26 }
  0x23   : > { %p6329_p9 = pnand %p6327_p10, %p6677_p13  ;;  %p6336_p4 = por %p6335_p6, %p6334_p2 }
  0x25   : > { %p6330_p1 = pneg %p6329_p9 }
  0x27   : > { %p6337_p8 = pnand %p6336_p4, %p6330_p1 }
  0x29   : > { %6340 = shalt.err (!%p6337_p8)
}
  0x2a   : > { %6239 = dma.hbm_to_vmem [thread:$0]  (!%p6661_p11), %s8079_s1, 128, %s209_s7, [#allocation7]  }
  0x2b   : > { %s6341_s14 = scalar_lea.hbm %s8081_s3, 16 }
  0x2c   : > { %p6342_p9 = scmp.ne.s32.totalorder %s8081_s3, %s6341_s14  ;;  %p6348_p1 = scmp.lt.u32.totalorder %s6341_s14, %s8081_s3 }
  0x2e   : > { %p6344_p12 = pnand %p6342_p9, %p6677_p13 }
  0x30   : > { %p6345_p2 = pneg %p6344_p12 }
  0x32   : > { %p6350_p4 = pnand %p6348_p1, %p6345_p2 }
  0x34   : > { %6353 = shalt.err (!%p6350_p4)
}
  0x35   : > { %s6354_s7 = scalar_lea.vmem %s6665_s9, 16  ;;  %s6361_s20 = scalar_lea.vmem %s6665_s9, 32 }
  0x36   : > { %p6355_p6 = scmp.ne.s32.totalorder %s6665_s9, %s6354_s7  ;;  %p6362_p3 = scmp.lt.s32.totalorder %s6665_s9, %s6665_s9 }
  0x37   : > { %p6363_p5 = scmp.lt.s32.totalorder %s6361_s20, %s6354_s7 }
  0x38   : > { %p6357_p8 = pnand %p6355_p6, %p6677_p13 }
  0x39   : > { %p6364_p7 = por %p6363_p5, %p6362_p3 }
  0x3a   : > { %p6358_p0 = pneg %p6357_p8 }
  0x3c   : > { %p6365_p10 = pnand %p6364_p7, %p6358_p0 }
  0x3e   : > { %6368 = shalt.err (!%p6365_p10)
}
  0x3f   : > { %6245 = dma.hbm_to_vmem [thread:$0]  (!%p6661_p11), %s8081_s3, 16, %s6665_s9, [#allocation10]  }
  0x40   : > { %s6369_s13 = scalar_lea.hbm %s8080_s2, 16 }
  0x41   : > { %p6370_p9 = scmp.ne.s32.totalorder %s8080_s2, %s6369_s13  ;;  %p6376_p1 = scmp.lt.u32.totalorder %s6369_s13, %s8080_s2 }
  0x43   : > { %p6372_p12 = pnand %p6370_p9, %p6677_p13 }
  0x45   : > { %p6373_p2 = pneg %p6372_p12 }
  0x47   : > { %p6378_p4 = pnand %p6376_p1, %p6373_p2 }
  0x49   : > { %6381 = shalt.err (!%p6378_p4)
}
  0x4a   : > { %s6382_s9 = scalar_lea.vmem %s6667_s12, 16  ;;  %s6389_s19 = scalar_lea.vmem %s6667_s12, 32 }
  0x4b   : > { %p6383_p6 = scmp.ne.s32.totalorder %s6667_s12, %s6382_s9  ;;  %p6390_p3 = scmp.lt.s32.totalorder %s6667_s12, %s6667_s12 }
  0x4c   : > { %p6391_p5 = scmp.lt.s32.totalorder %s6389_s19, %s6382_s9 }
  0x4d   : > { %p6385_p8 = pnand %p6383_p6, %p6677_p13 }
  0x4e   : > { %p6392_p7 = por %p6391_p5, %p6390_p3 }
  0x4f   : > { %p6386_p0 = pneg %p6385_p8 }
  0x51   : > { %p6393_p10 = pnand %p6392_p7, %p6386_p0 }
  0x53   : > { %6396 = shalt.err (!%p6393_p10)
}
  0x54   : > { %6242 = dma.hbm_to_vmem [thread:$0]  (!%p6661_p11), %s8080_s2, 16, %s6667_s12, [#allocation7]  }
  0x55   : > { %s6566_s26 = smov [#allocation11]   ;;  %s6397_s13 = scalar_lea.hbm %s8082_s4, 576 }
  0x56   : > { %s240_s30 = sshll.u32 %s6566_s26, 4  ;;  %p6398_p9 = scmp.ne.s32.totalorder %s8082_s4, %s6397_s13  ;;  %s241_s30 = int_to_ptr.vmem [resolvable:$true] %s240_s30 }
  0x57   : > { %p6404_p1 = scmp.lt.u32.totalorder %s6397_s13, %s8082_s4 }
  0x58   : > { %p6400_p12 = pnand %p6398_p9, %p6677_p13 }
  0x5a   : > { %p6401_p2 = pneg %p6400_p12 }
  0x5c   : > { %p6406_p4 = pnand %p6404_p1, %p6401_p2 }
  0x5e   : > { %6409 = shalt.err (!%p6406_p4)
}
  0x5f   : > { %s6410_s12 = scalar_lea.vmem %s241_s30, 576  ;;  %p6418_p3 = scmp.lt.s32.totalorder %s241_s30, %s241_s30 }
  0x60   : > { %p6411_p6 = scmp.ne.s32.totalorder %s241_s30, %s6410_s12  ;;  %p6419_p5 = scmp.lt.s32.totalorder %s6410_s12, %s6410_s12 }
  0x62   : > { %p6413_p8 = pnand %p6411_p6, %p6677_p13  ;;  %p6420_p7 = por %p6419_p5, %p6418_p3 }
  0x64   : > { %p6414_p0 = pneg %p6413_p8 }
  0x66   : > { %p6421_p10 = pnand %p6420_p7, %p6414_p0 }
  0x68   : > { %6424 = shalt.err (!%p6421_p10)
}
  0x69   : > { %s6567_s9 = smov 64   ;;  %s6568_s18 = smov 4  }
  0x6a   : > { %6248 = dma.hbm_to_vmem [thread:$0]  (!%p6661_p11), %s8082_s4, 576, %s241_s30, [#allocation10], %s6567_s9, %s6567_s9, %s6568_s18  }
  0x6b   : > { %s6760_s20 = sadd.s32 1, %s6561_s24   ;;  %s35_s8 = sadd.s32 1, %s6557_s23 }
  0x6c   : > { %s32_s26 = ssub.s32 %s6561_s24, %s6760_s20  ;;  %p42_p9 = scmp.ne.s32.totalorder %s6557_s23, %s6553_s22 }
  0x6d   : > { %p33_p13 = scmp.eq.s32.totalorder %s32_s26, 0  ;;  %p43_p12 = scmp.eq.s32.totalorder %s6561_s24, 0 }
  0x6e   : > { %p8118_p1 = scmp.eq.s32.totalorder %s6633_s25, 1  ;;  %p6264_p6 = scmp.lt.s32.totalorder %s6561_s24, 2 }
  0x6f   : > { %s6769_s11 = scalar_select %p33_p13, %s6557_s23, %s35_s8  }
  0x70   : > { %p44_p2 = por %p43_p12, %p42_p9  ;;  %p6773_p4 = por %p8118_p1, %p42_p9 }
  0x71   : > { %s254_s10 = sand.u32 1, %s6557_s23   ;;  %s5126_s30 = sshll.u32 %s6561_s24, 12 }
  0x72   : > { %s4777_s14 = sshll.u32 %s254_s10, 8  ;;  %s6783_s17 = scalar_lea.hbm %s8078_s0, %s5126_s30 }
  0x73   : > { %s258_s12 = scalar_lea.vmem [#allocation3], %s4777_s14  ;;  %p6787_p11 = pnand %p6264_p6, %p44_p2 }
  0x74   : > { %s265_s9 = sshll.u32 %s258_s12, 4  ;;  %s6791_s19 = scalar_lea.sflag [#allocation4], %s254_s10  ;;  %s6785_s9 = int_to_ptr.vmem [resolvable:$true] %s265_s9 }
  0x75   : > { %s6425_s7 = scalar_lea.hbm %s6783_s17, 4096  ;;  %p6427_p0 = pneg %p6787_p11 }
  0x76   : > { %p6426_p8 = scmp.ne.s32.totalorder %s6783_s17, %s6425_s7  ;;  %s6430_s14 = scalar_lea.hbm %s8078_s0, 8192 }
  0x77   : > { %p6431_p7 = scmp.lt.u32.totalorder %s6783_s17, %s8078_s0  ;;  %p6432_p10 = scmp.lt.u32.totalorder %s6430_s14, %s6425_s7 }
  0x78   : > { %p6428_p3 = pnand %p6427_p0, %p6426_p8  ;;  %p6434_p9 = scmp.lt.u32.totalorder %s6425_s7, %s6783_s17 }
  0x79   : > { %p6433_p13 = por %p6432_p10, %p6431_p7 }
  0x7a   : > { %p6429_p5 = pneg %p6428_p3 }
  0x7b   : > { %p6435_p12 = por %p6434_p9, %p6433_p13 }
  0x7d   : > { %p6436_p2 = pnand %p6435_p12, %p6429_p5 }
  0x7f   : > { %6439 = shalt.err (!%p6436_p2)
}
  0x80   : > { %s6440_s10 = scalar_lea.vmem %s6785_s9, 4096  ;;  %s6569_s16 = smov [#allocation3]  }
  0x81   : > { %p6441_p1 = scmp.ne.s32.totalorder %s6785_s9, %s6440_s10  ;;  %s6445_s12 = sshll.u32 %s6569_s16, 4  ;;  %s6446_s12 = int_to_ptr.vmem [resolvable:$false] %s6445_s12 }
  0x82   : > { %s6447_s26 = scalar_lea.vmem %s6446_s12, 8192  ;;  %p6448_p3 = scmp.lt.s32.totalorder %s6785_s9, %s6446_s12 }
  0x83   : > { %p6443_p6 = pnand %p6441_p1, %p6427_p0  ;;  %p6449_p7 = scmp.lt.s32.totalorder %s6447_s26, %s6440_s10 }
  0x85   : > { %p6444_p8 = pneg %p6443_p6  ;;  %p6450_p10 = por %p6449_p7, %p6448_p3 }
  0x87   : > { %p6451_p13 = pnand %p6450_p10, %p6444_p8 }
  0x89   : > { %6454 = shalt.err (!%p6451_p13)
}
  0x8a   : > { %s6570_s7 = smov 128   ;;  %s6571_s8 = smov 8  }
  0x8b   : > { %6252 = dma.hbm_to_vmem [thread:$0]  (!%p6787_p11), %s6783_s17, 4096, %s6785_s9, %s6791_s19, %s6570_s7, %s6570_s7, %s6571_s8  }
  0x8c   : > { %p8121_p0 = scmp.ne.s32.totalorder %s8115_s29, 0 }
  0x8e   : > { %277 = sbr.rel (%p8121_p0) target bundleno = 968 (0x3c8), region = 40 }
  0x95   : > { %s6822_s14 = sand.u32 1, %s6553_s22   ;;  %p8122_p5 = scmp.ne.s32.totalorder %s8113_s27, 0 }
  0x96   : > { %s4781_s30 = sshll.u32 %s6822_s14, 8  ;;  %s280_s15 = scalar_lea.sflag [#allocation4], %s6822_s14 }
  0x97   : > { %s6828_s10 = scalar_lea.vmem [#allocation3], %s4781_s30 }
  0x98   : > { %6528 = dma.done.wait (%p8122_p5), %s280_s15, 4096  }
  0x99   : > { %6530 = vsyncadd (%p8122_p5), %s280_s15, 4294963200  ;;  %p8123_p11 = scmp.eq.s32.totalorder %s6633_s25, 0 }
  0x9b   : > { %6532 = dma.done.wait (%p8123_p11), [#allocation7], 144   ;;  %p8124_p9 = pmov %p8123_p11 }
  0x9d   : > { %6534 = vsyncadd (%p8124_p9), [#allocation7], 4294967152  ;;  %p8125_p12 = pmov %p8124_p9 }
  0x9e   : > { %p8126_p2 = pmov %p8124_p9 }
  0x9f   : > { %6536 = dma.done.wait (%p8125_p12), [#allocation10], 592  }
  0xa0   : > { %6538 = vsyncadd (%p8126_p2), [#allocation10], 4294966704  ;;  %vm368_vm0 = vcmask 64512   ;;  %v367_v0 = vld [vmem:[#allocation6] sm:$0xff]  ;;  %v336_v2 = vld [vmem:[%s6828_s10 + $0x8] sm:$0xff]  ;;  %vm864_vm1 = vcmask 31744  }
  0xa1   : > { %v335_v1 = vld [vmem:[%s6828_s10] sm:$0xff]  ;;  %5458 = vmatprep.subr.mxu0 %v367_v0  ;;  %v337_v3 = vld [vmem:[%s6828_s10 + $0x10] sm:$0xff]  ;;  %v338_v4 = vld [vmem:[%s6828_s10 + $0x18] sm:$0xff]  ;;  %v6572_v33 = vmov 0.0   ;;  %vm867_vm2 = vcmask 25600   ;;  %vm873_vm3 = vcmask 24576  }
  0xa2   : > { %5460 = vmatprep.mubr.msk.f32.mxu0 %vm368_vm0, %v335_v1  ;;  %5459 = vmatpush3.msra.mxu0 %v367_v0  ;;  %v339_v5 = vld [vmem:[%s6828_s10 + $0x20] sm:$0xff]  ;;  %v340_v6 = vld [vmem:[%s6828_s10 + $0x28] sm:$0xff]  ;;  %v341_v7 = vld [vmem:[%s6828_s10 + $0x30] sm:$0xff]  ;;  %865 = vst.msk [vmem:[#allocation2] sm:$0xff] %vm864_vm1, %v6572_v33  ;;  %vm1106_vm4 = vcmask 1043456   ;;  %s7840_s27 = scalar_lea.vmem [#allocation12], %s4781_s30 }
  0xa3   : > { %5461 = vmatmul.mubr.msk.f32.vlgmr.msra.gmra.mrb[0].mxu0 %vm368_vm0, %v336_v2  ;;  %v342_v8 = vld [vmem:[%s6828_s10 + $0x38] sm:$0xff]  ;;  %v343_v9 = vld [vmem:[%s6828_s10 + $0x40] sm:$0xff]  ;;  %v344_v10 = vld [vmem:[%s6828_s10 + $0x48] sm:$0xff]  ;;  %866 = vst.msk [vmem:[#allocation2 + $0x8] sm:$0xff] %vm864_vm1, %v6572_v33  ;;  %s5127_s29 = sshll.u32 %s6633_s25, 12  ;;  %s4614_s17 = sshll.u32 %s7840_s27, 4  ;;  %s7991_s17 = int_to_ptr.vmem [resolvable:$true] %s4614_s17 }
  0xa4   : > { %5463 = vmatprep.mubr.msk.f32.mxu0 %vm368_vm0, %v337_v3  ;;  %v345_v11 = vld [vmem:[%s6828_s10 + $0x50] sm:$0xff]  ;;  %v346_v12 = vld [vmem:[%s6828_s10 + $0x58] sm:$0xff]  ;;  %v347_v13 = vld [vmem:[%s6828_s10 + $0x60] sm:$0xff]  ;;  %870 = vst.msk [vmem:[#allocation2 + $0x198] sm:$0xff] %vm864_vm1, %v6572_v33  ;;  %s7989_s19 = scalar_lea.hbm %s8083_s5, %s5127_s29  ;;  %s4596_s16 = scalar_lea.sflag [#allocation5], %s6822_s14 }
  0xa5   : > { %v348_v14 = vld [vmem:[%s6828_s10 + $0x68] sm:$0xff]  ;;  %v349_v15 = vld [vmem:[%s6828_s10 + $0x70] sm:$0xff]  ;;  %v350_v16 = vld [vmem:[%s6828_s10 + $0x78] sm:$0xff]  ;;  %871 = vst.msk [vmem:[#allocation2 + $0x1a0] sm:$0xff] %vm864_vm1, %v6572_v33  ;;  %s6455_s12 = scalar_lea.vmem %s7991_s17, 4096  ;;  %s6573_s26 = smov [#allocation12]  }
  0xa6   : > { %v351_v17 = vld [vmem:[%s6828_s10 + $0x80] sm:$0xff]  ;;  %v352_v18 = vld [vmem:[%s6828_s10 + $0x88] sm:$0xff]  ;;  %v353_v19 = vld [vmem:[%s6828_s10 + $0x90] sm:$0xff]  ;;  %868 = vst.msk [vmem:[#allocation2 + $0x10] sm:$0x3] %vm867_vm2, %v6572_v33  ;;  %p6456_p1 = scmp.ne.s32.totalorder %s7991_s17, %s6455_s12  ;;  %s6459_s7 = sshll.u32 %s6573_s26, 4  ;;  %s6460_s7 = int_to_ptr.vmem [resolvable:$false] %s6459_s7 }
  0xa7   : > { %5464 = vmatmul.mubr.msk.f32.gmra.mrb[2].mxu0 %vm368_vm0, %v338_v4  ;;  %v354_v20 = vld [vmem:[%s6828_s10 + $0x98] sm:$0xff]  ;;  %v355_v21 = vld [vmem:[%s6828_s10 + $0xa0] sm:$0xff]  ;;  %v356_v22 = vld [vmem:[%s6828_s10 + $0xa8] sm:$0xff]  ;;  %872 = vst.msk [vmem:[#allocation2 + $0x1a8] sm:$0x3] %vm867_vm2, %v6572_v33  ;;  %s6461_s8 = scalar_lea.vmem %s6460_s7, 8192  ;;  %p6462_p3 = scmp.lt.s32.totalorder %s7991_s17, %s6460_s7 }
  0xa8   : > { %5466 = vmatprep.mubr.msk.f32.mxu0 %vm368_vm0, %v339_v5  ;;  %v357_v23 = vld [vmem:[%s6828_s10 + $0xb0] sm:$0xff]  ;;  %v358_v24 = vld [vmem:[%s6828_s10 + $0xb8] sm:$0xff]  ;;  %v359_v25 = vld [vmem:[%s6828_s10 + $0xc0] sm:$0xff]  ;;  %874 = vst.msk [vmem:[#allocation2] sm:$0x1] %vm873_vm3, %v6572_v33  ;;  %p6457_p6 = pnand %p6456_p1, %p6773_p4  ;;  %p6463_p7 = scmp.lt.s32.totalorder %s6461_s8, %s6455_s12 }
  0xa9   : > { %v360_v26 = vld [vmem:[%s6828_s10 + $0xc8] sm:$0xff]  ;;  %v361_v27 = vld [vmem:[%s6828_s10 + $0xd0] sm:$0xff]  ;;  %v362_v28 = vld [vmem:[%s6828_s10 + $0xd8] sm:$0xff]  ;;  %875 = vst.msk [vmem:[#allocation2 + $0x18] sm:$0x1] %vm873_vm3, %v6572_v33 }
  0xaa   : > { %v363_v29 = vld [vmem:[%s6828_s10 + $0xe0] sm:$0xff]  ;;  %v364_v30 = vld [vmem:[%s6828_s10 + $0xe8] sm:$0xff]  ;;  %v365_v31 = vld [vmem:[%s6828_s10 + $0xf0] sm:$0xff]  ;;  %876 = vst.msk [vmem:[#allocation2 + $0x30] sm:$0x1] %vm873_vm3, %v6572_v33  ;;  %p6458_p8 = pneg %p6457_p6  ;;  %p6464_p10 = por %p6463_p7, %p6462_p3 }
  0xab   : > { %5467 = vmatmul.mubr.msk.f32.gmra.mrb[4].mxu0 %vm368_vm0, %v340_v6  ;;  %v366_v32 = vld [vmem:[%s6828_s10 + $0xf8] sm:$0xff]  ;;  %877 = vst.msk [vmem:[#allocation2 + $0x48] sm:$0x1] %vm873_vm3, %v6572_v33  ;;  %878 = vst.msk [vmem:[#allocation2 + $0x60] sm:$0x1] %vm873_vm3, %v6572_v33 }
  0xac   : > { %5469 = vmatprep.mubr.msk.f32.mxu0 %vm368_vm0, %v341_v7  ;;  %879 = vst.msk [vmem:[#allocation2 + $0x78] sm:$0x1] %vm873_vm3, %v6572_v33  ;;  %880 = vst.msk [vmem:[#allocation2 + $0x90] sm:$0x1] %vm873_vm3, %v6572_v33  ;;  %v1009_v34 = vld [vmem:[#allocation11 + $0x4] sm:$0xf]  ;;  %p6465_p13 = pnand %p6464_p10, %p6458_p8 }
  0xad   : > { %881 = vst.msk [vmem:[#allocation2 + $0xa8] sm:$0x1] %vm873_vm3, %v6572_v33  ;;  %882 = vst.msk [vmem:[#allocation2 + $0xc0] sm:$0x1] %vm873_vm3, %v6572_v33  ;;  %5508 = vmatprep.subr.msk.mxu0 %vm1106_vm4, %v1009_v34  ;;  %v976_v35 = vld [vmem:[#allocation2 + $0x1] sm:$0xff]  ;;  %v977_v36 = vld [vmem:[#allocation2 + $0x9] sm:$0xff] }
  0xae   : > { %883 = vst.msk [vmem:[#allocation2 + $0xd8] sm:$0x1] %vm873_vm3, %v6572_v33  ;;  %884 = vst.msk [vmem:[#allocation2 + $0xf0] sm:$0x1] %vm873_vm3, %v6572_v33  ;;  %5509 = vmatpush3.msk.msra.mxu0 %vm1106_vm4, %v1009_v34  ;;  %v2472_v37 = vld [vmem:[#allocation11 + $0x10] sm:$0xf] }
  0xaf   : > { %5470 = vmatmul.mubr.msk.f32.gmra.mrb[6].mxu0 %vm368_vm0, %v342_v8  ;;  %885 = vst.msk [vmem:[#allocation2 + $0x108] sm:$0x1] %vm873_vm3, %v6572_v33  ;;  %886 = vst.msk [vmem:[#allocation2 + $0x120] sm:$0x1] %vm873_vm3, %v6572_v33  ;;  %5708 = vmatprep.subr.msk.mxu1 %vm1106_vm4, %v2472_v37  ;;  %v6952_v38 = vld [vmem:[#allocation11 + $0x14] sm:$0xf] }
  0xb0   : > { %5472 = vmatprep.mubr.msk.f32.mxu0 %vm368_vm0, %v343_v9  ;;  %887 = vst.msk [vmem:[#allocation2 + $0x138] sm:$0x1] %vm873_vm3, %v6572_v33  ;;  %888 = vst.msk [vmem:[#allocation2 + $0x150] sm:$0x1] %vm873_vm3, %v6572_v33  ;;  %5709 = vmatpush3.msk.msra.mxu1 %vm1106_vm4, %v2472_v37  ;;  %v975_v39 = vld [vmem:[#allocation11] sm:$0xf] }
  0xb1   : > { %889 = vst.msk [vmem:[#allocation2 + $0x168] sm:$0x1] %vm873_vm3, %v6572_v33  ;;  %890 = vst.msk [vmem:[#allocation2 + $0x180] sm:$0x1] %vm873_vm3, %v6572_v33  ;;  %5758 = vmatprep.subr.msk.mxu1 %vm1106_vm4, %v6952_v38  ;;  %5558 = vmatprep.subr.msk.mxu0 %vm1106_vm4, %v975_v39  ;;  %v6958_v40 = vld [vmem:[#allocation8] ss:$0 sm:$0xff] }
  0xb2   : > { %891 = vst.msk [vmem:[#allocation2 + $0x198] sm:$0x1] %vm873_vm3, %v6572_v33  ;;  %892 = vst.msk [vmem:[#allocation2 + $0x11] sm:$0x1] %vm873_vm3, %v6572_v33  ;;  %v6960_v42 = vld [vmem:[#allocation9] ss:$0 sm:$0xff] }
  0xb3   : > { %5473 = vmatmul.mubr.msk.f32.gmra.mrb[8].mxu0 %vm368_vm0, %v344_v10  ;;  %893 = vst.msk [vmem:[#allocation2 + $0x29] sm:$0x1] %vm873_vm3, %v6572_v33  ;;  %894 = vst.msk [vmem:[#allocation2 + $0x41] sm:$0x1] %vm873_vm3, %v6572_v33  ;;  %v6975_v2 = vld [vmem:[#allocation11 + $0x8] sm:$0xf] }
  0xb4   : > { %5475 = vmatprep.mubr.msk.f32.mxu0 %vm368_vm0, %v345_v11  ;;  %895 = vst.msk [vmem:[#allocation2 + $0x59] sm:$0x1] %vm873_vm3, %v6572_v33  ;;  %896 = vst.msk [vmem:[#allocation2 + $0x71] sm:$0x1] %vm873_vm3, %v6572_v33 }
  0xb5   : > { %897 = vst.msk [vmem:[#allocation2 + $0x89] sm:$0x1] %vm873_vm3, %v6572_v33  ;;  %898 = vst.msk [vmem:[#allocation2 + $0xa1] sm:$0x1] %vm873_vm3, %v6572_v33 }
  0xb6   : > { %899 = vst.msk [vmem:[#allocation2 + $0xb9] sm:$0x1] %vm873_vm3, %v6572_v33  ;;  %900 = vst.msk [vmem:[#allocation2 + $0xd1] sm:$0x1] %vm873_vm3, %v6572_v33 }
  0xb7   : > { %5476 = vmatmul.mubr.msk.f32.gmra.mrb[10].mxu0 %vm368_vm0, %v346_v12  ;;  %901 = vst.msk [vmem:[#allocation2 + $0xe9] sm:$0x1] %vm873_vm3, %v6572_v33  ;;  %902 = vst.msk [vmem:[#allocation2 + $0x101] sm:$0x1] %vm873_vm3, %v6572_v33 }
  0xb8   : > { %5478 = vmatprep.mubr.msk.f32.mxu0 %vm368_vm0, %v347_v13  ;;  %903 = vst.msk [vmem:[#allocation2 + $0x119] sm:$0x1] %vm873_vm3, %v6572_v33  ;;  %904 = vst.msk [vmem:[#allocation2 + $0x131] sm:$0x1] %vm873_vm3, %v6572_v33 }
  0xb9   : > { %905 = vst.msk [vmem:[#allocation2 + $0x149] sm:$0x1] %vm873_vm3, %v6572_v33  ;;  %906 = vst.msk [vmem:[#allocation2 + $0x161] sm:$0x1] %vm873_vm3, %v6572_v33 }
  0xba   : > { %907 = vst.msk [vmem:[#allocation2 + $0x179] sm:$0x1] %vm873_vm3, %v6572_v33  ;;  %908 = vst.msk [vmem:[#allocation2 + $0x191] sm:$0x1] %vm873_vm3, %v6572_v33 }
  0xbb   : > { %5479 = vmatmul.mubr.msk.f32.gmra.mrb[12].mxu0 %vm368_vm0, %v348_v14  ;;  %909 = vst.msk [vmem:[#allocation2 + $0x1a9] sm:$0x1] %vm873_vm3, %v6572_v33 }
  0xbc   : > { %5481 = vmatprep.mubr.msk.f32.mxu0 %vm368_vm0, %v349_v15 }
  0xbf   : > { %5482 = vmatmul.mubr.msk.f32.gmra.mrb[14].mxu0 %vm368_vm0, %v350_v16 }
  0xc0   : > { %5484 = vmatprep.mubr.msk.f32.mxu0 %vm368_vm0, %v351_v17  ;;  %v6987_v17 = vld [vmem:[#allocation11 + $0x18] sm:$0xf] }
  0xc3   : > { %5485 = vmatmul.mubr.msk.f32.gmra.mrb[16].mxu0 %vm368_vm0, %v352_v18 }
  0xc4   : > { %5487 = vmatprep.mubr.msk.f32.mxu0 %vm368_vm0, %v353_v19 }
  0xc7   : > { %5488 = vmatmul.mubr.msk.f32.gmra.mrb[18].mxu0 %vm368_vm0, %v354_v20 }
  0xc8   : > { %5490 = vmatprep.mubr.msk.f32.mxu0 %vm368_vm0, %v355_v21 }
  0xcb   : > { %5491 = vmatmul.mubr.msk.f32.gmra.mrb[20].mxu0 %vm368_vm0, %v356_v22 }
  0xcc   : > { %5493 = vmatprep.mubr.msk.f32.mxu0 %vm368_vm0, %v357_v23 }
  0xcf   : > { %5494 = vmatmul.mubr.msk.f32.gmra.mrb[22].mxu0 %vm368_vm0, %v358_v24 }
  0xd0   : > { %5496 = vmatprep.mubr.msk.f32.mxu0 %vm368_vm0, %v359_v25 }
  0xd3   : > { %5497 = vmatmul.mubr.msk.f32.gmra.mrb[24].mxu0 %vm368_vm0, %v360_v26 }
  0xd4   : > { %5499 = vmatprep.mubr.msk.f32.mxu0 %vm368_vm0, %v361_v27 }
  0xd7   : > { %5500 = vmatmul.mubr.msk.f32.gmra.mrb[26].mxu0 %vm368_vm0, %v362_v28 }
  0xd8   : > { %5502 = vmatprep.mubr.msk.f32.mxu0 %vm368_vm0, %v363_v29 }
  0xdb   : > { %5503 = vmatmul.mubr.msk.f32.gmra.mrb[28].mxu0 %vm368_vm0, %v364_v30 }
  0xdc   : > { %5505 = vmatprep.mubr.msk.f32.mxu0 %vm368_vm0, %v365_v31 }
  0xdf   : > { %5506 = vmatmul.mubr.msk.f32.gmra.mrb[30].mxu0 %vm368_vm0, %v366_v32 }
  0xe0   : > { %5510 = vmatprep.mubr.msk.f32.mxu0 %vm864_vm1, %v976_v35 }
  0xe3   : > { %5511 = vmatmul.mubr.msk.f32.vlgmr.msra.gmra.mrb[32].mxu0 %vm864_vm1, %v977_v36 }
  0xe4   : > { %5559 = vmatpush3.msk.msra.mxu0 %vm1106_vm4, %v975_v39 }
  0xe5   : > { %5608 = vmatprep.subr.msk.mxu0 %vm1106_vm4, %v6975_v2 }
 0x176   : > { %v5462_v41 = vpop.f32.mrb[0].mxu0 }
 0x177   : > { %v698_v43 = vmul.f32 %v5462_v41, %v6958_v40  ;;  %v531_v44 = vpop.f32.mrb[1].mxu0 }
 0x178   : > { %v697_v45 = vmul.f32 %v6958_v40, %v531_v44 }
 0x179   : > { %v737_v46 = vadd.f32 %v6960_v42, %v698_v43 }
 0x17a   : > { %v736_v47 = vadd.f32 %v6960_v42, %v697_v45  ;;  %v5465_v48 = vpop.f32.mrb[2].mxu0 }
 0x17b   : > { %vm769_vm5 = vcmp.gt.f32.partialorder %v737_v46, 0.0  ;;  %v801_v49 = vmul.f32 0.1, %v737_v46  ;;  %v700_v50 = vmul.f32 %v5465_v48, %v6958_v40  ;;  %v541_v51 = vpop.f32.mrb[3].mxu0 }
 0x17c   : > { %vm768_vm6 = vcmp.gt.f32.partialorder %v736_v47, 0.0  ;;  %v800_v52 = vmul.f32 0.1, %v736_v47  ;;  %v699_v53 = vmul.f32 %v6958_v40, %v541_v51 }
 0x17d   : > { %v833_v54 = vsel %vm769_vm5, %v737_v46, %v801_v49  ;;  %v739_v55 = vadd.f32 %v6960_v42, %v700_v50 }
 0x17e   : > { %912 = vst.msk [vmem:[#allocation2 + $0x21] sm:$0xff] %vm864_vm1, %v833_v54  ;;  %v832_v56 = vsel %vm768_vm6, %v736_v47, %v800_v52  ;;  %v738_v57 = vadd.f32 %v6960_v42, %v699_v53  ;;  %v5468_v58 = vpop.f32.mrb[4].mxu0 }
 0x17f   : > { %911 = vst.msk [vmem:[#allocation2 + $0x19] sm:$0xff] %vm864_vm1, %v832_v56  ;;  %vm771_vm7 = vcmp.gt.f32.partialorder %v739_v55, 0.0  ;;  %v803_v59 = vmul.f32 0.1, %v739_v55  ;;  %v702_v60 = vmul.f32 %v5468_v58, %v6958_v40  ;;  %v551_v61 = vpop.f32.mrb[5].mxu0 }
 0x180   : > { %vm770_vm8 = vcmp.gt.f32.partialorder %v738_v57, 0.0  ;;  %v802_v62 = vmul.f32 0.1, %v738_v57  ;;  %v701_v63 = vmul.f32 %v6958_v40, %v551_v61 }
 0x181   : > { %v835_v0 = vsel %vm771_vm7, %v739_v55, %v803_v59  ;;  %v741_v1 = vadd.f32 %v6960_v42, %v702_v60 }
 0x182   : > { %914 = vst.msk [vmem:[#allocation2 + $0x39] sm:$0xff] %vm864_vm1, %v835_v0  ;;  %v834_v3 = vsel %vm770_vm8, %v738_v57, %v802_v62  ;;  %v740_v4 = vadd.f32 %v6960_v42, %v701_v63  ;;  %v5471_v5 = vpop.f32.mrb[6].mxu0 }
 0x183   : > { %913 = vst.msk [vmem:[#allocation2 + $0x31] sm:$0xff] %vm864_vm1, %v834_v3  ;;  %vm773_vm9 = vcmp.gt.f32.partialorder %v741_v1, 0.0  ;;  %v805_v6 = vmul.f32 0.1, %v741_v1  ;;  %v704_v7 = vmul.f32 %v5471_v5, %v6958_v40  ;;  %v561_v8 = vpop.f32.mrb[7].mxu0 }
 0x184   : > { %vm772_vm10 = vcmp.gt.f32.partialorder %v740_v4, 0.0  ;;  %v804_v9 = vmul.f32 0.1, %v740_v4  ;;  %v703_v10 = vmul.f32 %v6958_v40, %v561_v8 }
 0x185   : > { %v837_v11 = vsel %vm773_vm9, %v741_v1, %v805_v6  ;;  %v743_v12 = vadd.f32 %v6960_v42, %v704_v7  ;;  %v979_v21 = vld [vmem:[#allocation2 + $0x21] sm:$0xff] }
 0x186   : > { %916 = vst.msk [vmem:[#allocation2 + $0x51] sm:$0xff] %vm864_vm1, %v837_v11  ;;  %v836_v13 = vsel %vm772_vm10, %v740_v4, %v804_v9  ;;  %v742_v14 = vadd.f32 %v6960_v42, %v703_v10  ;;  %v5474_v15 = vpop.f32.mrb[8].mxu0  ;;  %v978_v16 = vld [vmem:[#allocation2 + $0x19] sm:$0xff] }
 0x187   : > { %915 = vst.msk [vmem:[#allocation2 + $0x49] sm:$0xff] %vm864_vm1, %v836_v13  ;;  %vm775_vm11 = vcmp.gt.f32.partialorder %v743_v12, 0.0  ;;  %v807_v18 = vmul.f32 0.1, %v743_v12  ;;  %v706_v19 = vmul.f32 %v5474_v15, %v6958_v40  ;;  %v571_v20 = vpop.f32.mrb[9].mxu0  ;;  %5513 = vmatprep.mubr.msk.f32.mxu0 %vm864_vm1, %v978_v16  ;;  %5710 = vmatprep.mubr.msk.f32.mxu1 %vm864_vm1, %v978_v16 }
 0x188   : > { %vm774_vm12 = vcmp.gt.f32.partialorder %v742_v14, 0.0  ;;  %v806_v22 = vmul.f32 0.1, %v742_v14  ;;  %v705_v23 = vmul.f32 %v6958_v40, %v571_v20  ;;  %5514 = vmatmul.mubr.msk.f32.gmra.mrb[34].mxu0 %vm864_vm1, %v979_v21  ;;  %5711 = vmatmul.mubr.msk.f32.vlgmr.msra.gmra.mrb[0].mxu1 %vm864_vm1, %v979_v21 }
 0x189   : > { %v839_v24 = vsel %vm775_vm11, %v743_v12, %v807_v18  ;;  %v745_v25 = vadd.f32 %v6960_v42, %v706_v19  ;;  %5759 = vmatpush3.msk.msra.mxu1 %vm1106_vm4, %v6952_v38  ;;  %v981_v33 = vld [vmem:[#allocation2 + $0x39] sm:$0xff] }
 0x18a   : > { %918 = vst.msk [vmem:[#allocation2 + $0x69] sm:$0xff] %vm864_vm1, %v839_v24  ;;  %v838_v26 = vsel %vm774_vm12, %v742_v14, %v806_v22  ;;  %v744_v27 = vadd.f32 %v6960_v42, %v705_v23  ;;  %v5477_v28 = vpop.f32.mrb[10].mxu0  ;;  %v980_v29 = vld [vmem:[#allocation2 + $0x31] sm:$0xff]  ;;  %5808 = vmatprep.subr.msk.mxu1 %vm1106_vm4, %v6987_v17 }
 0x18b   : > { %917 = vst.msk [vmem:[#allocation2 + $0x61] sm:$0xff] %vm864_vm1, %v838_v26  ;;  %vm777_vm13 = vcmp.gt.f32.partialorder %v745_v25, 0.0  ;;  %v809_v30 = vmul.f32 0.1, %v745_v25  ;;  %v708_v31 = vmul.f32 %v5477_v28, %v6958_v40  ;;  %v581_v32 = vpop.f32.mrb[11].mxu0  ;;  %5516 = vmatprep.mubr.msk.f32.mxu0 %vm864_vm1, %v980_v29  ;;  %5713 = vmatprep.mubr.msk.f32.mxu1 %vm864_vm1, %v980_v29 }
 0x18c   : > { %vm776_vm14 = vcmp.gt.f32.partialorder %v744_v27, 0.0  ;;  %v808_v34 = vmul.f32 0.1, %v744_v27  ;;  %v707_v35 = vmul.f32 %v6958_v40, %v581_v32  ;;  %5517 = vmatmul.mubr.msk.f32.gmra.mrb[36].mxu0 %vm864_vm1, %v981_v33  ;;  %5714 = vmatmul.mubr.msk.f32.gmra.mrb[2].mxu1 %vm864_vm1, %v981_v33 }
 0x18d   : > { %v841_v36 = vsel %vm777_vm13, %v745_v25, %v809_v30  ;;  %v747_v37 = vadd.f32 %v6960_v42, %v708_v31  ;;  %v983_v47 = vld [vmem:[#allocation2 + $0x51] sm:$0xff] }
 0x18e   : > { %920 = vst.msk [vmem:[#allocation2 + $0x81] sm:$0xff] %vm864_vm1, %v841_v36  ;;  %v840_v38 = vsel %vm776_vm14, %v744_v27, %v808_v34  ;;  %v746_v39 = vadd.f32 %v6960_v42, %v707_v35  ;;  %v5480_v41 = vpop.f32.mrb[12].mxu0  ;;  %v982_v43 = vld [vmem:[#allocation2 + $0x49] sm:$0xff] }
 0x18f   : > { %919 = vst.msk [vmem:[#allocation2 + $0x79] sm:$0xff] %vm864_vm1, %v840_v38  ;;  %vm779_vm15 = vcmp.gt.f32.partialorder %v747_v37, 0.0  ;;  %v811_v44 = vmul.f32 0.1, %v747_v37  ;;  %v710_v45 = vmul.f32 %v5480_v41, %v6958_v40  ;;  %v591_v46 = vpop.f32.mrb[13].mxu0  ;;  %5519 = vmatprep.mubr.msk.f32.mxu0 %vm864_vm1, %v982_v43  ;;  %5716 = vmatprep.mubr.msk.f32.mxu1 %vm864_vm1, %v982_v43 }
 0x190   : > { %vm778_vm2 = vcmp.gt.f32.partialorder %v746_v39, 0.0  ;;  %v810_v48 = vmul.f32 0.1, %v746_v39  ;;  %v709_v49 = vmul.f32 %v6958_v40, %v591_v46  ;;  %5520 = vmatmul.mubr.msk.f32.gmra.mrb[38].mxu0 %vm864_vm1, %v983_v47  ;;  %5717 = vmatmul.mubr.msk.f32.gmra.mrb[4].mxu1 %vm864_vm1, %v983_v47 }
 0x191   : > { %v843_v50 = vsel %vm779_vm15, %v747_v37, %v811_v44  ;;  %v749_v51 = vadd.f32 %v6960_v42, %v710_v45  ;;  %v985_v59 = vld [vmem:[#allocation2 + $0x69] sm:$0xff] }
 0x192   : > { %922 = vst.msk [vmem:[#allocation2 + $0x99] sm:$0xff] %vm864_vm1, %v843_v50  ;;  %v842_v52 = vsel %vm778_vm2, %v746_v39, %v810_v48  ;;  %v748_v53 = vadd.f32 %v6960_v42, %v709_v49  ;;  %v5483_v54 = vpop.f32.mrb[14].mxu0  ;;  %v984_v55 = vld [vmem:[#allocation2 + $0x61] sm:$0xff] }
 0x193   : > { %921 = vst.msk [vmem:[#allocation2 + $0x91] sm:$0xff] %vm864_vm1, %v842_v52  ;;  %vm781_vm3 = vcmp.gt.f32.partialorder %v749_v51, 0.0  ;;  %v813_v56 = vmul.f32 0.1, %v749_v51  ;;  %v712_v57 = vmul.f32 %v5483_v54, %v6958_v40  ;;  %v601_v58 = vpop.f32.mrb[15].mxu0  ;;  %5522 = vmatprep.mubr.msk.f32.mxu0 %vm864_vm1, %v984_v55  ;;  %5719 = vmatprep.mubr.msk.f32.mxu1 %vm864_vm1, %v984_v55 }
 0x194   : > { %vm780_vm5 = vcmp.gt.f32.partialorder %v748_v53, 0.0  ;;  %v812_v60 = vmul.f32 0.1, %v748_v53  ;;  %v711_v61 = vmul.f32 %v6958_v40, %v601_v58  ;;  %5523 = vmatmul.mubr.msk.f32.gmra.mrb[40].mxu0 %vm864_vm1, %v985_v59  ;;  %5720 = vmatmul.mubr.msk.f32.gmra.mrb[6].mxu1 %vm864_vm1, %v985_v59 }
 0x195   : > { %v845_v62 = vsel %vm781_vm3, %v749_v51, %v813_v56  ;;  %v751_v63 = vadd.f32 %v6960_v42, %v712_v57  ;;  %v987_v8 = vld [vmem:[#allocation2 + $0x81] sm:$0xff] }
 0x196   : > { %924 = vst.msk [vmem:[#allocation2 + $0xb1] sm:$0xff] %vm864_vm1, %v845_v62  ;;  %v844_v0 = vsel %vm780_vm5, %v748_v53, %v812_v60  ;;  %v750_v1 = vadd.f32 %v6960_v42, %v711_v61  ;;  %v5486_v3 = vpop.f32.mrb[16].mxu0  ;;  %v986_v4 = vld [vmem:[#allocation2 + $0x79] sm:$0xff] }
 0x197   : > { %923 = vst.msk [vmem:[#allocation2 + $0xa9] sm:$0xff] %vm864_vm1, %v844_v0  ;;  %vm783_vm6 = vcmp.gt.f32.partialorder %v751_v63, 0.0  ;;  %v815_v5 = vmul.f32 0.1, %v751_v63  ;;  %v714_v6 = vmul.f32 %v5486_v3, %v6958_v40  ;;  %v611_v7 = vpop.f32.mrb[17].mxu0  ;;  %5525 = vmatprep.mubr.msk.f32.mxu0 %vm864_vm1, %v986_v4  ;;  %5722 = vmatprep.mubr.msk.f32.mxu1 %vm864_vm1, %v986_v4 }
 0x198   : > { %vm782_vm7 = vcmp.gt.f32.partialorder %v750_v1, 0.0  ;;  %v814_v9 = vmul.f32 0.1, %v750_v1  ;;  %v713_v10 = vmul.f32 %v6958_v40, %v611_v7  ;;  %5526 = vmatmul.mubr.msk.f32.gmra.mrb[42].mxu0 %vm864_vm1, %v987_v8  ;;  %5723 = vmatmul.mubr.msk.f32.gmra.mrb[8].mxu1 %vm864_vm1, %v987_v8 }
 0x199   : > { %v847_v11 = vsel %vm783_vm6, %v751_v63, %v815_v5  ;;  %v753_v12 = vadd.f32 %v6960_v42, %v714_v6  ;;  %v989_v21 = vld [vmem:[#allocation2 + $0x99] sm:$0xff] }
 0x19a   : > { %926 = vst.msk [vmem:[#allocation2 + $0xc9] sm:$0xff] %vm864_vm1, %v847_v11  ;;  %v846_v13 = vsel %vm782_vm7, %v750_v1, %v814_v9  ;;  %v752_v14 = vadd.f32 %v6960_v42, %v713_v10  ;;  %v5489_v15 = vpop.f32.mrb[18].mxu0  ;;  %v988_v16 = vld [vmem:[#allocation2 + $0x91] sm:$0xff] }
 0x19b   : > { %925 = vst.msk [vmem:[#allocation2 + $0xc1] sm:$0xff] %vm864_vm1, %v846_v13  ;;  %vm785_vm8 = vcmp.gt.f32.partialorder %v753_v12, 0.0  ;;  %v817_v18 = vmul.f32 0.1, %v753_v12  ;;  %v716_v19 = vmul.f32 %v5489_v15, %v6958_v40  ;;  %v621_v20 = vpop.f32.mrb[19].mxu0  ;;  %5528 = vmatprep.mubr.msk.f32.mxu0 %vm864_vm1, %v988_v16  ;;  %5725 = vmatprep.mubr.msk.f32.mxu1 %vm864_vm1, %v988_v16 }
 0x19c   : > { %vm784_vm9 = vcmp.gt.f32.partialorder %v752_v14, 0.0  ;;  %v816_v22 = vmul.f32 0.1, %v752_v14  ;;  %v715_v23 = vmul.f32 %v6958_v40, %v621_v20  ;;  %5529 = vmatmul.mubr.msk.f32.gmra.mrb[44].mxu0 %vm864_vm1, %v989_v21  ;;  %5726 = vmatmul.mubr.msk.f32.gmra.mrb[10].mxu1 %vm864_vm1, %v989_v21 }
 0x19d   : > { %v849_v24 = vsel %vm785_vm8, %v753_v12, %v817_v18  ;;  %v755_v25 = vadd.f32 %v6960_v42, %v716_v19  ;;  %v7061_v33 = vld [vmem:[#allocation2 + $0xb1] sm:$0xff] }
 0x19e   : > { %928 = vst.msk [vmem:[#allocation2 + $0xe1] sm:$0xff] %vm864_vm1, %v849_v24  ;;  %v848_v26 = vsel %vm784_vm9, %v752_v14, %v816_v22  ;;  %v754_v27 = vadd.f32 %v6960_v42, %v715_v23  ;;  %v5492_v28 = vpop.f32.mrb[20].mxu0  ;;  %v7053_v29 = vld [vmem:[#allocation2 + $0xa9] sm:$0xff]  ;;  %8128 = vst [vmem:[#allocation21_spill] sm:$0xff] %v7061_v33 }
 0x19f   : > { %8127 = vst [vmem:[#allocation20_spill] sm:$0xff] %v7053_v29  ;;  %927 = vst.msk [vmem:[#allocation2 + $0xd9] sm:$0xff] %vm864_vm1, %v848_v26  ;;  %vm787_vm10 = vcmp.gt.f32.partialorder %v755_v25, 0.0  ;;  %v819_v30 = vmul.f32 0.1, %v755_v25  ;;  %v718_v31 = vmul.f32 %v5492_v28, %v6958_v40  ;;  %v631_v32 = vpop.f32.mrb[21].mxu0  ;;  %5531 = vmatprep.mubr.msk.f32.mxu0 %vm864_vm1, %v7053_v29  ;;  %5728 = vmatprep.mubr.msk.f32.mxu1 %vm864_vm1, %v7053_v29 }
 0x1a0   : > { %vm786_vm11 = vcmp.gt.f32.partialorder %v754_v27, 0.0  ;;  %v818_v34 = vmul.f32 0.1, %v754_v27  ;;  %v717_v35 = vmul.f32 %v6958_v40, %v631_v32  ;;  %5532 = vmatmul.mubr.msk.f32.gmra.mrb[46].mxu0 %vm864_vm1, %v7061_v33  ;;  %5729 = vmatmul.mubr.msk.f32.gmra.mrb[12].mxu1 %vm864_vm1, %v7061_v33 }
 0x1a1   : > { %v851_v36 = vsel %vm787_vm10, %v755_v25, %v819_v30  ;;  %v757_v37 = vadd.f32 %v6960_v42, %v718_v31  ;;  %v7079_v47 = vld [vmem:[#allocation2 + $0xc9] sm:$0xff] }
 0x1a2   : > { %930 = vst.msk [vmem:[#allocation2 + $0xf9] sm:$0xff] %vm864_vm1, %v851_v36  ;;  %v850_v38 = vsel %vm786_vm11, %v754_v27, %v818_v34  ;;  %v756_v39 = vadd.f32 %v6960_v42, %v717_v35  ;;  %v5495_v41 = vpop.f32.mrb[22].mxu0  ;;  %v7071_v43 = vld [vmem:[#allocation2 + $0xc1] sm:$0xff]  ;;  %8130 = vst [vmem:[#allocation23_spill] sm:$0xff] %v7079_v47 }
 0x1a3   : > { %8129 = vst [vmem:[#allocation22_spill] sm:$0xff] %v7071_v43  ;;  %929 = vst.msk [vmem:[#allocation2 + $0xf1] sm:$0xff] %vm864_vm1, %v850_v38  ;;  %vm789_vm12 = vcmp.gt.f32.partialorder %v757_v37, 0.0  ;;  %v821_v44 = vmul.f32 0.1, %v757_v37  ;;  %v720_v45 = vmul.f32 %v5495_v41, %v6958_v40  ;;  %v641_v46 = vpop.f32.mrb[23].mxu0  ;;  %5534 = vmatprep.mubr.msk.f32.mxu0 %vm864_vm1, %v7071_v43  ;;  %5731 = vmatprep.mubr.msk.f32.mxu1 %vm864_vm1, %v7071_v43 }
 0x1a4   : > { %vm788_vm13 = vcmp.gt.f32.partialorder %v756_v39, 0.0  ;;  %v820_v48 = vmul.f32 0.1, %v756_v39  ;;  %v719_v49 = vmul.f32 %v6958_v40, %v641_v46  ;;  %5535 = vmatmul.mubr.msk.f32.gmra.mrb[48].mxu0 %vm864_vm1, %v7079_v47  ;;  %5732 = vmatmul.mubr.msk.f32.gmra.mrb[14].mxu1 %vm864_vm1, %v7079_v47  ;;  %v1659_v47 = vld [vmem:[#allocation2 + $0x2] sm:$0xff] }
 0x1a5   : > { %v853_v50 = vsel %vm789_vm12, %v757_v37, %v821_v44  ;;  %v759_v51 = vadd.f32 %v6960_v42, %v720_v45  ;;  %v7097_v59 = vld [vmem:[#allocation2 + $0xe1] sm:$0xff] }
 0x1a6   : > { %932 = vst.msk [vmem:[#allocation2 + $0x111] sm:$0xff] %vm864_vm1, %v853_v50  ;;  %v852_v52 = vsel %vm788_vm13, %v756_v39, %v820_v48  ;;  %v758_v53 = vadd.f32 %v6960_v42, %v719_v49  ;;  %v5498_v54 = vpop.f32.mrb[24].mxu0  ;;  %v7089_v55 = vld [vmem:[#allocation2 + $0xd9] sm:$0xff]  ;;  %8132 = vst [vmem:[#allocation25_spill] sm:$0xff] %v7097_v59 }
 0x1a7   : > { %8131 = vst [vmem:[#allocation24_spill] sm:$0xff] %v7089_v55  ;;  %931 = vst.msk [vmem:[#allocation2 + $0x109] sm:$0xff] %vm864_vm1, %v852_v52  ;;  %vm791_vm14 = vcmp.gt.f32.partialorder %v759_v51, 0.0  ;;  %v823_v56 = vmul.f32 0.1, %v759_v51  ;;  %v722_v57 = vmul.f32 %v5498_v54, %v6958_v40  ;;  %v651_v58 = vpop.f32.mrb[25].mxu0  ;;  %5537 = vmatprep.mubr.msk.f32.mxu0 %vm864_vm1, %v7089_v55  ;;  %5734 = vmatprep.mubr.msk.f32.mxu1 %vm864_vm1, %v7089_v55 }
 0x1a8   : > { %vm790_vm15 = vcmp.gt.f32.partialorder %v758_v53, 0.0  ;;  %v822_v60 = vmul.f32 0.1, %v758_v53  ;;  %v721_v61 = vmul.f32 %v6958_v40, %v651_v58  ;;  %5538 = vmatmul.mubr.msk.f32.gmra.mrb[50].mxu0 %vm864_vm1, %v7097_v59  ;;  %5735 = vmatmul.mubr.msk.f32.gmra.mrb[16].mxu1 %vm864_vm1, %v7097_v59 }
 0x1a9   : > { %v855_v62 = vsel %vm791_vm14, %v759_v51, %v823_v56  ;;  %v761_v63 = vadd.f32 %v6960_v42, %v722_v57  ;;  %v7115_v8 = vld [vmem:[#allocation2 + $0xf9] sm:$0xff]  ;;  %v944_v56 = vld [vmem:[#allocation2 + $0x8] sm:$0xff] }
 0x1aa   : > { %934 = vst.msk [vmem:[#allocation2 + $0x129] sm:$0xff] %vm864_vm1, %v855_v62  ;;  %v854_v0 = vsel %vm790_vm15, %v758_v53, %v822_v60  ;;  %v760_v1 = vadd.f32 %v6960_v42, %v721_v61  ;;  %v5501_v3 = vpop.f32.mrb[26].mxu0  ;;  %v7107_v4 = vld [vmem:[#allocation2 + $0xf1] sm:$0xff]  ;;  %8134 = vst [vmem:[#allocation27_spill] sm:$0xff] %v7115_v8  ;;  %v943_v53 = vld [vmem:[#allocation2] sm:$0xff] }
 0x1ab   : > { %8133 = vst [vmem:[#allocation26_spill] sm:$0xff] %v7107_v4  ;;  %933 = vst.msk [vmem:[#allocation2 + $0x121] sm:$0xff] %vm864_vm1, %v854_v0  ;;  %vm793_vm2 = vcmp.gt.f32.partialorder %v761_v63, 0.0  ;;  %v825_v5 = vmul.f32 0.1, %v761_v63  ;;  %v724_v6 = vmul.f32 %v5501_v3, %v6958_v40  ;;  %v661_v7 = vpop.f32.mrb[27].mxu0  ;;  %5540 = vmatprep.mubr.msk.f32.mxu0 %vm864_vm1, %v7107_v4  ;;  %5737 = vmatprep.mubr.msk.f32.mxu1 %vm864_vm1, %v7107_v4 }
 0x1ac   : > { %vm792_vm3 = vcmp.gt.f32.partialorder %v760_v1, 0.0  ;;  %v824_v9 = vmul.f32 0.1, %v760_v1  ;;  %v723_v10 = vmul.f32 %v6958_v40, %v661_v7  ;;  %5541 = vmatmul.mubr.msk.f32.gmra.mrb[52].mxu0 %vm864_vm1, %v7115_v8  ;;  %5738 = vmatmul.mubr.msk.f32.gmra.mrb[18].mxu1 %vm864_vm1, %v7115_v8  ;;  %v7210_v60 = vld [vmem:[#allocation2 + $0x18] sm:$0xff]  ;;  %v7214_v62 = vld [vmem:[#allocation11 + $0xc] sm:$0xf] }
 0x1ad   : > { %v857_v11 = vsel %vm793_vm2, %v761_v63, %v825_v5  ;;  %v763_v12 = vadd.f32 %v6960_v42, %v724_v6  ;;  %v7133_v21 = vld [vmem:[#allocation2 + $0x111] sm:$0xff]  ;;  %8147 = vst [vmem:[#allocation40_spill] sm:$0xff] %v7210_v60  ;;  %v7212_v61 = vld [vmem:[#allocation2 + $0x1a] sm:$0xff]  ;;  %v7224_v0 = vld [vmem:[#allocation2 + $0x22] sm:$0xff] }
 0x1ae   : > { %936 = vst.msk [vmem:[#allocation2 + $0x141] sm:$0xff] %vm864_vm1, %v857_v11  ;;  %v856_v13 = vsel %vm792_vm3, %v760_v1, %v824_v9  ;;  %v762_v14 = vadd.f32 %v6960_v42, %v723_v10  ;;  %v5504_v15 = vpop.f32.mrb[28].mxu0  ;;  %v7125_v16 = vld [vmem:[#allocation2 + $0x109] sm:$0xff]  ;;  %8136 = vst [vmem:[#allocation29_spill] sm:$0xff] %v7133_v21  ;;  %v7222_v63 = vld [vmem:[#allocation2 + $0x20] sm:$0xff] }
 0x1af   : > { %8135 = vst [vmem:[#allocation28_spill] sm:$0xff] %v7125_v16  ;;  %935 = vst.msk [vmem:[#allocation2 + $0x139] sm:$0xff] %vm864_vm1, %v856_v13  ;;  %vm795_vm5 = vcmp.gt.f32.partialorder %v763_v12, 0.0  ;;  %v827_v18 = vmul.f32 0.1, %v763_v12  ;;  %v726_v19 = vmul.f32 %v5504_v15, %v6958_v40  ;;  %v671_v20 = vpop.f32.mrb[29].mxu0  ;;  %5543 = vmatprep.mubr.msk.f32.mxu0 %vm864_vm1, %v7125_v16  ;;  %5740 = vmatprep.mubr.msk.f32.mxu1 %vm864_vm1, %v7125_v16 }
 0x1b0   : > { %vm794_vm6 = vcmp.gt.f32.partialorder %v762_v14, 0.0  ;;  %v826_v22 = vmul.f32 0.1, %v762_v14  ;;  %v725_v23 = vmul.f32 %v6958_v40, %v671_v20  ;;  %5544 = vmatmul.mubr.msk.f32.gmra.mrb[54].mxu0 %vm864_vm1, %v7133_v21  ;;  %5741 = vmatmul.mubr.msk.f32.gmra.mrb[20].mxu1 %vm864_vm1, %v7133_v21  ;;  %8148 = vst [vmem:[#allocation41_spill] sm:$0xff] %v7222_v63  ;;  %v7226_v1 = vld [vmem:[#allocation11 + $0x1c] sm:$0xf] }
 0x1b1   : > { %v859_v24 = vsel %vm795_vm5, %v763_v12, %v827_v18  ;;  %v765_v25 = vadd.f32 %v6960_v42, %v726_v19  ;;  %v7151_v35 = vld [vmem:[#allocation2 + $0x129] sm:$0xff]  ;;  %v7246_v5 = vld [vmem:[#allocation2 + $0x38] sm:$0xff]  ;;  %v7270_v11 = vld [vmem:[#allocation2 + $0x60] sm:$0xff] }
 0x1b2   : > { %938 = vst.msk [vmem:[#allocation2 + $0x159] sm:$0xff] %vm864_vm1, %v859_v24  ;;  %v858_v26 = vsel %vm794_vm6, %v762_v14, %v826_v22  ;;  %v764_v27 = vadd.f32 %v6960_v42, %v725_v23  ;;  %v5507_v28 = vpop.f32.mrb[30].mxu0  ;;  %v7143_v30 = vld [vmem:[#allocation2 + $0x121] sm:$0xff]  ;;  %8138 = vst [vmem:[#allocation31_spill] sm:$0xff] %v7151_v35  ;;  %v7234_v3 = vld [vmem:[#allocation2 + $0x30] sm:$0xff] }
 0x1b3   : > { %8137 = vst [vmem:[#allocation30_spill] sm:$0xff] %v7143_v30  ;;  %937 = vst.msk [vmem:[#allocation2 + $0x151] sm:$0xff] %vm864_vm1, %v858_v26  ;;  %vm797_vm7 = vcmp.gt.f32.partialorder %v765_v25, 0.0  ;;  %v829_v31 = vmul.f32 0.1, %v765_v25  ;;  %v728_v32 = vmul.f32 %v5507_v28, %v6958_v40  ;;  %v681_v34 = vpop.f32.mrb[31].mxu0  ;;  %5546 = vmatprep.mubr.msk.f32.mxu0 %vm864_vm1, %v7143_v30  ;;  %5743 = vmatprep.mubr.msk.f32.mxu1 %vm864_vm1, %v7143_v30 }
 0x1b4   : > { %vm796_vm8 = vcmp.gt.f32.partialorder %v764_v27, 0.0  ;;  %v828_v36 = vmul.f32 0.1, %v764_v27  ;;  %v727_v37 = vmul.f32 %v6958_v40, %v681_v34  ;;  %5547 = vmatmul.mubr.msk.f32.gmra.mrb[56].mxu0 %vm864_vm1, %v7151_v35  ;;  %5744 = vmatmul.mubr.msk.f32.gmra.mrb[22].mxu1 %vm864_vm1, %v7151_v35  ;;  %v7248_v6 = vld [vmem:[#allocation2 + $0x3a] sm:$0xff]  ;;  %v7256_v7 = vld [vmem:[#allocation2 + $0x4a] sm:$0xff]  ;;  %v7264_v10 = vld [vmem:[#allocation2 + $0x52] sm:$0xff] }
 0x1b5   : > { %v861_v38 = vsel %vm797_vm7, %v765_v25, %v829_v31  ;;  %v767_v39 = vadd.f32 %v6960_v42, %v728_v32  ;;  %v7168_v46 = vld [vmem:[#allocation2 + $0x141] sm:$0xff]  ;;  %v7262_v9 = vld [vmem:[#allocation2 + $0x50] sm:$0xff]  ;;  %v7286_v15 = vld [vmem:[#allocation2 + $0x78] sm:$0xff] }
 0x1b6   : > { %940 = vst.msk [vmem:[#allocation2 + $0x171] sm:$0xff] %vm864_vm1, %v861_v38  ;;  %v860_v41 = vsel %vm796_vm8, %v764_v27, %v828_v36  ;;  %v766_v44 = vadd.f32 %v6960_v42, %v727_v37  ;;  %v7161_v45 = vld [vmem:[#allocation2 + $0x139] sm:$0xff]  ;;  %8140 = vst [vmem:[#allocation33_spill] sm:$0xff] %v7168_v46  ;;  %v7272_v12 = vld [vmem:[#allocation2 + $0x62] sm:$0xff] }
 0x1b7   : > { %8139 = vst [vmem:[#allocation32_spill] sm:$0xff] %v7161_v45  ;;  %939 = vst.msk [vmem:[#allocation2 + $0x169] sm:$0xff] %vm864_vm1, %v860_v41  ;;  %vm799_vm9 = vcmp.gt.f32.partialorder %v767_v39, 0.0  ;;  %v831_v40 = vmul.f32 0.1, %v767_v39  ;;  %5549 = vmatprep.mubr.msk.f32.mxu0 %vm864_vm1, %v7161_v45  ;;  %5746 = vmatprep.mubr.msk.f32.mxu1 %vm864_vm1, %v7161_v45  ;;  %v7278_v13 = vld [vmem:[#allocation2 + $0x68] sm:$0xff] }
 0x1b8   : > { %vm798_vm10 = vcmp.gt.f32.partialorder %v766_v44, 0.0  ;;  %v830_v48 = vmul.f32 0.1, %v766_v44  ;;  %5550 = vmatmul.mubr.msk.f32.gmra.mrb[58].mxu0 %vm864_vm1, %v7168_v46  ;;  %5747 = vmatmul.mubr.msk.f32.gmra.mrb[24].mxu1 %vm864_vm1, %v7168_v46  ;;  %v7280_v14 = vld [vmem:[#allocation2 + $0x6a] sm:$0xff]  ;;  %v7288_v18 = vld [vmem:[#allocation2 + $0x7a] sm:$0xff]  ;;  %v7296_v20 = vld [vmem:[#allocation2 + $0x82] sm:$0xff] }
 0x1b9   : > { %v863_v42 = vsel %vm799_vm9, %v767_v39, %v831_v40  ;;  %v7182_v51 = vld [vmem:[#allocation2 + $0x159] sm:$0xff]  ;;  %v7302_v22 = vld [vmem:[#allocation2 + $0x90] sm:$0xff]  ;;  %v7318_v26 = vld [vmem:[#allocation2 + $0xa8] sm:$0xff] }
 0x1ba   : > { %942 = vst.msk [vmem:[#allocation2 + $0x189] sm:$0xff] %vm864_vm1, %v863_v42  ;;  %v862_v49 = vsel %vm798_vm10, %v766_v44, %v830_v48  ;;  %v7175_v50 = vld [vmem:[#allocation2 + $0x151] sm:$0xff]  ;;  %8142 = vst [vmem:[#allocation35_spill] sm:$0xff] %v7182_v51  ;;  %v7294_v19 = vld [vmem:[#allocation2 + $0x80] sm:$0xff] }
 0x1bb   : > { %8141 = vst [vmem:[#allocation34_spill] sm:$0xff] %v7175_v50  ;;  %941 = vst.msk [vmem:[#allocation2 + $0x181] sm:$0xff] %vm864_vm1, %v862_v49  ;;  %5552 = vmatprep.mubr.msk.f32.mxu0 %vm864_vm1, %v7175_v50  ;;  %5749 = vmatprep.mubr.msk.f32.mxu1 %vm864_vm1, %v7175_v50  ;;  %v7304_v23 = vld [vmem:[#allocation2 + $0x92] sm:$0xff]  ;;  %v7312_v25 = vld [vmem:[#allocation2 + $0x9a] sm:$0xff] }
 0x1bc   : > { %5553 = vmatmul.mubr.msk.f32.gmra.mrb[60].mxu0 %vm864_vm1, %v7182_v51  ;;  %5750 = vmatmul.mubr.msk.f32.gmra.mrb[26].mxu1 %vm864_vm1, %v7182_v51  ;;  %v7310_v24 = vld [vmem:[#allocation2 + $0x98] sm:$0xff]  ;;  %v7320_v27 = vld [vmem:[#allocation2 + $0xaa] sm:$0xff]  ;;  %v7334_v32 = vld [vmem:[#allocation2 + $0xc0] sm:$0xff] }
 0x1bd   : > { %v7194_v54 = vld [vmem:[#allocation2 + $0x171] sm:$0xff]  ;;  %v7336_v34 = vld [vmem:[#allocation2 + $0xc2] sm:$0xff]  ;;  %v7352_v39 = vld [vmem:[#allocation2 + $0xda] sm:$0xff] }
 0x1be   : > { %v7188_v52 = vld [vmem:[#allocation2 + $0x169] sm:$0xff]  ;;  %8144 = vst [vmem:[#allocation37_spill] sm:$0xff] %v7194_v54  ;;  %v7328_v31 = vld [vmem:[#allocation2 + $0xb2] sm:$0xff]  ;;  %v7358_v41 = vld [vmem:[#allocation2 + $0xe0] sm:$0xff] }
 0x1bf   : > { %8143 = vst [vmem:[#allocation36_spill] sm:$0xff] %v7188_v52  ;;  %5555 = vmatprep.mubr.msk.f32.mxu0 %vm864_vm1, %v7188_v52  ;;  %5752 = vmatprep.mubr.msk.f32.mxu1 %vm864_vm1, %v7188_v52  ;;  %v7326_v28 = vld [vmem:[#allocation2 + $0xb0] sm:$0xff]  ;;  %v7342_v36 = vld [vmem:[#allocation2 + $0xc8] sm:$0xff]  ;;  %v7350_v38 = vld [vmem:[#allocation2 + $0xd8] sm:$0xff] }
 0x1c0   : > { %5556 = vmatmul.mubr.msk.f32.gmra.mrb[62].mxu0 %vm864_vm1, %v7194_v54  ;;  %5753 = vmatmul.mubr.msk.f32.gmra.mrb[28].mxu1 %vm864_vm1, %v7194_v54  ;;  %v7344_v37 = vld [vmem:[#allocation2 + $0xca] sm:$0xff]  ;;  %v7360_v44 = vld [vmem:[#allocation2 + $0xe2] sm:$0xff]  ;;  %v7368_v48 = vld [vmem:[#allocation2 + $0xf2] sm:$0xff] }
 0x1c1   : > { %5560 = vmatprep.mubr.msk.f32.mxu0 %vm864_vm1, %v943_v53  ;;  %v7205_v58 = vld [vmem:[#allocation2 + $0x189] sm:$0xff]  ;;  %v7374_v42 = vld [vmem:[#allocation2 + $0xf8] sm:$0xff]  ;;  %v7398_v54 = vld [vmem:[#allocation2 + $0x120] sm:$0xff] }
 0x1c2   : > { %v7201_v57 = vld [vmem:[#allocation2 + $0x181] sm:$0xff]  ;;  %8146 = vst [vmem:[#allocation39_spill] sm:$0xff] %v7205_v58  ;;  %v7366_v40 = vld [vmem:[#allocation2 + $0xf0] sm:$0xff]  ;;  %v7414_v46 = vld [vmem:[#allocation2 + $0x138] sm:$0xff] }
 0x1c3   : > { %8145 = vst [vmem:[#allocation38_spill] sm:$0xff] %v7201_v57  ;;  %5755 = vmatprep.mubr.msk.f32.mxu1 %vm864_vm1, %v7201_v57  ;;  %v7376_v49 = vld [vmem:[#allocation2 + $0xfa] sm:$0xff]  ;;  %v7382_v53 = vld [vmem:[#allocation2 + $0x108] sm:$0xff]  ;;  %v7392_v57 = vld [vmem:[#allocation2 + $0x112] sm:$0xff] }
 0x1c4   : > { %5561 = vmatmul.mubr.msk.f32.vlgmr.msra.gmra.mrb[32].mxu0 %vm864_vm1, %v944_v56  ;;  %5756 = vmatmul.mubr.msk.f32.gmra.mrb[30].mxu1 %vm864_vm1, %v7205_v58  ;;  %v7384_v56 = vld [vmem:[#allocation2 + $0x10a] sm:$0xff]  ;;  %v7400_v52 = vld [vmem:[#allocation2 + $0x122] sm:$0xff]  ;;  %v7416_v45 = vld [vmem:[#allocation2 + $0x13a] sm:$0xff] }
 0x1c5   : > { %5563 = vmatprep.mubr.msk.f32.mxu0 %vm864_vm1, %v7210_v60  ;;  %5760 = vmatprep.mubr.msk.f32.mxu1 %vm864_vm1, %v7212_v61  ;;  %v7390_v58 = vld [vmem:[#allocation2 + $0x110] sm:$0xff]  ;;  %v7406_v51 = vld [vmem:[#allocation2 + $0x128] sm:$0xff]  ;;  %v7422_v35 = vld [vmem:[#allocation2 + $0x140] sm:$0xff] }
 0x1c6   : > { %5609 = vmatpush3.msk.msra.mxu0 %vm1106_vm4, %v6975_v2  ;;  %v7240_v2 = vld [vmem:[#allocation2 + $0x32] sm:$0xff]  ;;  %v7408_v50 = vld [vmem:[#allocation2 + $0x12a] sm:$0xff]  ;;  %v7424_v30 = vld [vmem:[#allocation2 + $0x142] sm:$0xff] }
 0x1c7   : > { %5658 = vmatprep.subr.msk.mxu0 %vm1106_vm4, %v7214_v62  ;;  %v7430_v21 = vld [vmem:[#allocation2 + $0x150] sm:$0xff]  ;;  %v7438_v8 = vld [vmem:[#allocation2 + $0x158] sm:$0xff]  ;;  %v7446_v59 = vld [vmem:[#allocation2 + $0x168] sm:$0xff] }
 0x1c8   : > { %5564 = vmatmul.mubr.msk.f32.gmra.mrb[34].mxu0 %vm864_vm1, %v7222_v63  ;;  %5761 = vmatmul.mubr.msk.f32.vlgmr.msra.gmra.mrb[0].mxu1 %vm864_vm1, %v7224_v0  ;;  %v7432_v16 = vld [vmem:[#allocation2 + $0x152] sm:$0xff]  ;;  %v7440_v4 = vld [vmem:[#allocation2 + $0x15a] sm:$0xff]  ;;  %v7448_v55 = vld [vmem:[#allocation2 + $0x16a] sm:$0xff] }
 0x1c9   : > { %5809 = vmatpush3.msk.msra.mxu1 %vm1106_vm4, %v6987_v17  ;;  %5566 = vmatprep.mubr.msk.f32.mxu0 %vm864_vm1, %v7234_v3  ;;  %v7254_v17 = vld [vmem:[#allocation2 + $0x48] sm:$0xff]  ;;  %v7454_v43 = vld [vmem:[#allocation2 + $0x170] sm:$0xff] }
 0x1ca   : > { %5763 = vmatprep.mubr.msk.f32.mxu1 %vm864_vm1, %v7240_v2  ;;  %5858 = vmatprep.subr.msk.mxu1 %vm1106_vm4, %v7226_v1  ;;  %v7456_v33 = vld [vmem:[#allocation2 + $0x172] sm:$0xff]  ;;  %v7462_v29 = vld [vmem:[#allocation2 + $0x182] sm:$0xff]  ;;  %v1660_v63 = vld [vmem:[#allocation2 + $0xa] sm:$0xff] }
 0x1cb   : > { %8149 = vst [vmem:[#allocation42_spill] sm:$0xff] %v7456_v33  ;;  %8150 = vst [vmem:[#allocation43_spill] sm:$0xff] %v7462_v29  ;;  %v7467_v60 = vld [vmem:[#allocation2 + $0x18a] sm:$0xff] }
 0x1cc   : > { %5567 = vmatmul.mubr.msk.f32.gmra.mrb[36].mxu0 %vm864_vm1, %v7246_v5  ;;  %5764 = vmatmul.mubr.msk.f32.gmra.mrb[2].mxu1 %vm864_vm1, %v7248_v6  ;;  %8151 = vst [vmem:[#allocation44_spill] sm:$0xff] %v7467_v60 }
 0x1cd   : > { %5569 = vmatprep.mubr.msk.f32.mxu0 %vm864_vm1, %v7254_v17  ;;  %5766 = vmatprep.mubr.msk.f32.mxu1 %vm864_vm1, %v7256_v7 }
 0x1d0   : > { %5570 = vmatmul.mubr.msk.f32.gmra.mrb[38].mxu0 %vm864_vm1, %v7262_v9  ;;  %5767 = vmatmul.mubr.msk.f32.gmra.mrb[4].mxu1 %vm864_vm1, %v7264_v10 }
 0x1d1   : > { %5572 = vmatprep.mubr.msk.f32.mxu0 %vm864_vm1, %v7270_v11  ;;  %5769 = vmatprep.mubr.msk.f32.mxu1 %vm864_vm1, %v7272_v12 }
 0x1d4   : > { %5573 = vmatmul.mubr.msk.f32.gmra.mrb[40].mxu0 %vm864_vm1, %v7278_v13  ;;  %5770 = vmatmul.mubr.msk.f32.gmra.mrb[6].mxu1 %vm864_vm1, %v7280_v14 }
 0x1d5   : > { %5575 = vmatprep.mubr.msk.f32.mxu0 %vm864_vm1, %v7286_v15  ;;  %5772 = vmatprep.mubr.msk.f32.mxu1 %vm864_vm1, %v7288_v18 }
 0x1d8   : > { %5576 = vmatmul.mubr.msk.f32.gmra.mrb[42].mxu0 %vm864_vm1, %v7294_v19  ;;  %5773 = vmatmul.mubr.msk.f32.gmra.mrb[8].mxu1 %vm864_vm1, %v7296_v20 }
 0x1d9   : > { %5578 = vmatprep.mubr.msk.f32.mxu0 %vm864_vm1, %v7302_v22  ;;  %5775 = vmatprep.mubr.msk.f32.mxu1 %vm864_vm1, %v7304_v23 }
 0x1dc   : > { %5579 = vmatmul.mubr.msk.f32.gmra.mrb[44].mxu0 %vm864_vm1, %v7310_v24  ;;  %5776 = vmatmul.mubr.msk.f32.gmra.mrb[10].mxu1 %vm864_vm1, %v7312_v25 }
 0x1dd   : > { %5581 = vmatprep.mubr.msk.f32.mxu0 %vm864_vm1, %v7318_v26  ;;  %5778 = vmatprep.mubr.msk.f32.mxu1 %vm864_vm1, %v7320_v27 }
 0x1e0   : > { %5582 = vmatmul.mubr.msk.f32.gmra.mrb[46].mxu0 %vm864_vm1, %v7326_v28  ;;  %5779 = vmatmul.mubr.msk.f32.gmra.mrb[12].mxu1 %vm864_vm1, %v7328_v31 }
 0x1e1   : > { %5584 = vmatprep.mubr.msk.f32.mxu0 %vm864_vm1, %v7334_v32  ;;  %5781 = vmatprep.mubr.msk.f32.mxu1 %vm864_vm1, %v7336_v34 }
 0x1e4   : > { %5585 = vmatmul.mubr.msk.f32.gmra.mrb[48].mxu0 %vm864_vm1, %v7342_v36  ;;  %5782 = vmatmul.mubr.msk.f32.gmra.mrb[14].mxu1 %vm864_vm1, %v7344_v37 }
 0x1e5   : > { %5587 = vmatprep.mubr.msk.f32.mxu0 %vm864_vm1, %v7350_v38  ;;  %5784 = vmatprep.mubr.msk.f32.mxu1 %vm864_vm1, %v7352_v39 }
 0x1e8   : > { %5588 = vmatmul.mubr.msk.f32.gmra.mrb[50].mxu0 %vm864_vm1, %v7358_v41  ;;  %5785 = vmatmul.mubr.msk.f32.gmra.mrb[16].mxu1 %vm864_vm1, %v7360_v44 }
 0x1e9   : > { %5590 = vmatprep.mubr.msk.f32.mxu0 %vm864_vm1, %v7366_v40  ;;  %5787 = vmatprep.mubr.msk.f32.mxu1 %vm864_vm1, %v7368_v48 }
 0x1ec   : > { %5591 = vmatmul.mubr.msk.f32.gmra.mrb[52].mxu0 %vm864_vm1, %v7374_v42  ;;  %5788 = vmatmul.mubr.msk.f32.gmra.mrb[18].mxu1 %vm864_vm1, %v7376_v49 }
 0x1ed   : > { %5593 = vmatprep.mubr.msk.f32.mxu0 %vm864_vm1, %v7382_v53  ;;  %5790 = vmatprep.mubr.msk.f32.mxu1 %vm864_vm1, %v7384_v56 }
 0x1f0   : > { %5594 = vmatmul.mubr.msk.f32.gmra.mrb[54].mxu0 %vm864_vm1, %v7390_v58  ;;  %5791 = vmatmul.mubr.msk.f32.gmra.mrb[20].mxu1 %vm864_vm1, %v7392_v57 }
 0x1f1   : > { %5596 = vmatprep.mubr.msk.f32.mxu0 %vm864_vm1, %v7398_v54  ;;  %5793 = vmatprep.mubr.msk.f32.mxu1 %vm864_vm1, %v7400_v52 }
 0x1f4   : > { %5597 = vmatmul.mubr.msk.f32.gmra.mrb[56].mxu0 %vm864_vm1, %v7406_v51  ;;  %5794 = vmatmul.mubr.msk.f32.gmra.mrb[22].mxu1 %vm864_vm1, %v7408_v50 }
 0x1f5   : > { %5599 = vmatprep.mubr.msk.f32.mxu0 %vm864_vm1, %v7414_v46  ;;  %5796 = vmatprep.mubr.msk.f32.mxu1 %vm864_vm1, %v7416_v45 }
 0x1f8   : > { %5600 = vmatmul.mubr.msk.f32.gmra.mrb[58].mxu0 %vm864_vm1, %v7422_v35  ;;  %5797 = vmatmul.mubr.msk.f32.gmra.mrb[24].mxu1 %vm864_vm1, %v7424_v30 }
 0x1f9   : > { %5602 = vmatprep.mubr.msk.f32.mxu0 %vm864_vm1, %v7430_v21  ;;  %5799 = vmatprep.mubr.msk.f32.mxu1 %vm864_vm1, %v7432_v16 }
 0x1fc   : > { %5603 = vmatmul.mubr.msk.f32.gmra.mrb[60].mxu0 %vm864_vm1, %v7438_v8  ;;  %5800 = vmatmul.mubr.msk.f32.gmra.mrb[26].mxu1 %vm864_vm1, %v7440_v4 }
 0x1fd   : > { %5605 = vmatprep.mubr.msk.f32.mxu0 %vm864_vm1, %v7446_v59  ;;  %5802 = vmatprep.mubr.msk.f32.mxu1 %vm864_vm1, %v7448_v55 }
 0x200   : > { %5606 = vmatmul.mubr.msk.f32.gmra.mrb[62].mxu0 %vm864_vm1, %v7454_v43  ;;  %5803 = vmatmul.mubr.msk.f32.gmra.mrb[28].mxu1 %vm864_vm1, %v7456_v33 }
 0x201   : > { %5805 = vmatprep.mubr.msk.f32.mxu1 %vm864_vm1, %v7462_v29  ;;  %5610 = vmatprep.mubr.msk.f32.mxu0 %vm864_vm1, %v1659_v47  ;;  %v7478_v29 = vld [vmem:[#allocation11 + $0x20] sm:$0xf]  ;;  %v7592_v47 = vld [vmem:[#allocation2 + $0x180] sm:$0xff] }
 0x204   : > { %5611 = vmatmul.mubr.msk.f32.vlgmr.msra.gmra.mrb[32].mxu0 %vm864_vm1, %v1660_v63  ;;  %5806 = vmatmul.mubr.msk.f32.gmra.mrb[30].mxu1 %vm864_vm1, %v7467_v60  ;;  %v8152_v63 = vld [vmem:[#allocation40_spill] sm:$0xff]  ;;  %v3610_v60 = vld [vmem:[#allocation2 + $0x31] sm:$0xff] }
 0x205   : > { %5613 = vmatprep.mubr.msk.f32.mxu0 %vm864_vm1, %v7212_v61  ;;  %5810 = vmatprep.mubr.msk.f32.mxu1 %vm864_vm1, %v7234_v3  ;;  %v3250_v61 = vld [vmem:[#allocation2 + $0x198] sm:$0xff] }
 0x206   : > { %5659 = vmatpush3.msk.msra.mxu0 %vm1106_vm4, %v7214_v62  ;;  %v7598_v62 = vld [vmem:[#allocation2 + $0x188] sm:$0xff] }
 0x208   : > { %5614 = vmatmul.mubr.msk.f32.gmra.mrb[34].mxu0 %vm864_vm1, %v7224_v0  ;;  %5811 = vmatmul.mubr.msk.f32.vlgmr.msra.gmra.mrb[0].mxu1 %vm864_vm1, %v7246_v5  ;;  %v3251_v0 = vld [vmem:[#allocation2 + $0x1a0] sm:$0xff] }
 0x209   : > { %5859 = vmatpush3.msk.msra.mxu1 %vm1106_vm4, %v7226_v1  ;;  %5616 = vmatprep.mubr.msk.f32.mxu0 %vm864_vm1, %v7240_v2  ;;  %v8153_v1 = vld [vmem:[#allocation41_spill] sm:$0xff] }
 0x20a   : > { %5813 = vmatprep.mubr.msk.f32.mxu1 %vm864_vm1, %v7254_v17  ;;  %5908 = vmatprep.subr.msk.mxu1 %vm1106_vm4, %v7478_v29 }
 0x20c   : > { %5617 = vmatmul.mubr.msk.f32.gmra.mrb[36].mxu0 %vm864_vm1, %v7248_v6  ;;  %5814 = vmatmul.mubr.msk.f32.gmra.mrb[2].mxu1 %vm864_vm1, %v7262_v9 }
 0x20d   : > { %5619 = vmatprep.mubr.msk.f32.mxu0 %vm864_vm1, %v7256_v7  ;;  %5816 = vmatprep.mubr.msk.f32.mxu1 %vm864_vm1, %v7270_v11 }
 0x210   : > { %5620 = vmatmul.mubr.msk.f32.gmra.mrb[38].mxu0 %vm864_vm1, %v7264_v10  ;;  %5817 = vmatmul.mubr.msk.f32.gmra.mrb[4].mxu1 %vm864_vm1, %v7278_v13 }
 0x211   : > { %5622 = vmatprep.mubr.msk.f32.mxu0 %vm864_vm1, %v7272_v12  ;;  %5819 = vmatprep.mubr.msk.f32.mxu1 %vm864_vm1, %v7286_v15 }
 0x214   : > { %5623 = vmatmul.mubr.msk.f32.gmra.mrb[40].mxu0 %vm864_vm1, %v7280_v14  ;;  %5820 = vmatmul.mubr.msk.f32.gmra.mrb[6].mxu1 %vm864_vm1, %v7294_v19 }
 0x215   : > { %5625 = vmatprep.mubr.msk.f32.mxu0 %vm864_vm1, %v7288_v18  ;;  %5822 = vmatprep.mubr.msk.f32.mxu1 %vm864_vm1, %v7302_v22 }
 0x218   : > { %5626 = vmatmul.mubr.msk.f32.gmra.mrb[42].mxu0 %vm864_vm1, %v7296_v20  ;;  %5823 = vmatmul.mubr.msk.f32.gmra.mrb[8].mxu1 %vm864_vm1, %v7310_v24 }
 0x219   : > { %5628 = vmatprep.mubr.msk.f32.mxu0 %vm864_vm1, %v7304_v23  ;;  %5825 = vmatprep.mubr.msk.f32.mxu1 %vm864_vm1, %v7318_v26 }
 0x21c   : > { %5629 = vmatmul.mubr.msk.f32.gmra.mrb[44].mxu0 %vm864_vm1, %v7312_v25  ;;  %5826 = vmatmul.mubr.msk.f32.gmra.mrb[10].mxu1 %vm864_vm1, %v7326_v28 }
 0x21d   : > { %5631 = vmatprep.mubr.msk.f32.mxu0 %vm864_vm1, %v7320_v27  ;;  %5828 = vmatprep.mubr.msk.f32.mxu1 %vm864_vm1, %v7334_v32 }
 0x220   : > { %5632 = vmatmul.mubr.msk.f32.gmra.mrb[46].mxu0 %vm864_vm1, %v7328_v31  ;;  %5829 = vmatmul.mubr.msk.f32.gmra.mrb[12].mxu1 %vm864_vm1, %v7342_v36 }
 0x221   : > { %5634 = vmatprep.mubr.msk.f32.mxu0 %vm864_vm1, %v7336_v34  ;;  %5831 = vmatprep.mubr.msk.f32.mxu1 %vm864_vm1, %v7350_v38 }
 0x224   : > { %5635 = vmatmul.mubr.msk.f32.gmra.mrb[48].mxu0 %vm864_vm1, %v7344_v37  ;;  %5832 = vmatmul.mubr.msk.f32.gmra.mrb[14].mxu1 %vm864_vm1, %v7358_v41 }
 0x225   : > { %5637 = vmatprep.mubr.msk.f32.mxu0 %vm864_vm1, %v7352_v39  ;;  %5834 = vmatprep.mubr.msk.f32.mxu1 %vm864_vm1, %v7366_v40 }
 0x228   : > { %5638 = vmatmul.mubr.msk.f32.gmra.mrb[50].mxu0 %vm864_vm1, %v7360_v44  ;;  %5835 = vmatmul.mubr.msk.f32.gmra.mrb[16].mxu1 %vm864_vm1, %v7374_v42 }
 0x229   : > { %5640 = vmatprep.mubr.msk.f32.mxu0 %vm864_vm1, %v7368_v48  ;;  %5837 = vmatprep.mubr.msk.f32.mxu1 %vm864_vm1, %v7382_v53 }
 0x22c   : > { %5641 = vmatmul.mubr.msk.f32.gmra.mrb[52].mxu0 %vm864_vm1, %v7376_v49  ;;  %5838 = vmatmul.mubr.msk.f32.gmra.mrb[18].mxu1 %vm864_vm1, %v7390_v58 }
 0x22d   : > { %5643 = vmatprep.mubr.msk.f32.mxu0 %vm864_vm1, %v7384_v56  ;;  %5840 = vmatprep.mubr.msk.f32.mxu1 %vm864_vm1, %v7398_v54 }
 0x230   : > { %5644 = vmatmul.mubr.msk.f32.gmra.mrb[54].mxu0 %vm864_vm1, %v7392_v57  ;;  %5841 = vmatmul.mubr.msk.f32.gmra.mrb[20].mxu1 %vm864_vm1, %v7406_v51 }
 0x231   : > { %5646 = vmatprep.mubr.msk.f32.mxu0 %vm864_vm1, %v7400_v52  ;;  %5843 = vmatprep.mubr.msk.f32.mxu1 %vm864_vm1, %v7414_v46 }
 0x234   : > { %5647 = vmatmul.mubr.msk.f32.gmra.mrb[56].mxu0 %vm864_vm1, %v7408_v50  ;;  %5844 = vmatmul.mubr.msk.f32.gmra.mrb[22].mxu1 %vm864_vm1, %v7422_v35 }
 0x235   : > { %5649 = vmatprep.mubr.msk.f32.mxu0 %vm864_vm1, %v7416_v45  ;;  %5846 = vmatprep.mubr.msk.f32.mxu1 %vm864_vm1, %v7430_v21 }
 0x238   : > { %5650 = vmatmul.mubr.msk.f32.gmra.mrb[58].mxu0 %vm864_vm1, %v7424_v30  ;;  %5847 = vmatmul.mubr.msk.f32.gmra.mrb[24].mxu1 %vm864_vm1, %v7438_v8 }
 0x239   : > { %5652 = vmatprep.mubr.msk.f32.mxu0 %vm864_vm1, %v7432_v16  ;;  %5849 = vmatprep.mubr.msk.f32.mxu1 %vm864_vm1, %v7446_v59 }
 0x23c   : > { %5653 = vmatmul.mubr.msk.f32.gmra.mrb[60].mxu0 %vm864_vm1, %v7440_v4  ;;  %5850 = vmatmul.mubr.msk.f32.gmra.mrb[26].mxu1 %vm864_vm1, %v7454_v43 }
 0x23d   : > { %5655 = vmatprep.mubr.msk.f32.mxu0 %vm864_vm1, %v7448_v55  ;;  %5852 = vmatprep.mubr.msk.f32.mxu1 %vm864_vm1, %v7592_v47 }
 0x240   : > { %5656 = vmatmul.mubr.msk.f32.gmra.mrb[62].mxu0 %vm864_vm1, %v7456_v33  ;;  %5853 = vmatmul.mubr.msk.f32.gmra.mrb[28].mxu1 %vm864_vm1, %v7598_v62  ;;  %v3611_v33 = vld [vmem:[#allocation2 + $0x39] sm:$0xff] }
 0x241   : > { %5660 = vmatprep.mubr.msk.f32.mxu0 %vm864_vm1, %v8152_v63  ;;  %5855 = vmatprep.mubr.msk.f32.mxu1 %vm864_vm1, %v3250_v61  ;;  %v3612_v61 = vld [vmem:[#allocation2 + $0x49] sm:$0xff]  ;;  %v3613_v63 = vld [vmem:[#allocation2 + $0x51] sm:$0xff] }
 0x244   : > { %5661 = vmatmul.mubr.msk.f32.vlgmr.msra.gmra.mrb[32].mxu0 %vm864_vm1, %v8153_v1  ;;  %5856 = vmatmul.mubr.msk.f32.gmra.mrb[30].mxu1 %vm864_vm1, %v3251_v0 }
 0x245   : > { %5663 = vmatprep.mubr.msk.f32.mxu0 %vm864_vm1, %v7234_v3  ;;  %5860 = vmatprep.mubr.msk.f32.mxu1 %vm864_vm1, %v3610_v60  ;;  %v3614_v60 = vld [vmem:[#allocation2 + $0x61] sm:$0xff] }
 0x246   : > { %v3617_v3 = vld [vmem:[#allocation2 + $0x81] sm:$0xff] }
 0x248   : > { %5664 = vmatmul.mubr.msk.f32.gmra.mrb[34].mxu0 %vm864_vm1, %v7246_v5  ;;  %5861 = vmatmul.mubr.msk.f32.vlgmr.msra.gmra.mrb[0].mxu1 %vm864_vm1, %v3611_v33  ;;  %v3615_v33 = vld [vmem:[#allocation2 + $0x69] sm:$0xff]  ;;  %v3618_v5 = vld [vmem:[#allocation2 + $0x91] sm:$0xff] }
 0x249   : > { %5909 = vmatpush3.msk.msra.mxu1 %vm1106_vm4, %v7478_v29  ;;  %5666 = vmatprep.mubr.msk.f32.mxu0 %vm864_vm1, %v7254_v17  ;;  %v3616_v29 = vld [vmem:[#allocation2 + $0x79] sm:$0xff] }
 0x24a   : > { %5863 = vmatprep.mubr.msk.f32.mxu1 %vm864_vm1, %v3612_v61  ;;  %v3619_v17 = vld [vmem:[#allocation2 + $0x99] sm:$0xff] }
 0x24c   : > { %5667 = vmatmul.mubr.msk.f32.gmra.mrb[36].mxu0 %vm864_vm1, %v7262_v9  ;;  %5864 = vmatmul.mubr.msk.f32.gmra.mrb[2].mxu1 %vm864_vm1, %v3613_v63  ;;  %v8154_v9 = vld [vmem:[#allocation20_spill] sm:$0xff] }
 0x24d   : > { %5669 = vmatprep.mubr.msk.f32.mxu0 %vm864_vm1, %v7270_v11  ;;  %5866 = vmatprep.mubr.msk.f32.mxu1 %vm864_vm1, %v3614_v60  ;;  %v8155_v11 = vld [vmem:[#allocation21_spill] sm:$0xff] }
 0x250   : > { %5670 = vmatmul.mubr.msk.f32.gmra.mrb[38].mxu0 %vm864_vm1, %v7278_v13  ;;  %5867 = vmatmul.mubr.msk.f32.gmra.mrb[4].mxu1 %vm864_vm1, %v3615_v33  ;;  %v8156_v13 = vld [vmem:[#allocation22_spill] sm:$0xff] }
 0x251   : > { %5672 = vmatprep.mubr.msk.f32.mxu0 %vm864_vm1, %v7286_v15  ;;  %5869 = vmatprep.mubr.msk.f32.mxu1 %vm864_vm1, %v3616_v29  ;;  %v8157_v15 = vld [vmem:[#allocation23_spill] sm:$0xff] }
 0x254   : > { %5673 = vmatmul.mubr.msk.f32.gmra.mrb[40].mxu0 %vm864_vm1, %v7294_v19  ;;  %5870 = vmatmul.mubr.msk.f32.gmra.mrb[6].mxu1 %vm864_vm1, %v3617_v3  ;;  %v8158_v19 = vld [vmem:[#allocation24_spill] sm:$0xff] }
 0x255   : > { %5675 = vmatprep.mubr.msk.f32.mxu0 %vm864_vm1, %v7302_v22  ;;  %5872 = vmatprep.mubr.msk.f32.mxu1 %vm864_vm1, %v3618_v5  ;;  %v8159_v22 = vld [vmem:[#allocation25_spill] sm:$0xff] }
 0x258   : > { %5676 = vmatmul.mubr.msk.f32.gmra.mrb[42].mxu0 %vm864_vm1, %v7310_v24  ;;  %5873 = vmatmul.mubr.msk.f32.gmra.mrb[8].mxu1 %vm864_vm1, %v3619_v17  ;;  %v8160_v24 = vld [vmem:[#allocation26_spill] sm:$0xff] }
 0x259   : > { %5678 = vmatprep.mubr.msk.f32.mxu0 %vm864_vm1, %v7318_v26  ;;  %5875 = vmatprep.mubr.msk.f32.mxu1 %vm864_vm1, %v8154_v9  ;;  %v8161_v26 = vld [vmem:[#allocation27_spill] sm:$0xff] }
 0x25c   : > { %5679 = vmatmul.mubr.msk.f32.gmra.mrb[44].mxu0 %vm864_vm1, %v7326_v28  ;;  %5876 = vmatmul.mubr.msk.f32.gmra.mrb[10].mxu1 %vm864_vm1, %v8155_v11  ;;  %v8162_v28 = vld [vmem:[#allocation28_spill] sm:$0xff] }
 0x25d   : > { %5681 = vmatprep.mubr.msk.f32.mxu0 %vm864_vm1, %v7334_v32  ;;  %5878 = vmatprep.mubr.msk.f32.mxu1 %vm864_vm1, %v8156_v13  ;;  %v8163_v32 = vld [vmem:[#allocation29_spill] sm:$0xff] }
 0x260   : > { %5682 = vmatmul.mubr.msk.f32.gmra.mrb[46].mxu0 %vm864_vm1, %v7342_v36  ;;  %5879 = vmatmul.mubr.msk.f32.gmra.mrb[12].mxu1 %vm864_vm1, %v8157_v15  ;;  %v8164_v36 = vld [vmem:[#allocation30_spill] sm:$0xff] }
 0x261   : > { %5684 = vmatprep.mubr.msk.f32.mxu0 %vm864_vm1, %v7350_v38  ;;  %5881 = vmatprep.mubr.msk.f32.mxu1 %vm864_vm1, %v8158_v19  ;;  %v8165_v38 = vld [vmem:[#allocation31_spill] sm:$0xff] }
 0x264   : > { %5685 = vmatmul.mubr.msk.f32.gmra.mrb[48].mxu0 %vm864_vm1, %v7358_v41  ;;  %5882 = vmatmul.mubr.msk.f32.gmra.mrb[14].mxu1 %vm864_vm1, %v8159_v22  ;;  %v8166_v41 = vld [vmem:[#allocation32_spill] sm:$0xff] }
 0x265   : > { %5687 = vmatprep.mubr.msk.f32.mxu0 %vm864_vm1, %v7366_v40  ;;  %5884 = vmatprep.mubr.msk.f32.mxu1 %vm864_vm1, %v8160_v24  ;;  %v3641_v40 = vld [vmem:[#allocation2 + $0x1a1] sm:$0xff] }
 0x268   : > { %5688 = vmatmul.mubr.msk.f32.gmra.mrb[50].mxu0 %vm864_vm1, %v7374_v42  ;;  %5885 = vmatmul.mubr.msk.f32.gmra.mrb[16].mxu1 %vm864_vm1, %v8161_v26 }
 0x269   : > { %5690 = vmatprep.mubr.msk.f32.mxu0 %vm864_vm1, %v7382_v53  ;;  %5887 = vmatprep.mubr.msk.f32.mxu1 %vm864_vm1, %v8162_v28 }
 0x26c   : > { %5691 = vmatmul.mubr.msk.f32.gmra.mrb[52].mxu0 %vm864_vm1, %v7390_v58  ;;  %5888 = vmatmul.mubr.msk.f32.gmra.mrb[18].mxu1 %vm864_vm1, %v8163_v32  ;;  %v8167_v58 = vld [vmem:[#allocation33_spill] sm:$0xff] }
 0x26d   : > { %5693 = vmatprep.mubr.msk.f32.mxu0 %vm864_vm1, %v7398_v54  ;;  %5890 = vmatprep.mubr.msk.f32.mxu1 %vm864_vm1, %v8164_v36  ;;  %v8168_v54 = vld [vmem:[#allocation34_spill] sm:$0xff] }
 0x270   : > { %5694 = vmatmul.mubr.msk.f32.gmra.mrb[54].mxu0 %vm864_vm1, %v7406_v51  ;;  %5891 = vmatmul.mubr.msk.f32.gmra.mrb[20].mxu1 %vm864_vm1, %v8165_v38  ;;  %v8169_v51 = vld [vmem:[#allocation35_spill] sm:$0xff] }
 0x271   : > { %5696 = vmatprep.mubr.msk.f32.mxu0 %vm864_vm1, %v7414_v46  ;;  %5893 = vmatprep.mubr.msk.f32.mxu1 %vm864_vm1, %v8166_v41  ;;  %v8170_v46 = vld [vmem:[#allocation36_spill] sm:$0xff] }
 0x274   : > { %5697 = vmatmul.mubr.msk.f32.gmra.mrb[56].mxu0 %vm864_vm1, %v7422_v35  ;;  %5894 = vmatmul.mubr.msk.f32.gmra.mrb[22].mxu1 %vm864_vm1, %v8167_v58  ;;  %v8171_v35 = vld [vmem:[#allocation37_spill] sm:$0xff] }
 0x275   : > { %5699 = vmatprep.mubr.msk.f32.mxu0 %vm864_vm1, %v7430_v21  ;;  %5896 = vmatprep.mubr.msk.f32.mxu1 %vm864_vm1, %v8168_v54  ;;  %v8172_v21 = vld [vmem:[#allocation38_spill] sm:$0xff] }
 0x278   : > { %5700 = vmatmul.mubr.msk.f32.gmra.mrb[58].mxu0 %vm864_vm1, %v7438_v8  ;;  %5897 = vmatmul.mubr.msk.f32.gmra.mrb[24].mxu1 %vm864_vm1, %v8169_v51  ;;  %v3640_v8 = vld [vmem:[#allocation2 + $0x199] sm:$0xff] }
 0x279   : > { %5702 = vmatprep.mubr.msk.f32.mxu0 %vm864_vm1, %v7446_v59  ;;  %5899 = vmatprep.mubr.msk.f32.mxu1 %vm864_vm1, %v8170_v46  ;;  %v8173_v59 = vld [vmem:[#allocation39_spill] sm:$0xff] }
 0x27c   : > { %5703 = vmatmul.mubr.msk.f32.gmra.mrb[60].mxu0 %vm864_vm1, %v7454_v43  ;;  %5900 = vmatmul.mubr.msk.f32.gmra.mrb[26].mxu1 %vm864_vm1, %v8171_v35  ;;  %v8174_v43 = vld [vmem:[#allocation42_spill] sm:$0xff] }
 0x27d   : > { %5705 = vmatprep.mubr.msk.f32.mxu0 %vm864_vm1, %v7592_v47  ;;  %5902 = vmatprep.mubr.msk.f32.mxu1 %vm864_vm1, %v8172_v21 }
 0x280   : > { %5706 = vmatmul.mubr.msk.f32.gmra.mrb[62].mxu0 %vm864_vm1, %v7598_v62  ;;  %5903 = vmatmul.mubr.msk.f32.gmra.mrb[28].mxu1 %vm864_vm1, %v8173_v59 }
 0x281   : > { %5905 = vmatprep.mubr.msk.f32.mxu1 %vm864_vm1, %v3640_v8 }
 0x284   : > { %5906 = vmatmul.mubr.msk.f32.gmra.mrb[30].mxu1 %vm864_vm1, %v3641_v40 }
 0x285   : > { %5910 = vmatprep.mubr.msk.f32.mxu1 %vm864_vm1, %v7240_v2 }
 0x288   : > { %5911 = vmatmul.mubr.msk.f32.vlgmr.msra.gmra.mrb[0].mxu1 %vm864_vm1, %v7248_v6 }
 0x289   : > { %5913 = vmatprep.mubr.msk.f32.mxu1 %vm864_vm1, %v7256_v7 }
 0x28c   : > { %5914 = vmatmul.mubr.msk.f32.gmra.mrb[2].mxu1 %vm864_vm1, %v7264_v10 }
 0x28d   : > { %5916 = vmatprep.mubr.msk.f32.mxu1 %vm864_vm1, %v7272_v12 }
 0x290   : > { %5917 = vmatmul.mubr.msk.f32.gmra.mrb[4].mxu1 %vm864_vm1, %v7280_v14 }
 0x291   : > { %5919 = vmatprep.mubr.msk.f32.mxu1 %vm864_vm1, %v7288_v18 }
 0x294   : > { %5920 = vmatmul.mubr.msk.f32.gmra.mrb[6].mxu1 %vm864_vm1, %v7296_v20 }
 0x295   : > { %5922 = vmatprep.mubr.msk.f32.mxu1 %vm864_vm1, %v7304_v23 }
 0x298   : > { %5923 = vmatmul.mubr.msk.f32.gmra.mrb[8].mxu1 %vm864_vm1, %v7312_v25 }
 0x299   : > { %5925 = vmatprep.mubr.msk.f32.mxu1 %vm864_vm1, %v7320_v27 }
 0x29c   : > { %5926 = vmatmul.mubr.msk.f32.gmra.mrb[10].mxu1 %vm864_vm1, %v7328_v31 }
 0x29d   : > { %5928 = vmatprep.mubr.msk.f32.mxu1 %vm864_vm1, %v7336_v34 }
 0x2a0   : > { %5929 = vmatmul.mubr.msk.f32.gmra.mrb[12].mxu1 %vm864_vm1, %v7344_v37 }
 0x2a1   : > { %5931 = vmatprep.mubr.msk.f32.mxu1 %vm864_vm1, %v7352_v39 }
 0x2a4   : > { %5932 = vmatmul.mubr.msk.f32.gmra.mrb[14].mxu1 %vm864_vm1, %v7360_v44 }
 0x2a5   : > { %5934 = vmatprep.mubr.msk.f32.mxu1 %vm864_vm1, %v7368_v48 }
 0x2a8   : > { %5935 = vmatmul.mubr.msk.f32.gmra.mrb[16].mxu1 %vm864_vm1, %v7376_v49 }
 0x2a9   : > { %5937 = vmatprep.mubr.msk.f32.mxu1 %vm864_vm1, %v7384_v56 }
 0x2ac   : > { %5938 = vmatmul.mubr.msk.f32.gmra.mrb[18].mxu1 %vm864_vm1, %v7392_v57 }
 0x2ad   : > { %5940 = vmatprep.mubr.msk.f32.mxu1 %vm864_vm1, %v7400_v52  ;;  %v8175_v52 = vld [vmem:[#allocation43_spill] sm:$0xff] }
 0x2b0   : > { %5941 = vmatmul.mubr.msk.f32.gmra.mrb[20].mxu1 %vm864_vm1, %v7408_v50  ;;  %v4030_v50 = vld [vmem:[#allocation2 + $0x19a] sm:$0xff] }
 0x2b1   : > { %5943 = vmatprep.mubr.msk.f32.mxu1 %vm864_vm1, %v7416_v45  ;;  %v8176_v45 = vld [vmem:[#allocation44_spill] sm:$0xff] }
 0x2b4   : > { %5944 = vmatmul.mubr.msk.f32.gmra.mrb[22].mxu1 %vm864_vm1, %v7424_v30  ;;  %v4031_v30 = vld [vmem:[#allocation2 + $0x1a2] sm:$0xff] }
 0x2b5   : > { %5946 = vmatprep.mubr.msk.f32.mxu1 %vm864_vm1, %v7432_v16 }
 0x2b8   : > { %5947 = vmatmul.mubr.msk.f32.gmra.mrb[24].mxu1 %vm864_vm1, %v7440_v4 }
 0x2b9   : > { %5949 = vmatprep.mubr.msk.f32.mxu1 %vm864_vm1, %v7448_v55 }
 0x2bc   : > { %5950 = vmatmul.mubr.msk.f32.gmra.mrb[26].mxu1 %vm864_vm1, %v8174_v43 }
 0x2bd   : > { %5952 = vmatprep.mubr.msk.f32.mxu1 %vm864_vm1, %v8175_v52 }
 0x2c0   : > { %5953 = vmatmul.mubr.msk.f32.gmra.mrb[28].mxu1 %vm864_vm1, %v8176_v45 }
 0x2c1   : > { %5955 = vmatprep.mubr.msk.f32.mxu1 %vm864_vm1, %v4030_v50 }
 0x2c4   : > { %5956 = vmatmul.mubr.msk.f32.gmra.mrb[30].mxu1 %vm864_vm1, %v4031_v30 }
 0x317   : > { %v5662_v16 = vpop.f32.mrb[32].mxu0 }
 0x318   : > { %v2248_v4 = vpop.f32.mrb[33].mxu0 }
 0x31b   : > { %v5665_v57 = vpop.f32.mrb[34].mxu0 }
 0x31c   : > { %v2258_v2 = vpop.f32.mrb[35].mxu0 }
 0x31f   : > { %v5668_v55 = vpop.f32.mrb[36].mxu0 }
 0x320   : > { %v2268_v6 = vpop.f32.mrb[37].mxu0 }
 0x323   : > { %v7786_v7 = vpop.f32.mrb[38].mxu0 }
 0x324   : > { %v7788_v10 = vpop.f32.mrb[39].mxu0 }
 0x327   : > { %v7790_v12 = vpop.f32.mrb[40].mxu0 }
 0x328   : > { %v7792_v14 = vpop.f32.mrb[41].mxu0 }
 0x32b   : > { %v7794_v18 = vpop.f32.mrb[42].mxu0 }
 0x32c   : > { %v7796_v20 = vpop.f32.mrb[43].mxu0 }
 0x32f   : > { %v7798_v23 = vpop.f32.mrb[44].mxu0 }
 0x330   : > { %v7800_v25 = vpop.f32.mrb[45].mxu0 }
 0x333   : > { %v7802_v27 = vpop.f32.mrb[46].mxu0 }
 0x334   : > { %v7804_v31 = vpop.f32.mrb[47].mxu0 }
 0x337   : > { %v7806_v34 = vpop.f32.mrb[48].mxu0 }
 0x338   : > { %v7808_v37 = vpop.f32.mrb[49].mxu0 }
 0x33b   : > { %v7810_v39 = vpop.f32.mrb[50].mxu0 }
 0x33c   : > { %v7812_v44 = vpop.f32.mrb[51].mxu0 }
 0x33f   : > { %v7814_v48 = vpop.f32.mrb[52].mxu0 }
 0x340   : > { %v7816_v42 = vpop.f32.mrb[53].mxu0 }
 0x343   : > { %v7818_v49 = vpop.f32.mrb[54].mxu0 }
 0x344   : > { %v7820_v53 = vpop.f32.mrb[55].mxu0 }
 0x347   : > { %v7822_v56 = vpop.f32.mrb[56].mxu0 }
 0x348   : > { %v7824_v47 = vpop.f32.mrb[57].mxu0 }
 0x34b   : > { %v7826_v62 = vpop.f32.mrb[58].mxu0 }
 0x34c   : > { %v7828_v0 = vpop.f32.mrb[59].mxu0 }
 0x34f   : > { %v7830_v1 = vpop.f32.mrb[60].mxu0 }
 0x350   : > { %v7832_v61 = vpop.f32.mrb[61].mxu0 }
 0x353   : > { %v7834_v63 = vpop.f32.mrb[62].mxu0 }
 0x354   : > { %v7836_v60 = vpop.f32.mrb[63].mxu0 }
 0x35b   : > { %v5912_v33 = vpop.f32.mrb[0].mxu1 }
 0x35c   : > { %v5958_v29 = vadd.f32 %v5912_v33, %v5662_v16  ;;  %v4199_v3 = vpop.f32.mrb[1].mxu1 }
 0x35d   : > { %v5959_v5 = vadd.f32 %v4199_v3, %v2248_v4 }
 0x35e   : > { %4391 = vst.msk [vmem:[%s7840_s27 + $0x8] sm:$0xff] %vm368_vm0, %v5958_v29  ;;  %v4423_v17 = vsel %vm368_vm0, %v5958_v29, 0.0  ;;  %v4494_v9 = vmul.f32 %v5958_v29, %v5958_v29 }
 0x35f   : > { %4390 = vst.msk [vmem:[%s7840_s27] sm:$0xff] %vm368_vm0, %v5959_v5  ;;  %v4422_v11 = vsel %vm368_vm0, %v5959_v5, 0.0  ;;  %v4493_v13 = vmul.f32 %v5959_v5, %v5959_v5  ;;  %v5915_v15 = vpop.f32.mrb[2].mxu1 }
 0x360   : > { %v4526_v19 = vsel %vm368_vm0, %v4494_v9, 0.0  ;;  %v4424_v22 = vadd.f32 %v4423_v17, %v4422_v11  ;;  %v5960_v24 = vadd.f32 %v5915_v15, %v5665_v57  ;;  %v4209_v26 = vpop.f32.mrb[3].mxu1 }
 0x361   : > { %v4525_v28 = vsel %vm368_vm0, %v4493_v13, 0.0  ;;  %v5961_v32 = vadd.f32 %v4209_v26, %v2258_v2 }
 0x362   : > { %v4527_v36 = vadd.f32 %v4526_v19, %v4525_v28  ;;  %4393 = vst.msk [vmem:[%s7840_s27 + $0x18] sm:$0xff] %vm368_vm0, %v5960_v24  ;;  %v4496_v38 = vmul.f32 %v5960_v24, %v5960_v24  ;;  %v4427_v21 = vsel %vm368_vm0, %v5960_v24, 0.0 }
 0x363   : > { %4392 = vst.msk [vmem:[%s7840_s27 + $0x10] sm:$0xff] %vm368_vm0, %v5961_v32  ;;  %v4425_v41 = vsel %vm368_vm0, %v5961_v32, 0.0  ;;  %v4495_v58 = vmul.f32 %v5961_v32, %v5961_v32  ;;  %v5918_v54 = vpop.f32.mrb[4].mxu1 }
 0x364   : > { %v4426_v51 = vadd.f32 %v4425_v41, %v4424_v22  ;;  %v5962_v46 = vadd.f32 %v5918_v54, %v5668_v55  ;;  %v4219_v35 = vpop.f32.mrb[5].mxu1  ;;  %v4530_v52 = vsel %vm368_vm0, %v4496_v38, 0.0 }
 0x365   : > { %v4528_v8 = vsel %vm368_vm0, %v4495_v58, 0.0  ;;  %v5963_v59 = vadd.f32 %v4219_v35, %v2268_v6 }
 0x366   : > { %v4529_v40 = vadd.f32 %v4528_v8, %v4527_v36  ;;  %4395 = vst.msk [vmem:[%s7840_s27 + $0x28] sm:$0xff] %vm368_vm0, %v5962_v46  ;;  %v4428_v43 = vadd.f32 %v4427_v21, %v4426_v51  ;;  %v4498_v50 = vmul.f32 %v5962_v46, %v5962_v46  ;;  %v4431_v6 = vsel %vm368_vm0, %v5962_v46, 0.0 }
 0x367   : > { %4394 = vst.msk [vmem:[%s7840_s27 + $0x20] sm:$0xff] %vm368_vm0, %v5963_v59  ;;  %v4429_v45 = vsel %vm368_vm0, %v5963_v59, 0.0  ;;  %v4497_v30 = vmul.f32 %v5963_v59, %v5963_v59  ;;  %v5921_v16 = vpop.f32.mrb[6].mxu1 }
 0x368   : > { %v4430_v4 = vadd.f32 %v4429_v45, %v4428_v43  ;;  %v4531_v57 = vadd.f32 %v4530_v52, %v4529_v40  ;;  %v5964_v2 = vadd.f32 %v5921_v16, %v7786_v7  ;;  %v4229_v55 = vpop.f32.mrb[7].mxu1  ;;  %v4534_v17 = vsel %vm368_vm0, %v4498_v50, 0.0 }
 0x369   : > { %v4532_v33 = vsel %vm368_vm0, %v4497_v30, 0.0  ;;  %v5965_v29 = vadd.f32 %v4229_v55, %v7788_v10 }
 0x36a   : > { %v4533_v3 = vadd.f32 %v4532_v33, %v4531_v57  ;;  %4397 = vst.msk [vmem:[%s7840_s27 + $0x38] sm:$0xff] %vm368_vm0, %v5964_v2  ;;  %v4432_v5 = vadd.f32 %v4431_v6, %v4430_v4  ;;  %v4500_v9 = vmul.f32 %v5964_v2, %v5964_v2  ;;  %v4435_v24 = vsel %vm368_vm0, %v5964_v2, 0.0 }
 0x36b   : > { %4396 = vst.msk [vmem:[%s7840_s27 + $0x30] sm:$0xff] %vm368_vm0, %v5965_v29  ;;  %v4433_v7 = vsel %vm368_vm0, %v5965_v29, 0.0  ;;  %v4499_v11 = vmul.f32 %v5965_v29, %v5965_v29  ;;  %v5924_v13 = vpop.f32.mrb[8].mxu1 }
 0x36c   : > { %v4434_v15 = vadd.f32 %v4433_v7, %v4432_v5  ;;  %v4535_v19 = vadd.f32 %v4534_v17, %v4533_v3  ;;  %v5966_v22 = vadd.f32 %v5924_v13, %v7790_v12  ;;  %v4239_v10 = vpop.f32.mrb[9].mxu1  ;;  %v4538_v38 = vsel %vm368_vm0, %v4500_v9, 0.0 }
 0x36d   : > { %v4536_v26 = vsel %vm368_vm0, %v4499_v11, 0.0  ;;  %v5967_v28 = vadd.f32 %v4239_v10, %v7792_v14 }
 0x36e   : > { %v4537_v32 = vadd.f32 %v4536_v26, %v4535_v19  ;;  %4399 = vst.msk [vmem:[%s7840_s27 + $0x48] sm:$0xff] %vm368_vm0, %v5966_v22  ;;  %v4436_v36 = vadd.f32 %v4435_v24, %v4434_v15  ;;  %v4502_v41 = vmul.f32 %v5966_v22, %v5966_v22  ;;  %v4439_v21 = vsel %vm368_vm0, %v5966_v22, 0.0 }
 0x36f   : > { %4398 = vst.msk [vmem:[%s7840_s27 + $0x40] sm:$0xff] %vm368_vm0, %v5967_v28  ;;  %v4437_v12 = vsel %vm368_vm0, %v5967_v28, 0.0  ;;  %v4501_v58 = vmul.f32 %v5967_v28, %v5967_v28  ;;  %v5927_v54 = vpop.f32.mrb[10].mxu1 }
 0x370   : > { %v4438_v51 = vadd.f32 %v4437_v12, %v4436_v36  ;;  %v4539_v46 = vadd.f32 %v4538_v38, %v4537_v32  ;;  %v5968_v35 = vadd.f32 %v5927_v54, %v7794_v18  ;;  %v4249_v14 = vpop.f32.mrb[11].mxu1  ;;  %v4542_v52 = vsel %vm368_vm0, %v4502_v41, 0.0 }
 0x371   : > { %v4540_v8 = vsel %vm368_vm0, %v4501_v58, 0.0  ;;  %v5969_v59 = vadd.f32 %v4249_v14, %v7796_v20 }
 0x372   : > { %v4541_v40 = vadd.f32 %v4540_v8, %v4539_v46  ;;  %4401 = vst.msk [vmem:[%s7840_s27 + $0x58] sm:$0xff] %vm368_vm0, %v5968_v35  ;;  %v4440_v43 = vadd.f32 %v4439_v21, %v4438_v51  ;;  %v4504_v50 = vmul.f32 %v5968_v35, %v5968_v35  ;;  %v4443_v2 = vsel %vm368_vm0, %v5968_v35, 0.0 }
 0x373   : > { %4400 = vst.msk [vmem:[%s7840_s27 + $0x50] sm:$0xff] %vm368_vm0, %v5969_v59  ;;  %v4441_v18 = vsel %vm368_vm0, %v5969_v59, 0.0  ;;  %v4503_v45 = vmul.f32 %v5969_v59, %v5969_v59  ;;  %v5930_v30 = vpop.f32.mrb[12].mxu1 }
 0x374   : > { %v4442_v16 = vadd.f32 %v4441_v18, %v4440_v43  ;;  %v4543_v4 = vadd.f32 %v4542_v52, %v4541_v40  ;;  %v5970_v57 = vadd.f32 %v5930_v30, %v7798_v23  ;;  %v4259_v20 = vpop.f32.mrb[13].mxu1  ;;  %v4546_v3 = vsel %vm368_vm0, %v4504_v50, 0.0 }
 0x375   : > { %v4544_v55 = vsel %vm368_vm0, %v4503_v45, 0.0  ;;  %v5971_v6 = vadd.f32 %v4259_v20, %v7800_v25 }
 0x376   : > { %v4545_v33 = vadd.f32 %v4544_v55, %v4543_v4  ;;  %4403 = vst.msk [vmem:[%s7840_s27 + $0x68] sm:$0xff] %vm368_vm0, %v5970_v57  ;;  %v4444_v29 = vadd.f32 %v4443_v2, %v4442_v16  ;;  %v4506_v5 = vmul.f32 %v5970_v57, %v5970_v57  ;;  %v4447_v15 = vsel %vm368_vm0, %v5970_v57, 0.0 }
 0x377   : > { %4402 = vst.msk [vmem:[%s7840_s27 + $0x60] sm:$0xff] %vm368_vm0, %v5971_v6  ;;  %v4445_v23 = vsel %vm368_vm0, %v5971_v6, 0.0  ;;  %v4505_v17 = vmul.f32 %v5971_v6, %v5971_v6  ;;  %v5933_v9 = vpop.f32.mrb[14].mxu1 }
 0x378   : > { %v4446_v7 = vadd.f32 %v4445_v23, %v4444_v29  ;;  %v4547_v11 = vadd.f32 %v4546_v3, %v4545_v33  ;;  %v5972_v13 = vadd.f32 %v5933_v9, %v7802_v27  ;;  %v4269_v25 = vpop.f32.mrb[15].mxu1  ;;  %v4550_v26 = vsel %vm368_vm0, %v4506_v5, 0.0 }
 0x379   : > { %v4548_v19 = vsel %vm368_vm0, %v4505_v17, 0.0  ;;  %v5973_v22 = vadd.f32 %v4269_v25, %v7804_v31 }
 0x37a   : > { %v4549_v10 = vadd.f32 %v4548_v19, %v4547_v11  ;;  %4405 = vst.msk [vmem:[%s7840_s27 + $0x78] sm:$0xff] %vm368_vm0, %v5972_v13  ;;  %v4448_v24 = vadd.f32 %v4447_v15, %v4446_v7  ;;  %v4508_v28 = vmul.f32 %v5972_v13, %v5972_v13  ;;  %v4451_v58 = vsel %vm368_vm0, %v5972_v13, 0.0 }
 0x37b   : > { %4404 = vst.msk [vmem:[%s7840_s27 + $0x70] sm:$0xff] %vm368_vm0, %v5973_v22  ;;  %v4449_v27 = vsel %vm368_vm0, %v5973_v22, 0.0  ;;  %v4507_v32 = vmul.f32 %v5973_v22, %v5973_v22  ;;  %v5936_v36 = vpop.f32.mrb[16].mxu1 }
 0x37c   : > { %v4450_v38 = vadd.f32 %v4449_v27, %v4448_v24  ;;  %v4551_v41 = vadd.f32 %v4550_v26, %v4549_v10  ;;  %v5974_v12 = vadd.f32 %v5936_v36, %v7806_v34  ;;  %v4279_v31 = vpop.f32.mrb[17].mxu1  ;;  %v4554_v14 = vsel %vm368_vm0, %v4508_v28, 0.0 }
 0x37d   : > { %v4552_v54 = vsel %vm368_vm0, %v4507_v32, 0.0  ;;  %v5975_v51 = vadd.f32 %v4279_v31, %v7808_v37 }
 0x37e   : > { %v4553_v46 = vadd.f32 %v4552_v54, %v4551_v41  ;;  %4407 = vst.msk [vmem:[%s7840_s27 + $0x88] sm:$0xff] %vm368_vm0, %v5974_v12  ;;  %v4452_v35 = vadd.f32 %v4451_v58, %v4450_v38  ;;  %v4510_v21 = vmul.f32 %v5974_v12, %v5974_v12  ;;  %v4455_v50 = vsel %vm368_vm0, %v5974_v12, 0.0 }
 0x37f   : > { %4406 = vst.msk [vmem:[%s7840_s27 + $0x80] sm:$0xff] %vm368_vm0, %v5975_v51  ;;  %v4453_v34 = vsel %vm368_vm0, %v5975_v51, 0.0  ;;  %v4509_v8 = vmul.f32 %v5975_v51, %v5975_v51  ;;  %v5939_v59 = vpop.f32.mrb[18].mxu1 }
 0x380   : > { %v4454_v40 = vadd.f32 %v4453_v34, %v4452_v35  ;;  %v4555_v43 = vadd.f32 %v4554_v14, %v4553_v46  ;;  %v5976_v52 = vadd.f32 %v5939_v59, %v7810_v39  ;;  %v4289_v37 = vpop.f32.mrb[19].mxu1  ;;  %v4558_v4 = vsel %vm368_vm0, %v4510_v21, 0.0 }
 0x381   : > { %v4556_v18 = vsel %vm368_vm0, %v4509_v8, 0.0  ;;  %v5977_v45 = vadd.f32 %v4289_v37, %v7812_v44 }
 0x382   : > { %v4557_v30 = vadd.f32 %v4556_v18, %v4555_v43  ;;  %4409 = vst.msk [vmem:[%s7840_s27 + $0x98] sm:$0xff] %vm368_vm0, %v5976_v52  ;;  %v4456_v16 = vadd.f32 %v4455_v50, %v4454_v40  ;;  %v4512_v57 = vmul.f32 %v5976_v52, %v5976_v52  ;;  %v4459_v29 = vsel %vm368_vm0, %v5976_v52, 0.0 }
 0x383   : > { %4408 = vst.msk [vmem:[%s7840_s27 + $0x90] sm:$0xff] %vm368_vm0, %v5977_v45  ;;  %v4457_v39 = vsel %vm368_vm0, %v5977_v45, 0.0  ;;  %v4511_v20 = vmul.f32 %v5977_v45, %v5977_v45  ;;  %v5942_v2 = vpop.f32.mrb[20].mxu1 }
 0x384   : > { %v4458_v55 = vadd.f32 %v4457_v39, %v4456_v16  ;;  %v4559_v6 = vadd.f32 %v4558_v4, %v4557_v30  ;;  %v5978_v33 = vadd.f32 %v5942_v2, %v7814_v48  ;;  %v4299_v44 = vpop.f32.mrb[21].mxu1  ;;  %v4562_v9 = vsel %vm368_vm0, %v4512_v57, 0.0 }
 0x385   : > { %v4560_v3 = vsel %vm368_vm0, %v4511_v20, 0.0  ;;  %v5979_v5 = vadd.f32 %v4299_v44, %v7816_v42 }
 0x386   : > { %v4561_v23 = vadd.f32 %v4560_v3, %v4559_v6  ;;  %4411 = vst.msk [vmem:[%s7840_s27 + $0xa8] sm:$0xff] %vm368_vm0, %v5978_v33  ;;  %v4460_v17 = vadd.f32 %v4459_v29, %v4458_v55  ;;  %v4514_v7 = vmul.f32 %v5978_v33, %v5978_v33  ;;  %v4463_v22 = vsel %vm368_vm0, %v5978_v33, 0.0 }
 0x387   : > { %4410 = vst.msk [vmem:[%s7840_s27 + $0xa0] sm:$0xff] %vm368_vm0, %v5979_v5  ;;  %v4461_v48 = vsel %vm368_vm0, %v5979_v5, 0.0  ;;  %v4513_v11 = vmul.f32 %v5979_v5, %v5979_v5  ;;  %v5945_v13 = vpop.f32.mrb[22].mxu1 }
 0x388   : > { %v4462_v25 = vadd.f32 %v4461_v48, %v4460_v17  ;;  %v4563_v15 = vadd.f32 %v4562_v9, %v4561_v23  ;;  %v5980_v19 = vadd.f32 %v5945_v13, %v7818_v49  ;;  %v4309_v42 = vpop.f32.mrb[23].mxu1  ;;  %v4566_v27 = vsel %vm368_vm0, %v4514_v7, 0.0 }
 0x389   : > { %v4564_v10 = vsel %vm368_vm0, %v4513_v11, 0.0  ;;  %v5981_v24 = vadd.f32 %v4309_v42, %v7820_v53 }
 0x38a   : > { %v4565_v26 = vadd.f32 %v4564_v10, %v4563_v15  ;;  %4413 = vst.msk [vmem:[%s7840_s27 + $0xb8] sm:$0xff] %vm368_vm0, %v5980_v19  ;;  %v4464_v28 = vadd.f32 %v4463_v22, %v4462_v25  ;;  %v4516_v32 = vmul.f32 %v5980_v19, %v5980_v19  ;;  %v4467_v58 = vsel %vm368_vm0, %v5980_v19, 0.0 }
 0x38b   : > { %4412 = vst.msk [vmem:[%s7840_s27 + $0xb0] sm:$0xff] %vm368_vm0, %v5981_v24  ;;  %v4465_v49 = vsel %vm368_vm0, %v5981_v24, 0.0  ;;  %v4515_v36 = vmul.f32 %v5981_v24, %v5981_v24  ;;  %v5948_v38 = vpop.f32.mrb[24].mxu1 }
 0x38c   : > { %v4466_v41 = vadd.f32 %v4465_v49, %v4464_v28  ;;  %v4567_v12 = vadd.f32 %v4566_v27, %v4565_v26  ;;  %v5982_v31 = vadd.f32 %v5948_v38, %v7822_v56  ;;  %v4319_v53 = vpop.f32.mrb[25].mxu1  ;;  %v4570_v14 = vsel %vm368_vm0, %v4516_v32, 0.0 }
 0x38d   : > { %v4568_v54 = vsel %vm368_vm0, %v4515_v36, 0.0  ;;  %v5983_v51 = vadd.f32 %v4319_v53, %v7824_v47 }
 0x38e   : > { %v4569_v46 = vadd.f32 %v4568_v54, %v4567_v12  ;;  %4415 = vst.msk [vmem:[%s7840_s27 + $0xc8] sm:$0xff] %vm368_vm0, %v5982_v31  ;;  %v4468_v35 = vadd.f32 %v4467_v58, %v4466_v41  ;;  %v4518_v21 = vmul.f32 %v5982_v31, %v5982_v31  ;;  %v4471_v52 = vsel %vm368_vm0, %v5982_v31, 0.0 }
 0x38f   : > { %4414 = vst.msk [vmem:[%s7840_s27 + $0xc0] sm:$0xff] %vm368_vm0, %v5983_v51  ;;  %v4469_v56 = vsel %vm368_vm0, %v5983_v51, 0.0  ;;  %v4517_v34 = vmul.f32 %v5983_v51, %v5983_v51  ;;  %v5951_v8 = vpop.f32.mrb[26].mxu1 }
 0x390   : > { %v4470_v59 = vadd.f32 %v4469_v56, %v4468_v35  ;;  %v4571_v40 = vadd.f32 %v4570_v14, %v4569_v46  ;;  %v5984_v43 = vadd.f32 %v5951_v8, %v7826_v62  ;;  %v4329_v47 = vpop.f32.mrb[27].mxu1  ;;  %v4574_v30 = vsel %vm368_vm0, %v4518_v21, 0.0 }
 0x391   : > { %v4572_v37 = vsel %vm368_vm0, %v4517_v34, 0.0  ;;  %v5985_v50 = vadd.f32 %v4329_v47, %v7828_v0 }
 0x392   : > { %v4573_v18 = vadd.f32 %v4572_v37, %v4571_v40  ;;  %4417 = vst.msk [vmem:[%s7840_s27 + $0xd8] sm:$0xff] %vm368_vm0, %v5984_v43  ;;  %v4472_v45 = vadd.f32 %v4471_v52, %v4470_v59  ;;  %v4520_v16 = vmul.f32 %v5984_v43, %v5984_v43  ;;  %v4475_v55 = vsel %vm368_vm0, %v5984_v43, 0.0 }
 0x393   : > { %4416 = vst.msk [vmem:[%s7840_s27 + $0xd0] sm:$0xff] %vm368_vm0, %v5985_v50  ;;  %v4473_v62 = vsel %vm368_vm0, %v5985_v50, 0.0  ;;  %v4519_v4 = vmul.f32 %v5985_v50, %v5985_v50  ;;  %v5954_v57 = vpop.f32.mrb[28].mxu1 }
 0x394   : > { %v4474_v39 = vadd.f32 %v4473_v62, %v4472_v45  ;;  %v4575_v20 = vadd.f32 %v4574_v30, %v4573_v18  ;;  %v5986_v0 = vadd.f32 %v5954_v57, %v7830_v1  ;;  %v4339_v2 = vpop.f32.mrb[29].mxu1  ;;  %v4578_v3 = vsel %vm368_vm0, %v4520_v16, 0.0 }
 0x395   : > { %v4576_v6 = vsel %vm368_vm0, %v4519_v4, 0.0  ;;  %v5987_v33 = vadd.f32 %v4339_v2, %v7832_v61 }
 0x396   : > { %v4577_v44 = vadd.f32 %v4576_v6, %v4575_v20  ;;  %4419 = vst.msk [vmem:[%s7840_s27 + $0xe8] sm:$0xff] %vm368_vm0, %v5986_v0  ;;  %v4476_v29 = vadd.f32 %v4475_v55, %v4474_v39  ;;  %v4522_v5 = vmul.f32 %v5986_v0, %v5986_v0  ;;  %v4479_v11 = vsel %vm368_vm0, %v5986_v0, 0.0 }
 0x397   : > { %4418 = vst.msk [vmem:[%s7840_s27 + $0xe0] sm:$0xff] %vm368_vm0, %v5987_v33  ;;  %v4477_v1 = vsel %vm368_vm0, %v5987_v33, 0.0  ;;  %v4521_v23 = vmul.f32 %v5987_v33, %v5987_v33  ;;  %v5957_v17 = vpop.f32.mrb[30].mxu1 }
 0x398   : > { %v4478_v9 = vadd.f32 %v4477_v1, %v4476_v29  ;;  %v4579_v7 = vadd.f32 %v4578_v3, %v4577_v44  ;;  %v5988_v61 = vadd.f32 %v5957_v17, %v7834_v63  ;;  %v4349_v48 = vpop.f32.mrb[31].mxu1  ;;  %v4582_v19 = vsel %vm368_vm0, %v4522_v5, 0.0 }
 0x399   : > { %v4580_v13 = vsel %vm368_vm0, %v4521_v23, 0.0  ;;  %v5989_v25 = vadd.f32 %v4349_v48, %v7836_v60 }
 0x39a   : > { %v4581_v15 = vadd.f32 %v4580_v13, %v4579_v7  ;;  %4421 = vst.msk [vmem:[%s7840_s27 + $0xf8] sm:$0xff] %vm368_vm0, %v5988_v61  ;;  %v4480_v63 = vadd.f32 %v4479_v11, %v4478_v9  ;;  %v4524_v42 = vmul.f32 %v5988_v61, %v5988_v61 }
 0x39b   : > { %4420 = vst.msk [vmem:[%s7840_s27 + $0xf0] sm:$0xff] %vm368_vm0, %v5989_v25  ;;  %v4481_v22 = vsel %vm368_vm0, %v5989_v25, 0.0  ;;  %v4523_v10 = vmul.f32 %v5989_v25, %v5989_v25 }
 0x39c   : > { %v4482_v24 = vadd.f32 %v4481_v22, %v4480_v63  ;;  %v4583_v26 = vadd.f32 %v4582_v19, %v4581_v15 }
 0x39d   : > { %6468 = shalt.err (!%p6465_p13)
}
 0x39e   : > { %s6469_s30 = scalar_lea.hbm %s7989_s19, 4096  ;;  %s6473_s27 = scalar_lea.hbm %s8083_s5, 8192 }
 0x39f   : > { %p6470_p0 = scmp.ne.s32.totalorder %s7989_s19, %s6469_s30  ;;  %p6474_p9 = scmp.lt.u32.totalorder %s7989_s19, %s8083_s5 }
 0x3a0   : > { %p6475_p12 = scmp.lt.u32.totalorder %s6473_s27, %s6469_s30  ;;  %p6477_p1 = scmp.lt.u32.totalorder %s6469_s30, %s7989_s19 }
 0x3a1   : > { %p6471_p5 = pnand %p6470_p0, %p6773_p4 }
 0x3a2   : > { %p6476_p2 = por %p6475_p12, %p6474_p9 }
 0x3a3   : > { %p6472_p11 = pneg %p6471_p5 }
 0x3a4   : > { %p6478_p6 = por %p6477_p1, %p6476_p2 }
 0x3a6   : > { %p6479_p8 = pnand %p6478_p6, %p6472_p11 }
 0x3a8   : > { %6482 = shalt.err (!%p6479_p8)
}
 0x3a9   : > { %s6574_s18 = smov 128   ;;  %s6575_s12 = smov 8   ;;  %v4483_v60 = vsel %vm368_vm0, %v5988_v61, 0.0  ;;  %v4584_v28 = vsel %vm368_vm0, %v4523_v10, 0.0  ;;  %v4586_v49 = vsel %vm368_vm0, %v4524_v42, 0.0  ;;  %vm4491_vm1 = vcmask 57344  }
 0x3aa   : > { %6232 = dma.vmem_to_hbm [thread:$0]  (%p6773_p4), %s7991_s17, 4096, %s7989_s19, %s4596_s16, %s6574_s18, %s6574_s18, %s6575_s12   ;;  %v4484_v27 = vadd.f32 %v4483_v60, %v4482_v24  ;;  %v4585_v32 = vadd.f32 %v4584_v28, %v4583_v26 }
 0x3ab   : > { %s4787_s26 = sshll.u32 %s6822_s14, 1  ;;  %s5123_s17 = sshll.u32 %s6633_s25, 5 }
 0x3ac   : > { %v4485_v36 = vrot.slane %v4484_v27, 4  ;;  %v4587_v38 = vadd.f32 %v4586_v49, %v4585_v32  ;;  %s332_s19 = scalar_lea.vmem [#allocation13], %s4787_s26  ;;  %s8034_s30 = scalar_lea.hbm %s8084_s6, %s5123_s17 }
 0x3ad   : > { %s4630_s16 = sshll.u32 %s332_s19, 4  ;;  %s4601_s15 = scalar_lea.sflag [#allocation14], %s6822_s14  ;;  %s8036_s16 = int_to_ptr.vmem [resolvable:$true] %s4630_s16 }
 0x3ae   : > { %v4486_v41 = vadd.f32 %v4485_v36, %v4484_v27  ;;  %v4588_v12 = vrot.slane %v4587_v38, 4  ;;  %s6483_s10 = scalar_lea.vmem %s8036_s16, 32  ;;  %s6576_s25 = smov [#allocation13]  }
 0x3af   : > { %p6484_p3 = scmp.ne.s32.totalorder %s8036_s16, %s6483_s10  ;;  %s6487_s27 = sshll.u32 %s6576_s25, 4  ;;  %s6488_s27 = int_to_ptr.vmem [resolvable:$false] %s6487_s27 }
 0x3b0   : > { %v4487_v31 = vrot.slane %v4486_v41, 2  ;;  %v4589_v53 = vadd.f32 %v4588_v12, %v4587_v38  ;;  %s6489_s29 = scalar_lea.vmem %s6488_s27, 64  ;;  %p6490_p13 = scmp.lt.s32.totalorder %s8036_s16, %s6488_s27 }
 0x3b1   : > { %p6485_p7 = pnand %p6484_p3, %p6773_p4  ;;  %p6491_p0 = scmp.lt.s32.totalorder %s6489_s29, %s6483_s10 }
 0x3b2   : > { %v4488_v58 = vadd.f32 %v4487_v31, %v4486_v41  ;;  %v4590_v54 = vrot.slane %v4589_v53, 2 }
 0x3b3   : > { %p6486_p10 = pneg %p6485_p7  ;;  %p6492_p5 = por %p6491_p0, %p6490_p13 }
 0x3b4   : > { %v4489_v51 = vrot.slane %v4488_v58, 1  ;;  %v4591_v46 = vadd.f32 %v4590_v54, %v4589_v53 }
 0x3b5   : > { %p6493_p11 = pnand %p6492_p5, %p6486_p10 }
 0x3b6   : > { %v4490_v35 = vadd.f32 %v4489_v51, %v4488_v58  ;;  %v4592_v14 = vrot.slane %v4591_v46, 1 }
 0x3b8   : > { %v4593_v21 = vadd.f32 %v4592_v14, %v4591_v46  ;;  %4492 = vst.msk [vmem:[%s332_s19] sm:$0x1] %vm4491_vm1, %v4490_v35 }
 0x3ba   : > { %4594 = vst.msk [vmem:[%s332_s19 + $0x1] sm:$0x1] %vm4491_vm1, %v4593_v21 }
 0x3bb   : > { %6496 = shalt.err (!%p6493_p11)
}
 0x3bc   : > { %s6497_s14 = scalar_lea.hbm %s8034_s30, 32  ;;  %s6501_s12 = scalar_lea.hbm %s8084_s6, 64 }
 0x3bd   : > { %p6498_p9 = scmp.ne.s32.totalorder %s8034_s30, %s6497_s14  ;;  %p6502_p1 = scmp.lt.u32.totalorder %s8034_s30, %s8084_s6 }
 0x3be   : > { %p6503_p6 = scmp.lt.u32.totalorder %s6501_s12, %s6497_s14  ;;  %p6505_p3 = scmp.lt.u32.totalorder %s6497_s14, %s8034_s30 }
 0x3bf   : > { %p6499_p12 = pnand %p6498_p9, %p6773_p4 }
 0x3c0   : > { %p6504_p8 = por %p6503_p6, %p6502_p1 }
 0x3c1   : > { %p6500_p2 = pneg %p6499_p12 }
 0x3c2   : > { %p6506_p7 = por %p6505_p3, %p6504_p8 }
 0x3c4   : > { %p6507_p10 = pnand %p6506_p7, %p6500_p2 }
 0x3c6   : > { %6510 = shalt.err (!%p6507_p10)
}
 0x3c7   : > { %6233 = dma.vmem_to_hbm [thread:$0]  (%p6773_p4), %s8036_s16, 32, %s8034_s30, %s4601_s15  }
 0x3c8 PF: > { %s4642_s19 = sand.u32 1, %s6549_s21   ;;  %p8177_p13 = scmp.ne.s32.totalorder %s8114_s28, 0 }
 0x3c9   : > { %p8178_p0 = scmp.ge.s32.totalorder %s6561_s24, 2  ;;  %s4643_s7 = scalar_lea.sflag [#allocation5], %s4642_s19 }
 0x3cb   : > { %p6254_p5 = pnand %p8178_p0, %p8177_p13 }
 0x3cd   : > { %6540 = dma.done.wait (!%p6254_p5), %s4643_s7, 4096  }
 0x3ce   : > { %6542 = vsyncadd (!%p6254_p5), %s4643_s7, 4294963200  ;;  %s4652_s8 = scalar_lea.sflag [#allocation14], %s4642_s19 }
 0x3cf   : > { %6544 = dma.done.wait (!%p6254_p5), %s4652_s8, 32  }
 0x3d0   : > { %6546 = vsyncadd (!%p6254_p5), %s4652_s8, 4294967264  ;;  %p25_p4 = scmp.ge.s32.totalorder %s6760_s20, 4   ;;  %s8179_s21 = smov %s6553_s22 }
 0x3d1   : > { %s8180_s22 = smov %s6557_s23  ;;  %s8181_s23 = smov %s6769_s11 }
 0x3d2   : > { %s8182_s24 = smov %s6760_s20  ;;  %27 = sbr.rel (!%p25_p4) target bundleno = 9 (0x9), region = 129 }
 0x3d9   :  { %4657 = vsyncpa [#allocation4], 1 }
 0x3da   :  { %4659 = vsyncpa [#allocation4 + $0x1], 1 }
 0x3db   :  { %4660 = vsyncpa [#allocation7], 1 }
 0x3dc   :  { %4661 = vsyncpa [#allocation10], 1 }
 0x3dd   :  { %4662 = vsyncpa [#allocation5], 1 }
 0x3de   :  { %4664 = vsyncpa [#allocation5 + $0x1], 1 }
 0x3df   :  { %4665 = vsyncpa [#allocation14], 1 }
 0x3e0   :  { %4667 = vsyncpa [#allocation14 + $0x1], 1 }

</bundles_post_ra>
